<compile_context>
chip_gen: v6e
topology: v6e:2x2x1
jax: 0.10.0
libtpu: 0.0.40
codegen_flags: <defaults>
</compile_context>

<pallas_src>
import functools
import math

import jax
import jax.numpy as jnp
from jax.experimental import pallas as pl
from jax.experimental.pallas import tpu as pltpu


# ----------------------------------------------------------------------------
# Exact (erf-based) GELU, matching torch.nn.functional.gelu default.
# erf via the Abramowitz & Stegun 7.1.26 polynomial (|err| <= 1.5e-7, i.e.
# exact at f32 for GELU) using only ops guaranteed to lower in Mosaic.
# ----------------------------------------------------------------------------
def _erf_approx(x):
    ax = jnp.abs(x)
    t = 1.0 / (1.0 + 0.3275911 * ax)
    poly = t * (0.254829592 + t * (-0.284496736 + t * (1.421413741
                + t * (-1.453152027 + t * 1.061405429))))
    y = 1.0 - poly * jnp.exp(-ax * ax)
    return jnp.where(x < 0.0, -y, y)


def _gelu_exact(x):
    return 0.5 * x * (1.0 + _erf_approx(x * 0.7071067811865476))


# ----------------------------------------------------------------------------
# Fused DWFFN kernel (one batch image per grid step).
#   x_ref     : [(H+2)*(W+2), dim]    zero-padded, channel-last, flat spatial
#   w_in_ref  : [dim, 2*hidden]       project_in  (1x1 conv as GEMM)
#   w_dw_ref  : [9, 2*hidden]         depthwise taps, k = ki*3 + kj
#   w_out_ref : [2*hidden, dim]       project_out with zero rows [hidden:)
#   o_ref     : [H*(W+2), dim]        width-padded rows (wrapper slices :W)
#   y_s       : VMEM [(H+2)*(W+2)+8, 2*hidden]  project_in output + zero tail
# ----------------------------------------------------------------------------
def _dwffn_kernel(x_ref, w_in_ref, w_dw_ref, w_out_ref, o_ref, y_s,
                  *, Wp2, n_rows, hidden, chunk):
    P = x_ref.shape[0]                       # (H+2)*(W+2)
    c2 = w_in_ref.shape[1]                   # 2*hidden
    tail = y_s.shape[0] - P                  # zero tail (>= 2 needed, 8 used)

    # ---- project_in: 1x1 conv == one GEMM, result stays in VMEM -------------
    # (input was spatially zero-padded in the wrapper; a bias-free 1x1 conv
    #  maps zero rows to zero rows, so the halo of y_s is zero as required.)
    y_s[pl.ds(0, P), :] = jnp.dot(x_ref[...], w_in_ref[...],
                                  preferred_element_type=jnp.float32)
    # Zero tail: the two garbage halo columns of the very last row read up to
    # 2 rows past P; keep those reads in-bounds and deterministic.
    y_s[pl.ds(P, tail), :] = jnp.zeros((tail, c2), jnp.float32)

    # Per-tap depthwise weights, hoisted out of the chunk loop (9 vregs).
    w_taps = [w_dw_ref[pl.ds(k, 1), :] for k in range(9)]        # each (1, 2h)

    # ---- 3x3 depthwise + gated GELU + project_out, chunked over rows --------
    # Row space is the width-padded flat index q = oi*(W+2) + oj, oj in
    # [0, W+2); every tap is then a contiguous slice y_s[q + di*(W+2) + dj].
    for start in range(0, n_rows, chunk):
        rows = min(chunk, n_rows - start)

        acc = y_s[pl.ds(start, rows), :] * w_taps[0]
        for di in range(3):
            for dj in range(3):
                if di == 0 and dj == 0:
                    continue
                off = di * Wp2 + dj
                acc = acc + y_s[pl.ds(start + off, rows), :] * w_taps[di * 3 + dj]

        # gated[:, c] = gelu(acc[:, c]) * acc[:, (c + hidden) % (2*hidden)].
        # Roll by `hidden` is symmetric (2h/2); lanes >= hidden hold garbage
        # that the zero rows of w_out_ref cancel in the GEMM below.
        gated = _gelu_exact(acc) * pltpu.roll(acc, hidden, 1)

        o_ref[pl.ds(start, rows), :] = jnp.dot(
            gated, w_out_ref[...],
            preferred_element_type=jnp.float32).astype(o_ref.dtype)


# ----------------------------------------------------------------------------
# Wrapper (public API keeps PyTorch's NCHW convention).
# ----------------------------------------------------------------------------
def dwffn_forward(params, x):
    """DWFFN forward. x: NCHW [B, dim, H, W] -> NCHW [B, dim, H, W]."""
    w_in, w_dw, w_out = params["w_in"], params["w_dw"], params["w_out"]
    B, dim, H, W = x.shape
    c2 = w_in.shape[1]
    hidden = c2 // 2
    Hp2, Wp2 = H + 2, W + 2
    P = Hp2 * Wp2
    n_rows = H * Wp2                       # width-padded output rows per image
    chunk = min(96, n_rows)                # 12 vregs of work per chunk slice

    # NCHW -> channel-last, zero-pad the 3x3 halo once, flatten spatial.
    x_nhwc = jnp.transpose(x, (0, 2, 3, 1))
    xp = jnp.pad(x_nhwc, ((0, 0), (1, 1), (1, 1), (0, 0)))
    xp = xp.reshape(B, P, dim)

    # Zero rows for channels [hidden, 2*hidden): cancel the garbage lanes of
    # the rolled gate and keep the final GEMM K lane-dense (K = 2*hidden).
    w_out_pad = jnp.concatenate([w_out, jnp.zeros_like(w_out)], axis=0)

    kernel = functools.partial(_dwffn_kernel, Wp2=Wp2, n_rows=n_rows,
                               hidden=hidden, chunk=chunk)
    out = pl.pallas_call(
        kernel,
        out_shape=jax.ShapeDtypeStruct((B, n_rows, dim), x.dtype),
        grid_spec=pltpu.PrefetchScalarGridSpec(
            num_scalar_prefetch=0,
            grid=(B,),
            in_specs=[
                pl.BlockSpec((None, P, dim), lambda b: (b, 0, 0)),
                pl.BlockSpec((dim, c2), lambda b: (0, 0)),
                pl.BlockSpec((9, c2), lambda b: (0, 0)),
                pl.BlockSpec((c2, dim), lambda b: (0, 0)),
            ],
            out_specs=pl.BlockSpec((None, n_rows, dim), lambda b: (b, 0, 0)),
            scratch_shapes=[
                pltpu.VMEM((P + 8, c2), jnp.float32),   # project_in output
            ],
        ),
        compiler_params=pltpu.CompilerParams(
            dimension_semantics=("parallel",)),
    )(xp, w_in, w_dw, w_out_pad)

    # TODO(synk): output last dim is `dim`=32 (<128 lanes) so the store is a
    # masked vst; at ~37 KiB/image repacking to a lane-dense slab is not worth
    # the in-kernel relayout.
    out = out.reshape(B, H, Wp2, dim)[:, :, :W, :]   # drop width-halo columns
    return jnp.transpose(out, (0, 3, 1, 2))


# ----------------------------------------------------------------------------
# Pure-JAX reference (for a correctness sanity check only).
# ----------------------------------------------------------------------------
def dwffn_reference(params, x):
    w_in, w_dw, w_out = params["w_in"], params["w_dw"], params["w_out"]
    B, dim, H, W = x.shape
    hidden = w_in.shape[1] // 2
    hi = jax.lax.Precision.HIGHEST
    xt = jnp.transpose(x, (0, 2, 3, 1))
    y = jnp.einsum("bhwc,cd->bhwd", xt, w_in, precision=hi)
    yp = jnp.pad(y, ((0, 0), (1, 1), (1, 1), (0, 0)))
    acc = jnp.zeros_like(y)
    for di in range(3):
        for dj in range(3):
            acc = acc + yp[:, di:di + H, dj:dj + W, :] * w_dw[di * 3 + dj]
    x1, x2 = acc[..., :hidden], acc[..., hidden:]
    g = jax.nn.gelu(x1, approximate=False) * x2
    out = jnp.einsum("bhwc,cd->bhwd", g, w_out, precision=hi)
    return jnp.transpose(out, (0, 3, 1, 2))


# ----------------------------------------------------------------------------
# Deterministic parameter init (channel-last GEMM layouts).
#   w_in  [dim, 2h]  == torch project_in.weight.reshape(2h, dim).T
#   w_dw  [9, 2h]    == torch dwconv.weight.reshape(2h, 9).T   (tap k = ki*3+kj)
#   w_out [h, dim]   == torch project_out.weight.reshape(dim, h).T
# (all convs are bias=False in the reference module)
# ----------------------------------------------------------------------------
def init_params(key, dim, ffn_expansion_factor=2.0):
    hidden = int(dim * ffn_expansion_factor)
    c2 = 2 * hidden
    k1, k2, k3 = jax.random.split(key, 3)
    w_in = jax.random.normal(k1, (dim, c2), jnp.float32) * (1.0 / math.sqrt(dim))
    w_dw = jax.random.normal(k2, (9, c2), jnp.float32) * (1.0 / 3.0)
    w_out = jax.random.normal(k3, (hidden, dim), jnp.float32) * (1.0 / math.sqrt(hidden))
    return {"w_in": w_in, "w_dw": w_dw, "w_out": w_out}


if __name__ == "__main__":
    B, dim, H, W = 2, 32, 16, 16
    ffn_expansion_factor = 2.0

    key = jax.random.PRNGKey(0)
    kp, kx = jax.random.split(key)
    params = init_params(kp, dim, ffn_expansion_factor)
    x = jax.random.normal(kx, (B, dim, H, W), jnp.float32)

    fwd = jax.jit(dwffn_forward)
    out = fwd(params, x)
    jax.block_until_ready(out)

    assert out.shape == (B, dim, H, W)
    assert bool(jnp.isfinite(out).all())

    # Loose tolerance: the in-kernel MXU f32 matmul precision may differ from
    # the HIGHEST-precision XLA reference; structural bugs would be O(1).
    ref = dwffn_reference(params, x)
    max_err = float(jnp.max(jnp.abs(out - ref)))
    assert max_err < 5e-2, f"max abs err {max_err}"

    print("KERNEL_OK")
</pallas_src>

<mosaic_0001>
module attributes {stable_mosaic.version = 11 : i64} {
  func.func @_dwffn_kernel(%arg0: i32, %arg1: memref<1x324x32xf32, #tpu.memory_space<vmem>>, %arg2: memref<32x128xf32, #tpu.memory_space<vmem>>, %arg3: memref<9x128xf32, #tpu.memory_space<vmem>>, %arg4: memref<128x32xf32, #tpu.memory_space<vmem>>, %arg5: memref<1x288x32xf32, #tpu.memory_space<vmem>>, %arg6: memref<332x128xf32, #tpu.memory_space<vmem>>) attributes {dimension_semantics = [#tpu.dimension_semantics<parallel>], iteration_bounds = array<i64: 2>, scalar_prefetch = 0 : i64, scratch_operands = 1 : i64, tpu.core_type = #tpu.core_type<tc>, window_params = [{transform_indices = @transform_0, window_bounds = array<i64: 1, 324, 32>}, {pipeline_mode = #tpu.pipeline_mode<synchronous>, transform_indices = @transform_1, window_bounds = array<i64: 32, 128>}, {pipeline_mode = #tpu.pipeline_mode<synchronous>, transform_indices = @transform_2, window_bounds = array<i64: 9, 128>}, {pipeline_mode = #tpu.pipeline_mode<synchronous>, transform_indices = @transform_3, window_bounds = array<i64: 128, 32>}, {transform_indices = @transform_4, window_bounds = array<i64: 1, 288, 32>}]} {
    %c0 = arith.constant 0 : index
    %c0_0 = arith.constant 0 : index
    %c0_1 = arith.constant 0 : index
    %0 = vector.load %arg1[%c0, %c0_0, %c0_1] : memref<1x324x32xf32, #tpu.memory_space<vmem>>, vector<1x324x32xf32>
    %1 = vector.shape_cast %0 : vector<1x324x32xf32> to vector<324x32xf32>
    %c0_2 = arith.constant 0 : index
    %c0_3 = arith.constant 0 : index
    %2 = vector.load %arg2[%c0_2, %c0_3] : memref<32x128xf32, #tpu.memory_space<vmem>>, vector<32x128xf32>
    %cst = arith.constant dense<0.000000e+00> : vector<324x128xf32>
    %3 = tpu.matmul %1, %2, %cst {dimension_numbers = #tpu.dot_dimension_numbers<[1], [0], [0], [1], [0, 0, 1, 1], [], []>} : vector<324x32xf32>, vector<32x128xf32>, vector<324x128xf32> -> vector<324x128xf32>
    %c0_4 = arith.constant 0 : index
    %c0_5 = arith.constant 0 : index
    %4 = vector.load %arg6[%c0_4, %c0_5] : memref<332x128xf32, #tpu.memory_space<vmem>>, vector<324x128xf32>
    tpu.vector_store %arg6[%c0_4, %c0_5], %3 {strides = array<i32>} : memref<332x128xf32, #tpu.memory_space<vmem>>, vector<324x128xf32>,
    %cst_6 = arith.constant 0.000000e+00 : f32
    %5 = vector.broadcast %cst_6 : f32 to vector<8x128xf32>
    %c324 = arith.constant 324 : index
    %c0_7 = arith.constant 0 : index
    %6 = vector.load %arg6[%c324, %c0_7] : memref<332x128xf32, #tpu.memory_space<vmem>>, vector<8x128xf32>
    tpu.vector_store %arg6[%c324, %c0_7], %5 {strides = array<i32>} : memref<332x128xf32, #tpu.memory_space<vmem>>, vector<8x128xf32>,
    %c0_8 = arith.constant 0 : index
    %c0_9 = arith.constant 0 : index
    %7 = vector.load %arg3[%c0_8, %c0_9] : memref<9x128xf32, #tpu.memory_space<vmem>>, vector<1x128xf32>
    %c1 = arith.constant 1 : index
    %c0_10 = arith.constant 0 : index
    %8 = vector.load %arg3[%c1, %c0_10] : memref<9x128xf32, #tpu.memory_space<vmem>>, vector<1x128xf32>
    %c2 = arith.constant 2 : index
    %c0_11 = arith.constant 0 : index
    %9 = vector.load %arg3[%c2, %c0_11] : memref<9x128xf32, #tpu.memory_space<vmem>>, vector<1x128xf32>
    %c3 = arith.constant 3 : index
    %c0_12 = arith.constant 0 : index
    %10 = vector.load %arg3[%c3, %c0_12] : memref<9x128xf32, #tpu.memory_space<vmem>>, vector<1x128xf32>
    %c4 = arith.constant 4 : index
    %c0_13 = arith.constant 0 : index
    %11 = vector.load %arg3[%c4, %c0_13] : memref<9x128xf32, #tpu.memory_space<vmem>>, vector<1x128xf32>
    %c5 = arith.constant 5 : index
    %c0_14 = arith.constant 0 : index
    %12 = vector.load %arg3[%c5, %c0_14] : memref<9x128xf32, #tpu.memory_space<vmem>>, vector<1x128xf32>
    %c6 = arith.constant 6 : index
    %c0_15 = arith.constant 0 : index
    %13 = vector.load %arg3[%c6, %c0_15] : memref<9x128xf32, #tpu.memory_space<vmem>>, vector<1x128xf32>
    %c7 = arith.constant 7 : index
    %c0_16 = arith.constant 0 : index
    %14 = vector.load %arg3[%c7, %c0_16] : memref<9x128xf32, #tpu.memory_space<vmem>>, vector<1x128xf32>
    %c8 = arith.constant 8 : index
    %c0_17 = arith.constant 0 : index
    %15 = vector.load %arg3[%c8, %c0_17] : memref<9x128xf32, #tpu.memory_space<vmem>>, vector<1x128xf32>
    %c0_18 = arith.constant 0 : index
    %c0_19 = arith.constant 0 : index
    %16 = vector.load %arg6[%c0_18, %c0_19] : memref<332x128xf32, #tpu.memory_space<vmem>>, vector<96x128xf32>
    %17 = vector.broadcast %7 : vector<1x128xf32> to vector<96x128xf32>
    %18 = arith.mulf %16, %17 : vector<96x128xf32>
    %c1_20 = arith.constant 1 : index
    %c0_21 = arith.constant 0 : index
    %19 = vector.load %arg6[%c1_20, %c0_21] : memref<332x128xf32, #tpu.memory_space<vmem>>, vector<96x128xf32>
    %20 = vector.broadcast %8 : vector<1x128xf32> to vector<96x128xf32>
    %21 = arith.mulf %19, %20 : vector<96x128xf32>
    %22 = arith.addf %18, %21 : vector<96x128xf32>
    %c2_22 = arith.constant 2 : index
    %c0_23 = arith.constant 0 : index
    %23 = vector.load %arg6[%c2_22, %c0_23] : memref<332x128xf32, #tpu.memory_space<vmem>>, vector<96x128xf32>
    %24 = vector.broadcast %9 : vector<1x128xf32> to vector<96x128xf32>
    %25 = arith.mulf %23, %24 : vector<96x128xf32>
    %26 = arith.addf %22, %25 : vector<96x128xf32>
    %c18 = arith.constant 18 : index
    %c0_24 = arith.constant 0 : index
    %27 = vector.load %arg6[%c18, %c0_24] : memref<332x128xf32, #tpu.memory_space<vmem>>, vector<96x128xf32>
    %28 = vector.broadcast %10 : vector<1x128xf32> to vector<96x128xf32>
    %29 = arith.mulf %27, %28 : vector<96x128xf32>
    %30 = arith.addf %26, %29 : vector<96x128xf32>
    %c19 = arith.constant 19 : index
    %c0_25 = arith.constant 0 : index
    %31 = vector.load %arg6[%c19, %c0_25] : memref<332x128xf32, #tpu.memory_space<vmem>>, vector<96x128xf32>
    %32 = vector.broadcast %11 : vector<1x128xf32> to vector<96x128xf32>
    %33 = arith.mulf %31, %32 : vector<96x128xf32>
    %34 = arith.addf %30, %33 : vector<96x128xf32>
    %c20 = arith.constant 20 : index
    %c0_26 = arith.constant 0 : index
    %35 = vector.load %arg6[%c20, %c0_26] : memref<332x128xf32, #tpu.memory_space<vmem>>, vector<96x128xf32>
    %36 = vector.broadcast %12 : vector<1x128xf32> to vector<96x128xf32>
    %37 = arith.mulf %35, %36 : vector<96x128xf32>
    %38 = arith.addf %34, %37 : vector<96x128xf32>
    %c36 = arith.constant 36 : index
    %c0_27 = arith.constant 0 : index
    %39 = vector.load %arg6[%c36, %c0_27] : memref<332x128xf32, #tpu.memory_space<vmem>>, vector<96x128xf32>
    %40 = vector.broadcast %13 : vector<1x128xf32> to vector<96x128xf32>
    %41 = arith.mulf %39, %40 : vector<96x128xf32>
    %42 = arith.addf %38, %41 : vector<96x128xf32>
    %c37 = arith.constant 37 : index
    %c0_28 = arith.constant 0 : index
    %43 = vector.load %arg6[%c37, %c0_28] : memref<332x128xf32, #tpu.memory_space<vmem>>, vector<96x128xf32>
    %44 = vector.broadcast %14 : vector<1x128xf32> to vector<96x128xf32>
    %45 = arith.mulf %43, %44 : vector<96x128xf32>
    %46 = arith.addf %42, %45 : vector<96x128xf32>
    %c38 = arith.constant 38 : index
    %c0_29 = arith.constant 0 : index
    %47 = vector.load %arg6[%c38, %c0_29] : memref<332x128xf32, #tpu.memory_space<vmem>>, vector<96x128xf32>
    %48 = vector.broadcast %15 : vector<1x128xf32> to vector<96x128xf32>
    %49 = arith.mulf %47, %48 : vector<96x128xf32>
    %50 = arith.addf %46, %49 : vector<96x128xf32>
    %cst_30 = arith.constant 5.000000e-01 : f32
    %51 = vector.broadcast %cst_30 : f32 to vector<96x128xf32>
    %52 = arith.mulf %51, %50 : vector<96x128xf32>
    %cst_31 = arith.constant 0.707106769 : f32
    %53 = vector.broadcast %cst_31 : f32 to vector<96x128xf32>
    %54 = arith.mulf %50, %53 : vector<96x128xf32>
    %55 = math.absf %54 : vector<96x128xf32>
    %cst_32 = arith.constant 0.327591091 : f32
    %56 = vector.broadcast %cst_32 : f32 to vector<96x128xf32>
    %57 = arith.mulf %56, %55 : vector<96x128xf32>
    %cst_33 = arith.constant 1.000000e+00 : f32
    %58 = vector.broadcast %cst_33 : f32 to vector<96x128xf32>
    %59 = arith.addf %58, %57 : vector<96x128xf32>
    %cst_34 = arith.constant 1.000000e+00 : f32
    %60 = vector.broadcast %cst_34 : f32 to vector<96x128xf32>
    %61 = arith.divf %60, %59 : vector<96x128xf32>
    %cst_35 = arith.constant 1.06140542 : f32
    %62 = vector.broadcast %cst_35 : f32 to vector<96x128xf32>
    %63 = arith.mulf %61, %62 : vector<96x128xf32>
    %cst_36 = arith.constant -1.45315206 : f32
    %64 = vector.broadcast %cst_36 : f32 to vector<96x128xf32>
    %65 = arith.addf %64, %63 : vector<96x128xf32>
    %66 = arith.mulf %61, %65 : vector<96x128xf32>
    %cst_37 = arith.constant 1.42141378 : f32
    %67 = vector.broadcast %cst_37 : f32 to vector<96x128xf32>
    %68 = arith.addf %67, %66 : vector<96x128xf32>
    %69 = arith.mulf %61, %68 : vector<96x128xf32>
    %cst_38 = arith.constant -0.284496725 : f32
    %70 = vector.broadcast %cst_38 : f32 to vector<96x128xf32>
    %71 = arith.addf %70, %69 : vector<96x128xf32>
    %72 = arith.mulf %61, %71 : vector<96x128xf32>
    %cst_39 = arith.constant 0.254829586 : f32
    %73 = vector.broadcast %cst_39 : f32 to vector<96x128xf32>
    %74 = arith.addf %73, %72 : vector<96x128xf32>
    %75 = arith.mulf %61, %74 : vector<96x128xf32>
    %cst_40 = arith.constant 0.000000e+00 : f32
    %76 = vector.broadcast %cst_40 : f32 to vector<96x128xf32>
    %77 = arith.subf %76, %55 : vector<96x128xf32>
    %78 = arith.mulf %77, %55 : vector<96x128xf32>
    %79 = math.exp %78 : vector<96x128xf32>
    %80 = arith.mulf %75, %79 : vector<96x128xf32>
    %cst_41 = arith.constant 1.000000e+00 : f32
    %81 = vector.broadcast %cst_41 : f32 to vector<96x128xf32>
    %82 = arith.subf %81, %80 : vector<96x128xf32>
    %cst_42 = arith.constant 0.000000e+00 : f32
    %83 = vector.broadcast %cst_42 : f32 to vector<96x128xf32>
    %84 = arith.cmpf olt, %54, %83 : vector<96x128xf32>
    %cst_43 = arith.constant 0.000000e+00 : f32
    %85 = vector.broadcast %cst_43 : f32 to vector<96x128xf32>
    %86 = arith.subf %85, %82 : vector<96x128xf32>
    %87 = arith.select %84, %86, %82 : vector<96x128xi1>, vector<96x128xf32>
    %cst_44 = arith.constant 1.000000e+00 : f32
    %88 = vector.broadcast %cst_44 : f32 to vector<96x128xf32>
    %89 = arith.addf %88, %87 : vector<96x128xf32>
    %90 = arith.mulf %52, %89 : vector<96x128xf32>
    %c64_i32 = arith.constant 64 : i32
    %91 = tpu.dynamic_rotate %50 by %c64_i32 dim 1 : vector<96x128xf32>, i32 -> vector<96x128xf32>
    %92 = arith.mulf %90, %91 : vector<96x128xf32>
    %c0_45 = arith.constant 0 : index
    %c0_46 = arith.constant 0 : index
    %93 = vector.load %arg4[%c0_45, %c0_46] : memref<128x32xf32, #tpu.memory_space<vmem>>, vector<128x32xf32>
    %cst_47 = arith.constant dense<0.000000e+00> : vector<96x32xf32>
    %94 = tpu.matmul %92, %93, %cst_47 {dimension_numbers = #tpu.dot_dimension_numbers<[1], [0], [0], [1], [0, 0, 1, 1], [], []>} : vector<96x128xf32>, vector<128x32xf32>, vector<96x32xf32> -> vector<96x32xf32>
    %c0_48 = arith.constant 0 : index
    %c0_49 = arith.constant 0 : index
    %c0_50 = arith.constant 0 : index
    %95 = vector.load %arg5[%c0_48, %c0_49, %c0_50] : memref<1x288x32xf32, #tpu.memory_space<vmem>>, vector<1x96x32xf32>
    %96 = vector.shape_cast %95 : vector<1x96x32xf32> to vector<96x32xf32>
    %97 = vector.shape_cast %94 : vector<96x32xf32> to vector<1x96x32xf32>
    tpu.vector_store %arg5[%c0_48, %c0_49, %c0_50], %97 {strides = array<i32>} : memref<1x288x32xf32, #tpu.memory_space<vmem>>, vector<1x96x32xf32>,
    %c96 = arith.constant 96 : index
    %c0_51 = arith.constant 0 : index
    %98 = vector.load %arg6[%c96, %c0_51] : memref<332x128xf32, #tpu.memory_space<vmem>>, vector<96x128xf32>
    %99 = vector.broadcast %7 : vector<1x128xf32> to vector<96x128xf32>
    %100 = arith.mulf %98, %99 : vector<96x128xf32>
    %c97 = arith.constant 97 : index
    %c0_52 = arith.constant 0 : index
    %101 = vector.load %arg6[%c97, %c0_52] : memref<332x128xf32, #tpu.memory_space<vmem>>, vector<96x128xf32>
    %102 = vector.broadcast %8 : vector<1x128xf32> to vector<96x128xf32>
    %103 = arith.mulf %101, %102 : vector<96x128xf32>
    %104 = arith.addf %100, %103 : vector<96x128xf32>
    %c98 = arith.constant 98 : index
    %c0_53 = arith.constant 0 : index
    %105 = vector.load %arg6[%c98, %c0_53] : memref<332x128xf32, #tpu.memory_space<vmem>>, vector<96x128xf32>
    %106 = vector.broadcast %9 : vector<1x128xf32> to vector<96x128xf32>
    %107 = arith.mulf %105, %106 : vector<96x128xf32>
    %108 = arith.addf %104, %107 : vector<96x128xf32>
    %c114 = arith.constant 114 : index
    %c0_54 = arith.constant 0 : index
    %109 = vector.load %arg6[%c114, %c0_54] : memref<332x128xf32, #tpu.memory_space<vmem>>, vector<96x128xf32>
    %110 = vector.broadcast %10 : vector<1x128xf32> to vector<96x128xf32>
    %111 = arith.mulf %109, %110 : vector<96x128xf32>
    %112 = arith.addf %108, %111 : vector<96x128xf32>
    %c115 = arith.constant 115 : index
    %c0_55 = arith.constant 0 : index
    %113 = vector.load %arg6[%c115, %c0_55] : memref<332x128xf32, #tpu.memory_space<vmem>>, vector<96x128xf32>
    %114 = vector.broadcast %11 : vector<1x128xf32> to vector<96x128xf32>
    %115 = arith.mulf %113, %114 : vector<96x128xf32>
    %116 = arith.addf %112, %115 : vector<96x128xf32>
    %c116 = arith.constant 116 : index
    %c0_56 = arith.constant 0 : index
    %117 = vector.load %arg6[%c116, %c0_56] : memref<332x128xf32, #tpu.memory_space<vmem>>, vector<96x128xf32>
    %118 = vector.broadcast %12 : vector<1x128xf32> to vector<96x128xf32>
    %119 = arith.mulf %117, %118 : vector<96x128xf32>
    %120 = arith.addf %116, %119 : vector<96x128xf32>
    %c132 = arith.constant 132 : index
    %c0_57 = arith.constant 0 : index
    %121 = vector.load %arg6[%c132, %c0_57] : memref<332x128xf32, #tpu.memory_space<vmem>>, vector<96x128xf32>
    %122 = vector.broadcast %13 : vector<1x128xf32> to vector<96x128xf32>
    %123 = arith.mulf %121, %122 : vector<96x128xf32>
    %124 = arith.addf %120, %123 : vector<96x128xf32>
    %c133 = arith.constant 133 : index
    %c0_58 = arith.constant 0 : index
    %125 = vector.load %arg6[%c133, %c0_58] : memref<332x128xf32, #tpu.memory_space<vmem>>, vector<96x128xf32>
    %126 = vector.broadcast %14 : vector<1x128xf32> to vector<96x128xf32>
    %127 = arith.mulf %125, %126 : vector<96x128xf32>
    %128 = arith.addf %124, %127 : vector<96x128xf32>
    %c134 = arith.constant 134 : index
    %c0_59 = arith.constant 0 : index
    %129 = vector.load %arg6[%c134, %c0_59] : memref<332x128xf32, #tpu.memory_space<vmem>>, vector<96x128xf32>
    %130 = vector.broadcast %15 : vector<1x128xf32> to vector<96x128xf32>
    %131 = arith.mulf %129, %130 : vector<96x128xf32>
    %132 = arith.addf %128, %131 : vector<96x128xf32>
    %cst_60 = arith.constant 5.000000e-01 : f32
    %133 = vector.broadcast %cst_60 : f32 to vector<96x128xf32>
    %134 = arith.mulf %133, %132 : vector<96x128xf32>
    %cst_61 = arith.constant 0.707106769 : f32
    %135 = vector.broadcast %cst_61 : f32 to vector<96x128xf32>
    %136 = arith.mulf %132, %135 : vector<96x128xf32>
    %137 = math.absf %136 : vector<96x128xf32>
    %cst_62 = arith.constant 0.327591091 : f32
    %138 = vector.broadcast %cst_62 : f32 to vector<96x128xf32>
    %139 = arith.mulf %138, %137 : vector<96x128xf32>
    %cst_63 = arith.constant 1.000000e+00 : f32
    %140 = vector.broadcast %cst_63 : f32 to vector<96x128xf32>
    %141 = arith.addf %140, %139 : vector<96x128xf32>
    %cst_64 = arith.constant 1.000000e+00 : f32
    %142 = vector.broadcast %cst_64 : f32 to vector<96x128xf32>
    %143 = arith.divf %142, %141 : vector<96x128xf32>
    %cst_65 = arith.constant 1.06140542 : f32
    %144 = vector.broadcast %cst_65 : f32 to vector<96x128xf32>
    %145 = arith.mulf %143, %144 : vector<96x128xf32>
    %cst_66 = arith.constant -1.45315206 : f32
    %146 = vector.broadcast %cst_66 : f32 to vector<96x128xf32>
    %147 = arith.addf %146, %145 : vector<96x128xf32>
    %148 = arith.mulf %143, %147 : vector<96x128xf32>
    %cst_67 = arith.constant 1.42141378 : f32
    %149 = vector.broadcast %cst_67 : f32 to vector<96x128xf32>
    %150 = arith.addf %149, %148 : vector<96x128xf32>
    %151 = arith.mulf %143, %150 : vector<96x128xf32>
    %cst_68 = arith.constant -0.284496725 : f32
    %152 = vector.broadcast %cst_68 : f32 to vector<96x128xf32>
    %153 = arith.addf %152, %151 : vector<96x128xf32>
    %154 = arith.mulf %143, %153 : vector<96x128xf32>
    %cst_69 = arith.constant 0.254829586 : f32
    %155 = vector.broadcast %cst_69 : f32 to vector<96x128xf32>
    %156 = arith.addf %155, %154 : vector<96x128xf32>
    %157 = arith.mulf %143, %156 : vector<96x128xf32>
    %cst_70 = arith.constant 0.000000e+00 : f32
    %158 = vector.broadcast %cst_70 : f32 to vector<96x128xf32>
    %159 = arith.subf %158, %137 : vector<96x128xf32>
    %160 = arith.mulf %159, %137 : vector<96x128xf32>
    %161 = math.exp %160 : vector<96x128xf32>
    %162 = arith.mulf %157, %161 : vector<96x128xf32>
    %cst_71 = arith.constant 1.000000e+00 : f32
    %163 = vector.broadcast %cst_71 : f32 to vector<96x128xf32>
    %164 = arith.subf %163, %162 : vector<96x128xf32>
    %cst_72 = arith.constant 0.000000e+00 : f32
    %165 = vector.broadcast %cst_72 : f32 to vector<96x128xf32>
    %166 = arith.cmpf olt, %136, %165 : vector<96x128xf32>
    %cst_73 = arith.constant 0.000000e+00 : f32
    %167 = vector.broadcast %cst_73 : f32 to vector<96x128xf32>
    %168 = arith.subf %167, %164 : vector<96x128xf32>
    %169 = arith.select %166, %168, %164 : vector<96x128xi1>, vector<96x128xf32>
    %cst_74 = arith.constant 1.000000e+00 : f32
    %170 = vector.broadcast %cst_74 : f32 to vector<96x128xf32>
    %171 = arith.addf %170, %169 : vector<96x128xf32>
    %172 = arith.mulf %134, %171 : vector<96x128xf32>
    %c64_i32_75 = arith.constant 64 : i32
    %173 = tpu.dynamic_rotate %132 by %c64_i32_75 dim 1 : vector<96x128xf32>, i32 -> vector<96x128xf32>
    %174 = arith.mulf %172, %173 : vector<96x128xf32>
    %c0_76 = arith.constant 0 : index
    %c0_77 = arith.constant 0 : index
    %175 = vector.load %arg4[%c0_76, %c0_77] : memref<128x32xf32, #tpu.memory_space<vmem>>, vector<128x32xf32>
    %cst_78 = arith.constant dense<0.000000e+00> : vector<96x32xf32>
    %176 = tpu.matmul %174, %175, %cst_78 {dimension_numbers = #tpu.dot_dimension_numbers<[1], [0], [0], [1], [0, 0, 1, 1], [], []>} : vector<96x128xf32>, vector<128x32xf32>, vector<96x32xf32> -> vector<96x32xf32>
    %c0_79 = arith.constant 0 : index
    %c96_80 = arith.constant 96 : index
    %c0_81 = arith.constant 0 : index
    %177 = vector.load %arg5[%c0_79, %c96_80, %c0_81] : memref<1x288x32xf32, #tpu.memory_space<vmem>>, vector<1x96x32xf32>
    %178 = vector.shape_cast %177 : vector<1x96x32xf32> to vector<96x32xf32>
    %179 = vector.shape_cast %176 : vector<96x32xf32> to vector<1x96x32xf32>
    tpu.vector_store %arg5[%c0_79, %c96_80, %c0_81], %179 {strides = array<i32>} : memref<1x288x32xf32, #tpu.memory_space<vmem>>, vector<1x96x32xf32>,
    %c192 = arith.constant 192 : index
    %c0_82 = arith.constant 0 : index
    %180 = vector.load %arg6[%c192, %c0_82] : memref<332x128xf32, #tpu.memory_space<vmem>>, vector<96x128xf32>
    %181 = vector.broadcast %7 : vector<1x128xf32> to vector<96x128xf32>
    %182 = arith.mulf %180, %181 : vector<96x128xf32>
    %c193 = arith.constant 193 : index
    %c0_83 = arith.constant 0 : index
    %183 = vector.load %arg6[%c193, %c0_83] : memref<332x128xf32, #tpu.memory_space<vmem>>, vector<96x128xf32>
    %184 = vector.broadcast %8 : vector<1x128xf32> to vector<96x128xf32>
    %185 = arith.mulf %183, %184 : vector<96x128xf32>
    %186 = arith.addf %182, %185 : vector<96x128xf32>
    %c194 = arith.constant 194 : index
    %c0_84 = arith.constant 0 : index
    %187 = vector.load %arg6[%c194, %c0_84] : memref<332x128xf32, #tpu.memory_space<vmem>>, vector<96x128xf32>
    %188 = vector.broadcast %9 : vector<1x128xf32> to vector<96x128xf32>
    %189 = arith.mulf %187, %188 : vector<96x128xf32>
    %190 = arith.addf %186, %189 : vector<96x128xf32>
    %c210 = arith.constant 210 : index
    %c0_85 = arith.constant 0 : index
    %191 = vector.load %arg6[%c210, %c0_85] : memref<332x128xf32, #tpu.memory_space<vmem>>, vector<96x128xf32>
    %192 = vector.broadcast %10 : vector<1x128xf32> to vector<96x128xf32>
    %193 = arith.mulf %191, %192 : vector<96x128xf32>
    %194 = arith.addf %190, %193 : vector<96x128xf32>
    %c211 = arith.constant 211 : index
    %c0_86 = arith.constant 0 : index
    %195 = vector.load %arg6[%c211, %c0_86] : memref<332x128xf32, #tpu.memory_space<vmem>>, vector<96x128xf32>
    %196 = vector.broadcast %11 : vector<1x128xf32> to vector<96x128xf32>
    %197 = arith.mulf %195, %196 : vector<96x128xf32>
    %198 = arith.addf %194, %197 : vector<96x128xf32>
    %c212 = arith.constant 212 : index
    %c0_87 = arith.constant 0 : index
    %199 = vector.load %arg6[%c212, %c0_87] : memref<332x128xf32, #tpu.memory_space<vmem>>, vector<96x128xf32>
    %200 = vector.broadcast %12 : vector<1x128xf32> to vector<96x128xf32>
    %201 = arith.mulf %199, %200 : vector<96x128xf32>
    %202 = arith.addf %198, %201 : vector<96x128xf32>
    %c228 = arith.constant 228 : index
    %c0_88 = arith.constant 0 : index
    %203 = vector.load %arg6[%c228, %c0_88] : memref<332x128xf32, #tpu.memory_space<vmem>>, vector<96x128xf32>
    %204 = vector.broadcast %13 : vector<1x128xf32> to vector<96x128xf32>
    %205 = arith.mulf %203, %204 : vector<96x128xf32>
    %206 = arith.addf %202, %205 : vector<96x128xf32>
    %c229 = arith.constant 229 : index
    %c0_89 = arith.constant 0 : index
    %207 = vector.load %arg6[%c229, %c0_89] : memref<332x128xf32, #tpu.memory_space<vmem>>, vector<96x128xf32>
    %208 = vector.broadcast %14 : vector<1x128xf32> to vector<96x128xf32>
    %209 = arith.mulf %207, %208 : vector<96x128xf32>
    %210 = arith.addf %206, %209 : vector<96x128xf32>
    %c230 = arith.constant 230 : index
    %c0_90 = arith.constant 0 : index
    %211 = vector.load %arg6[%c230, %c0_90] : memref<332x128xf32, #tpu.memory_space<vmem>>, vector<96x128xf32>
    %212 = vector.broadcast %15 : vector<1x128xf32> to vector<96x128xf32>
    %213 = arith.mulf %211, %212 : vector<96x128xf32>
    %214 = arith.addf %210, %213 : vector<96x128xf32>
    %cst_91 = arith.constant 5.000000e-01 : f32
    %215 = vector.broadcast %cst_91 : f32 to vector<96x128xf32>
    %216 = arith.mulf %215, %214 : vector<96x128xf32>
    %cst_92 = arith.constant 0.707106769 : f32
    %217 = vector.broadcast %cst_92 : f32 to vector<96x128xf32>
    %218 = arith.mulf %214, %217 : vector<96x128xf32>
    %219 = math.absf %218 : vector<96x128xf32>
    %cst_93 = arith.constant 0.327591091 : f32
    %220 = vector.broadcast %cst_93 : f32 to vector<96x128xf32>
    %221 = arith.mulf %220, %219 : vector<96x128xf32>
    %cst_94 = arith.constant 1.000000e+00 : f32
    %222 = vector.broadcast %cst_94 : f32 to vector<96x128xf32>
    %223 = arith.addf %222, %221 : vector<96x128xf32>
    %cst_95 = arith.constant 1.000000e+00 : f32
    %224 = vector.broadcast %cst_95 : f32 to vector<96x128xf32>
    %225 = arith.divf %224, %223 : vector<96x128xf32>
    %cst_96 = arith.constant 1.06140542 : f32
    %226 = vector.broadcast %cst_96 : f32 to vector<96x128xf32>
    %227 = arith.mulf %225, %226 : vector<96x128xf32>
    %cst_97 = arith.constant -1.45315206 : f32
    %228 = vector.broadcast %cst_97 : f32 to vector<96x128xf32>
    %229 = arith.addf %228, %227 : vector<96x128xf32>
    %230 = arith.mulf %225, %229 : vector<96x128xf32>
    %cst_98 = arith.constant 1.42141378 : f32
    %231 = vector.broadcast %cst_98 : f32 to vector<96x128xf32>
    %232 = arith.addf %231, %230 : vector<96x128xf32>
    %233 = arith.mulf %225, %232 : vector<96x128xf32>
    %cst_99 = arith.constant -0.284496725 : f32
    %234 = vector.broadcast %cst_99 : f32 to vector<96x128xf32>
    %235 = arith.addf %234, %233 : vector<96x128xf32>
    %236 = arith.mulf %225, %235 : vector<96x128xf32>
    %cst_100 = arith.constant 0.254829586 : f32
    %237 = vector.broadcast %cst_100 : f32 to vector<96x128xf32>
    %238 = arith.addf %237, %236 : vector<96x128xf32>
    %239 = arith.mulf %225, %238 : vector<96x128xf32>
    %cst_101 = arith.constant 0.000000e+00 : f32
    %240 = vector.broadcast %cst_101 : f32 to vector<96x128xf32>
    %241 = arith.subf %240, %219 : vector<96x128xf32>
    %242 = arith.mulf %241, %219 : vector<96x128xf32>
    %243 = math.exp %242 : vector<96x128xf32>
    %244 = arith.mulf %239, %243 : vector<96x128xf32>
    %cst_102 = arith.constant 1.000000e+00 : f32
    %245 = vector.broadcast %cst_102 : f32 to vector<96x128xf32>
    %246 = arith.subf %245, %244 : vector<96x128xf32>
    %cst_103 = arith.constant 0.000000e+00 : f32
    %247 = vector.broadcast %cst_103 : f32 to vector<96x128xf32>
    %248 = arith.cmpf olt, %218, %247 : vector<96x128xf32>
    %cst_104 = arith.constant 0.000000e+00 : f32
    %249 = vector.broadcast %cst_104 : f32 to vector<96x128xf32>
    %250 = arith.subf %249, %246 : vector<96x128xf32>
    %251 = arith.select %248, %250, %246 : vector<96x128xi1>, vector<96x128xf32>
    %cst_105 = arith.constant 1.000000e+00 : f32
    %252 = vector.broadcast %cst_105 : f32 to vector<96x128xf32>
    %253 = arith.addf %252, %251 : vector<96x128xf32>
    %254 = arith.mulf %216, %253 : vector<96x128xf32>
    %c64_i32_106 = arith.constant 64 : i32
    %255 = tpu.dynamic_rotate %214 by %c64_i32_106 dim 1 : vector<96x128xf32>, i32 -> vector<96x128xf32>
    %256 = arith.mulf %254, %255 : vector<96x128xf32>
    %c0_107 = arith.constant 0 : index
    %c0_108 = arith.constant 0 : index
    %257 = vector.load %arg4[%c0_107, %c0_108] : memref<128x32xf32, #tpu.memory_space<vmem>>, vector<128x32xf32>
    %cst_109 = arith.constant dense<0.000000e+00> : vector<96x32xf32>
    %258 = tpu.matmul %256, %257, %cst_109 {dimension_numbers = #tpu.dot_dimension_numbers<[1], [0], [0], [1], [0, 0, 1, 1], [], []>} : vector<96x128xf32>, vector<128x32xf32>, vector<96x32xf32> -> vector<96x32xf32>
    %c0_110 = arith.constant 0 : index
    %c192_111 = arith.constant 192 : index
    %c0_112 = arith.constant 0 : index
    %259 = vector.load %arg5[%c0_110, %c192_111, %c0_112] : memref<1x288x32xf32, #tpu.memory_space<vmem>>, vector<1x96x32xf32>
    %260 = vector.shape_cast %259 : vector<1x96x32xf32> to vector<96x32xf32>
    %261 = vector.shape_cast %258 : vector<96x32xf32> to vector<1x96x32xf32>
    tpu.vector_store %arg5[%c0_110, %c192_111, %c0_112], %261 {strides = array<i32>} : memref<1x288x32xf32, #tpu.memory_space<vmem>>, vector<1x96x32xf32>,
    return
  }
  func.func @transform_0(%arg0: i32) -> (i32, i32, i32) {
    %c0_i32 = arith.constant 0 : i32
    %c0_i32_0 = arith.constant 0 : i32
    %c0_i32_1 = arith.constant 0 : i32
    return %arg0, %c0_i32, %c0_i32_0 : i32, i32, i32
  }
  func.func @transform_1(%arg0: i32) -> (i32, i32) {
    %c0_i32 = arith.constant 0 : i32
    %c0_i32_0 = arith.constant 0 : i32
    %c0_i32_1 = arith.constant 0 : i32
    return %c0_i32, %c0_i32_0 : i32, i32
  }
  func.func @transform_2(%arg0: i32) -> (i32, i32) {
    %c0_i32 = arith.constant 0 : i32
    %c0_i32_0 = arith.constant 0 : i32
    %c0_i32_1 = arith.constant 0 : i32
    return %c0_i32, %c0_i32_0 : i32, i32
  }
  func.func @transform_3(%arg0: i32) -> (i32, i32) {
    %c0_i32 = arith.constant 0 : i32
    %c0_i32_0 = arith.constant 0 : i32
    %c0_i32_1 = arith.constant 0 : i32
    return %c0_i32, %c0_i32_0 : i32, i32
  }
  func.func @transform_4(%arg0: i32) -> (i32, i32, i32) {
    %c0_i32 = arith.constant 0 : i32
    %c0_i32_0 = arith.constant 0 : i32
    %c0_i32_1 = arith.constant 0 : i32
    return %arg0, %c0_i32, %c0_i32_0 : i32, i32, i32
  }
}

</mosaic_0001>

<bundles_post_ra>
// kernel: dwffn_forward.1
= control target key start
LH: loop header
LB: loop body
LE: loop exit
PB: predicated region body
PF: predicated region fallthrough
CT: control target
= control target key end

     0   :  { %s3888_s15 = smov 0   ;;  %s5938_s0 = inlined_call_operand.vmem [shape: f32[2,324,32], index: 0, kind: input, shape index: {}]   ;;  %s5939_s1 = inlined_call_operand.vmem [shape: f32[32,128], index: 1, kind: input, shape index: {}]   ;;  %s5940_s2 = inlined_call_operand.vmem [shape: f32[9,128], index: 2, kind: input, shape index: {}]   ;;  %s5941_s3 = inlined_call_operand.vmem [shape: f32[128,32], index: 3, kind: input, shape index: {}]   ;;  %s5942_s4 = inlined_call_operand.vmem [shape: f32[2,288,32], index: 4, kind: output, shape index: {}]  }
   0x1 LB: > { %s3194_s16 = sadd.s32 4294967295, %s3858_s15   ;;  %p3198_p0 = scmp.ge.s32.totalorder %s3858_s15, 1  ;;  %s3858_s15 = sphi %s3888_s15, %s14_s15  }
   0x2   : > { %p162_p1 = scmp.lt.s32.totalorder %s3858_s15, 3 }
   0x4   : > { %p163_p2 = pnand %p3198_p0, %p162_p1 }
   0x6   : > { %166 = sbr.rel (%p163_p2) target bundleno = 842 (0x34a), region = 36 }
   0xb   : > { %v242_v0 = vld [vmem:[%s5939_s1 + $0x18] sm:$0xff]  ;;  %p188_p3 = scmp.lt.s32.totalorder %s3194_s16, 1  ;;  %v3860_v1 = vmov 0.0   ;;  %v241_v2 = vld [vmem:[%s5939_s1 + $0x10] sm:$0xff]  ;;  %vm3861_vm0 = vmmov 0   ;;  %v240_v3 = vld [vmem:[%s5939_s1 + $0x8] sm:$0xff] }
   0xc   : > { %3382 = vmatprep.subr.mxu0 %v3860_v1  ;;  %678 = vst [vmem:[#allocation2 + $0x144] sm:$0xff] %v3860_v1  ;;  %3390 = vmatprep.mubr.msk.f32.mxu0 %vm3861_vm0, %v3860_v1  ;;  %v239_v4 = vld [vmem:[%s5939_s1] sm:$0xff]  ;;  %vm243_vm1 = vcmask 261120  }
   0xd   : > { %3383 = vmatpush3.msra.mxu0 %v242_v0  ;;  %s6264_s16 = smov (!%p188_p3, %s3194_s16), 1  ;;  %3663 = vmatprep.subr.mxu1 %v3860_v1  ;;  %v4092_v56 = vld [vmem:[%s5940_s2 + $0x1] ss:$0 sm:$0xff]  ;;  %v4099_v59 = vld [vmem:[%s5940_s2] ss:$0 sm:$0xff] }
   0xe   : > { %3384 = vmatprep.subr.mxu0 %v3860_v1  ;;  %3667 = vmatpush3.msra.mxu1 %v242_v0  ;;  %s3671_s23 = smul.u32 328, %s6264_s16 }
   0xf   : > { %3385 = vmatpush3.msra.mxu0 %v241_v2  ;;  %3664 = vmatprep.subr.mxu1 %v3860_v1  ;;  %s3672_s19 = smul.u32 288, %s6264_s16 }
  0x10   : > { %3386 = vmatprep.subr.mxu0 %v3860_v1  ;;  %3668 = vmatpush3.msra.mxu1 %v241_v2  ;;  %s3922_s28 = scalar_lea.vmem %s5938_s0, %s3671_s23  ;;  %s3862_s23 = smov 64  }
  0x11   : > { %3387 = vmatpush3.msra.mxu0 %v240_v3  ;;  %3665 = vmatprep.subr.mxu1 %v3860_v1  ;;  %v198_v5 = vld [vmem:[%s3922_s28] sm:$0xff]  ;;  %v199_v6 = vld [vmem:[%s3922_s28 + $0x8] sm:$0xff]  ;;  %v200_v9 = vld [vmem:[%s3922_s28 + $0x10] sm:$0xff]  ;;  %s5861_s21 = scalar_lea.vmem %s5942_s4, %s3672_s19 }
  0x12   : > { %3388 = vmatprep.subr.mxu0 %v3860_v1  ;;  %3669 = vmatpush3.msra.mxu1 %v240_v3  ;;  %v230_v7 = vld [vmem:[%s3922_s28 + $0x100] sm:$0xff]  ;;  %v231_v8 = vld [vmem:[%s3922_s28 + $0x108] sm:$0xff]  ;;  %v232_v10 = vld [vmem:[%s3922_s28 + $0x110] sm:$0xff] }
  0x13   : > { %3389 = vmatpush3.msra.mxu0 %v239_v4  ;;  %3666 = vmatprep.subr.mxu1 %v3860_v1  ;;  %v201_v11 = vld [vmem:[%s3922_s28 + $0x18] sm:$0xff]  ;;  %v202_v13 = vld [vmem:[%s3922_s28 + $0x20] sm:$0xff]  ;;  %v203_v15 = vld [vmem:[%s3922_s28 + $0x28] sm:$0xff] }
  0x14   : > { %3391 = vmatmul.mubr.msk.f32.vlgmr.msra.gmra.mxu0 %vm243_vm1, %v198_v5  ;;  %3670 = vmatpush3.msra.mxu1 %v239_v4  ;;  %v233_v12 = vld [vmem:[%s3922_s28 + $0x118] sm:$0xff]  ;;  %v234_v14 = vld [vmem:[%s3922_s28 + $0x120] sm:$0xff]  ;;  %v235_v16 = vld [vmem:[%s3922_s28 + $0x128] sm:$0xff] }
  0x15   : > { %3393 = vmatprep.mubr.msk.f32.mxu0 %vm3861_vm0, %v3860_v1  ;;  %3486 = vmatprep.mubr.msk.f32.mxu1 %vm3861_vm0, %v3860_v1  ;;  %v204_v17 = vld [vmem:[%s3922_s28 + $0x30] sm:$0xff]  ;;  %v205_v19 = vld [vmem:[%s3922_s28 + $0x38] sm:$0xff]  ;;  %v206_v21 = vld [vmem:[%s3922_s28 + $0x40] sm:$0xff] }
  0x16   : > { %3487 = vmatmul.mubr.msk.f32.vlgmr.msra.gmra.mxu1 %vm243_vm1, %v230_v7  ;;  %v236_v18 = vld [vmem:[%s3922_s28 + $0x130] sm:$0xff]  ;;  %v237_v20 = vld [vmem:[%s3922_s28 + $0x138] sm:$0xff]  ;;  %v238_v22 = vld [vmem:[%s3922_s28 + $0x140] sm:$0xf] }
  0x17   : > { %3489 = vmatprep.mubr.msk.f32.mxu1 %vm3861_vm0, %v3860_v1  ;;  %v207_v23 = vld [vmem:[%s3922_s28 + $0x48] sm:$0xff]  ;;  %v208_v24 = vld [vmem:[%s3922_s28 + $0x50] sm:$0xff]  ;;  %v209_v25 = vld [vmem:[%s3922_s28 + $0x58] sm:$0xff] }
  0x18   : > { %3394 = vmatmul.mubr.msk.f32.gmra.mxu0 %vm243_vm1, %v199_v6  ;;  %v210_v26 = vld [vmem:[%s3922_s28 + $0x60] sm:$0xff]  ;;  %v211_v27 = vld [vmem:[%s3922_s28 + $0x68] sm:$0xff]  ;;  %v212_v28 = vld [vmem:[%s3922_s28 + $0x70] sm:$0xff] }
  0x19   : > { %3396 = vmatprep.mubr.msk.f32.mxu0 %vm3861_vm0, %v3860_v1  ;;  %v213_v29 = vld [vmem:[%s3922_s28 + $0x78] sm:$0xff]  ;;  %v214_v30 = vld [vmem:[%s3922_s28 + $0x80] sm:$0xff]  ;;  %v215_v31 = vld [vmem:[%s3922_s28 + $0x88] sm:$0xff] }
  0x1a   : > { %3490 = vmatmul.mubr.msk.f32.gmra.mxu1 %vm243_vm1, %v231_v8  ;;  %v216_v32 = vld [vmem:[%s3922_s28 + $0x90] sm:$0xff]  ;;  %v217_v33 = vld [vmem:[%s3922_s28 + $0x98] sm:$0xff]  ;;  %v218_v34 = vld [vmem:[%s3922_s28 + $0xa0] sm:$0xff] }
  0x1b   : > { %3492 = vmatprep.mubr.msk.f32.mxu1 %vm3861_vm0, %v3860_v1  ;;  %v219_v35 = vld [vmem:[%s3922_s28 + $0xa8] sm:$0xff]  ;;  %v220_v36 = vld [vmem:[%s3922_s28 + $0xb0] sm:$0xff]  ;;  %v221_v37 = vld [vmem:[%s3922_s28 + $0xb8] sm:$0xff] }
  0x1c   : > { %3397 = vmatmul.mubr.msk.f32.gmra.mxu0 %vm243_vm1, %v200_v9  ;;  %v222_v38 = vld [vmem:[%s3922_s28 + $0xc0] sm:$0xff]  ;;  %v223_v39 = vld [vmem:[%s3922_s28 + $0xc8] sm:$0xff]  ;;  %v224_v40 = vld [vmem:[%s3922_s28 + $0xd0] sm:$0xff] }
  0x1d   : > { %3399 = vmatprep.mubr.msk.f32.mxu0 %vm3861_vm0, %v3860_v1  ;;  %v225_v41 = vld [vmem:[%s3922_s28 + $0xd8] sm:$0xff]  ;;  %v226_v42 = vld [vmem:[%s3922_s28 + $0xe0] sm:$0xff]  ;;  %v227_v43 = vld [vmem:[%s3922_s28 + $0xe8] sm:$0xff] }
  0x1e   : > { %3493 = vmatmul.mubr.msk.f32.gmra.mxu1 %vm243_vm1, %v232_v10  ;;  %v228_v44 = vld [vmem:[%s3922_s28 + $0xf0] sm:$0xff]  ;;  %v229_v45 = vld [vmem:[%s3922_s28 + $0xf8] sm:$0xff]  ;;  %v4107_v3 = vld [vmem:[%s5940_s2 + $0x2] ss:$0 sm:$0xff] }
  0x1f   : > { %3495 = vmatprep.mubr.msk.f32.mxu1 %vm3861_vm0, %v3860_v1  ;;  %v4113_v10 = vld [vmem:[%s5940_s2 + $0x3] ss:$0 sm:$0xff] }
  0x20   : > { %3400 = vmatmul.mubr.msk.f32.gmra.mxu0 %vm243_vm1, %v201_v11  ;;  %v4118_v11 = vld [vmem:[%s5940_s2 + $0x4] ss:$0 sm:$0xff] }
  0x21   : > { %3402 = vmatprep.mubr.msk.f32.mxu0 %vm3861_vm0, %v3860_v1 }
  0x22   : > { %3496 = vmatmul.mubr.msk.f32.gmra.mxu1 %vm243_vm1, %v233_v12 }
  0x23   : > { %3498 = vmatprep.mubr.msk.f32.mxu1 %vm3861_vm0, %v3860_v1 }
  0x24   : > { %3403 = vmatmul.mubr.msk.f32.gmra.mxu0 %vm243_vm1, %v202_v13 }
  0x25   : > { %3405 = vmatprep.mubr.msk.f32.mxu0 %vm3861_vm0, %v3860_v1 }
  0x26   : > { %3499 = vmatmul.mubr.msk.f32.gmra.mxu1 %vm243_vm1, %v234_v14 }
  0x27   : > { %3501 = vmatprep.mubr.msk.f32.mxu1 %vm3861_vm0, %v3860_v1 }
  0x28   : > { %3406 = vmatmul.mubr.msk.f32.gmra.mxu0 %vm243_vm1, %v203_v15 }
  0x29   : > { %3408 = vmatprep.mubr.msk.f32.mxu0 %vm3861_vm0, %v3860_v1 }
  0x2a   : > { %3502 = vmatmul.mubr.msk.f32.gmra.mxu1 %vm243_vm1, %v235_v16 }
  0x2b   : > { %3504 = vmatprep.mubr.msk.f32.mxu1 %vm3861_vm0, %v3860_v1 }
  0x2c   : > { %3409 = vmatmul.mubr.msk.f32.gmra.mxu0 %vm243_vm1, %v204_v17 }
  0x2d   : > { %3411 = vmatprep.mubr.msk.f32.mxu0 %vm3861_vm0, %v3860_v1 }
  0x2e   : > { %3505 = vmatmul.mubr.msk.f32.gmra.mxu1 %vm243_vm1, %v236_v18 }
  0x2f   : > { %3507 = vmatprep.mubr.msk.f32.mxu1 %vm3861_vm0, %v3860_v1 }
  0x30   : > { %3412 = vmatmul.mubr.msk.f32.gmra.mxu0 %vm243_vm1, %v205_v19 }
  0x31   : > { %3414 = vmatprep.mubr.msk.f32.mxu0 %vm3861_vm0, %v3860_v1 }
  0x32   : > { %3508 = vmatmul.mubr.msk.f32.gmra.mxu1 %vm243_vm1, %v237_v20 }
  0x33   : > { %3510 = vmatprep.mubr.msk.f32.mxu1 %vm3861_vm0, %v3860_v1 }
  0x34   : > { %3415 = vmatmul.mubr.msk.f32.gmra.mxu0 %vm243_vm1, %v206_v21 }
  0x35   : > { %3417 = vmatprep.mubr.msk.f32.mxu0 %vm3861_vm0, %v3860_v1 }
  0x36   : > { %3511 = vmatmul.mubr.msk.f32.gmra.mxu1 %vm243_vm1, %v238_v22 }
  0x38   : > { %3418 = vmatmul.mubr.msk.f32.gmra.mxu0 %vm243_vm1, %v207_v23 }
  0x39   : > { %3420 = vmatprep.mubr.msk.f32.mxu0 %vm3861_vm0, %v3860_v1 }
  0x3c   : > { %3421 = vmatmul.mubr.msk.f32.gmra.mxu0 %vm243_vm1, %v208_v24 }
  0x3d   : > { %3423 = vmatprep.mubr.msk.f32.mxu0 %vm3861_vm0, %v3860_v1 }
  0x40   : > { %3424 = vmatmul.mubr.msk.f32.gmra.mxu0 %vm243_vm1, %v209_v25 }
  0x41   : > { %3426 = vmatprep.mubr.msk.f32.mxu0 %vm3861_vm0, %v3860_v1 }
  0x44   : > { %3427 = vmatmul.mubr.msk.f32.gmra.mxu0 %vm243_vm1, %v210_v26  ;;  %v4127_v26 = vld [vmem:[%s5940_s2 + $0x5] ss:$0 sm:$0xff] }
  0x45   : > { %3429 = vmatprep.mubr.msk.f32.mxu0 %vm3861_vm0, %v3860_v1 }
  0x48   : > { %3430 = vmatmul.mubr.msk.f32.gmra.mxu0 %vm243_vm1, %v211_v27 }
  0x49   : > { %3432 = vmatprep.mubr.msk.f32.mxu0 %vm3861_vm0, %v3860_v1 }
  0x4c   : > { %3433 = vmatmul.mubr.msk.f32.gmra.mxu0 %vm243_vm1, %v212_v28 }
  0x4d   : > { %3435 = vmatprep.mubr.msk.f32.mxu0 %vm3861_vm0, %v3860_v1 }
  0x50   : > { %3436 = vmatmul.mubr.msk.f32.gmra.mxu0 %vm243_vm1, %v213_v29 }
  0x51   : > { %3438 = vmatprep.mubr.msk.f32.mxu0 %vm3861_vm0, %v3860_v1 }
  0x54   : > { %3439 = vmatmul.mubr.msk.f32.gmra.mxu0 %vm243_vm1, %v214_v30 }
  0x55   : > { %3441 = vmatprep.mubr.msk.f32.mxu0 %vm3861_vm0, %v3860_v1 }
  0x58   : > { %3442 = vmatmul.mubr.msk.f32.gmra.mxu0 %vm243_vm1, %v215_v31 }
  0x59   : > { %3444 = vmatprep.mubr.msk.f32.mxu0 %vm3861_vm0, %v3860_v1 }
  0x5c   : > { %3445 = vmatmul.mubr.msk.f32.gmra.mxu0 %vm243_vm1, %v216_v32 }
  0x5d   : > { %3447 = vmatprep.mubr.msk.f32.mxu0 %vm3861_vm0, %v3860_v1 }
  0x60   : > { %3448 = vmatmul.mubr.msk.f32.gmra.mxu0 %vm243_vm1, %v217_v33 }
  0x61   : > { %3450 = vmatprep.mubr.msk.f32.mxu0 %vm3861_vm0, %v3860_v1 }
  0x64   : > { %3451 = vmatmul.mubr.msk.f32.gmra.mxu0 %vm243_vm1, %v218_v34 }
  0x65   : > { %3453 = vmatprep.mubr.msk.f32.mxu0 %vm3861_vm0, %v3860_v1 }
  0x68   : > { %3454 = vmatmul.mubr.msk.f32.gmra.mxu0 %vm243_vm1, %v219_v35 }
  0x69   : > { %3456 = vmatprep.mubr.msk.f32.mxu0 %vm3861_vm0, %v3860_v1 }
  0x6c   : > { %3457 = vmatmul.mubr.msk.f32.gmra.mxu0 %vm243_vm1, %v220_v36 }
  0x6d   : > { %3459 = vmatprep.mubr.msk.f32.mxu0 %vm3861_vm0, %v3860_v1 }
  0x70   : > { %3460 = vmatmul.mubr.msk.f32.gmra.mxu0 %vm243_vm1, %v221_v37 }
  0x71   : > { %3462 = vmatprep.mubr.msk.f32.mxu0 %vm3861_vm0, %v3860_v1 }
  0x74   : > { %3463 = vmatmul.mubr.msk.f32.gmra.mxu0 %vm243_vm1, %v222_v38 }
  0x75   : > { %3465 = vmatprep.mubr.msk.f32.mxu0 %vm3861_vm0, %v3860_v1 }
  0x78   : > { %3466 = vmatmul.mubr.msk.f32.gmra.mxu0 %vm243_vm1, %v223_v39 }
  0x79   : > { %3468 = vmatprep.mubr.msk.f32.mxu0 %vm3861_vm0, %v3860_v1 }
  0x7c   : > { %3469 = vmatmul.mubr.msk.f32.gmra.mxu0 %vm243_vm1, %v224_v40 }
  0x7d   : > { %3471 = vmatprep.mubr.msk.f32.mxu0 %vm3861_vm0, %v3860_v1 }
  0x80   : > { %3472 = vmatmul.mubr.msk.f32.gmra.mxu0 %vm243_vm1, %v225_v41 }
  0x81   : > { %3474 = vmatprep.mubr.msk.f32.mxu0 %vm3861_vm0, %v3860_v1 }
  0x84   : > { %3475 = vmatmul.mubr.msk.f32.gmra.mxu0 %vm243_vm1, %v226_v42  ;;  %v4136_v42 = vld [vmem:[%s5940_s2 + $0x6] ss:$0 sm:$0xff] }
  0x85   : > { %3477 = vmatprep.mubr.msk.f32.mxu0 %vm3861_vm0, %v3860_v1 }
  0x88   : > { %3478 = vmatmul.mubr.msk.f32.gmra.mxu0 %vm243_vm1, %v227_v43 }
  0x89   : > { %3480 = vmatprep.mubr.msk.f32.mxu0 %vm3861_vm0, %v3860_v1 }
  0x8c   : > { %3481 = vmatmul.mubr.msk.f32.gmra.mxu0 %vm243_vm1, %v228_v44 }
  0x8d   : > { %3483 = vmatprep.mubr.msk.f32.mxu0 %vm3861_vm0, %v3860_v1 }
  0x90   : > { %3484 = vmatmul.mubr.msk.f32.gmra.mxu0 %vm243_vm1, %v229_v45  ;;  %v4142_v45 = vld [vmem:[%s5940_s2 + $0x7] ss:$0 sm:$0xff] }
  0xd4   : > { %v433_v46 = vpop.f32.mrf.mxu0 }
  0xd5   : > { %637 = vst [vmem:[#allocation2] sm:$0xff] %v433_v46  ;;  %v704_v0 = vmul.f32 %v4099_v59, %v433_v46  ;;  %v4147_v46 = vld [vmem:[%s5940_s2 + $0x8] ss:$0 sm:$0xff] }
  0xd6   : > { %v3392_v47 = vpop.f32.mrf.mxu0  ;;  %v593_v48 = vpop.f32.mrf.mxu1 }
  0xd7   : > { %669 = vst [vmem:[#allocation2 + $0x100] sm:$0xff] %v593_v48 }
  0xd8   : > { %v438_v49 = vpop.f32.mrf.mxu0  ;;  %v3488_v50 = vpop.f32.mrf.mxu1 }
  0xd9   : > { %638 = vst [vmem:[#allocation2 + $0x8] sm:$0xff] %v438_v49  ;;  %v705_v13 = vmul.f32 %v4099_v59, %v438_v49 }
  0xda   : > { %v3395_v51 = vpop.f32.mrf.mxu0  ;;  %v598_v52 = vpop.f32.mrf.mxu1 }
  0xdb   : > { %670 = vst [vmem:[#allocation2 + $0x108] sm:$0xff] %v598_v52 }
  0xdc   : > { %v443_v53 = vpop.f32.mrf.mxu0  ;;  %v3491_v54 = vpop.f32.mrf.mxu1 }
  0xdd   : > { %639 = vst [vmem:[#allocation2 + $0x10] sm:$0xff] %v443_v53  ;;  %v706_v35 = vmul.f32 %v4099_v59, %v443_v53 }
  0xde   : > { %v3398_v55 = vpop.f32.mrf.mxu0  ;;  %v603_v57 = vpop.f32.mrf.mxu1 }
  0xdf   : > { %671 = vst [vmem:[#allocation2 + $0x110] sm:$0xff] %v603_v57 }
  0xe0   : > { %v4094_v58 = vpop.f32.mrf.mxu0  ;;  %v716_v60 = vld [vmem:[#allocation2 + $0x1] sm:$0xff]  ;;  %v3494_v62 = vpop.f32.mrf.mxu1 }
  0xe1   : > { %640 = vst [vmem:[#allocation2 + $0x18] sm:$0xff] %v4094_v58  ;;  %v732_v61 = vmul.f32 %v4092_v56, %v716_v60  ;;  %v756_v4 = vld [vmem:[#allocation2 + $0x2] sm:$0xff]  ;;  %v707_v51 = vmul.f32 %v4099_v59, %v4094_v58 }
  0xe2   : > { %v3401_v63 = vpop.f32.mrf.mxu0  ;;  %v608_v1 = vpop.f32.mrf.mxu1  ;;  %v772_v12 = vmul.f32 %v4107_v3, %v756_v4 }
  0xe3   : > { %672 = vst [vmem:[#allocation2 + $0x118] sm:$0xff] %v608_v1  ;;  %v744_v6 = vadd.f32 %v732_v61, %v704_v0 }
  0xe4   : > { %v453_v2 = vpop.f32.mrf.mxu0  ;;  %v717_v5 = vld [vmem:[#allocation2 + $0x9] sm:$0xff]  ;;  %v3497_v8 = vpop.f32.mrf.mxu1 }
  0xe5   : > { %641 = vst [vmem:[#allocation2 + $0x20] sm:$0xff] %v453_v2  ;;  %v733_v7 = vmul.f32 %v4092_v56, %v717_v5  ;;  %v757_v18 = vld [vmem:[#allocation2 + $0xa] sm:$0xff]  ;;  %v784_v19 = vadd.f32 %v772_v12, %v744_v6  ;;  %v708_v61 = vmul.f32 %v4099_v59, %v453_v2 }
  0xe6   : > { %v3404_v9 = vpop.f32.mrf.mxu0  ;;  %v613_v14 = vpop.f32.mrf.mxu1  ;;  %v773_v29 = vmul.f32 %v4107_v3, %v757_v18 }
  0xe7   : > { %673 = vst [vmem:[#allocation2 + $0x120] sm:$0xff] %v613_v14  ;;  %v745_v21 = vadd.f32 %v733_v7, %v705_v13 }
  0xe8   : > { %v458_v15 = vpop.f32.mrf.mxu0  ;;  %v758_v16 = vld [vmem:[#allocation2 + $0x12] sm:$0xff]  ;;  %v3500_v23 = vpop.f32.mrf.mxu1 }
  0xe9   : > { %v826_v17 = vld [vmem:[#allocation2 + $0x13] sm:$0xff]  ;;  %642 = vst [vmem:[#allocation2 + $0x28] sm:$0xff] %v458_v15  ;;  %v802_v20 = vmul.f32 %v4113_v10, %v758_v16  ;;  %v785_v37 = vadd.f32 %v773_v29, %v745_v21  ;;  %v774_v60 = vmul.f32 %v4107_v3, %v758_v16  ;;  %v4158_v62 = vmul.f32 %v4099_v59, %v458_v15 }
  0xea   : > { %v718_v22 = vld [vmem:[#allocation2 + $0x11] sm:$0xff]  ;;  %v3407_v24 = vpop.f32.mrf.mxu0  ;;  %v842_v28 = vmul.f32 %v4118_v11, %v826_v17  ;;  %v618_v30 = vpop.f32.mrf.mxu1 }
  0xeb   : > { %v734_v25 = vmul.f32 %v4092_v56, %v718_v22  ;;  %v814_v27 = vadd.f32 %v802_v20, %v784_v19  ;;  %v866_v32 = vld [vmem:[#allocation2 + $0x14] sm:$0xff]  ;;  %674 = vst [vmem:[#allocation2 + $0x128] sm:$0xff] %v618_v30 }
  0xec   : > { %v463_v31 = vpop.f32.mrf.mxu0  ;;  %v759_v33 = vld [vmem:[#allocation2 + $0x1a] sm:$0xff]  ;;  %v3503_v40 = vpop.f32.mrf.mxu1  ;;  %v882_v47 = vmul.f32 %v4127_v26, %v866_v32 }
  0xed   : > { %v827_v34 = vld [vmem:[#allocation2 + $0x1b] sm:$0xff]  ;;  %643 = vst [vmem:[#allocation2 + $0x30] sm:$0xff] %v463_v31  ;;  %v854_v36 = vadd.f32 %v842_v28, %v814_v27  ;;  %v803_v38 = vmul.f32 %v4113_v10, %v759_v33  ;;  %v746_v43 = vadd.f32 %v734_v25, %v706_v35  ;;  %v775_v13 = vmul.f32 %v4107_v3, %v759_v33 }
  0xee   : > { %v719_v39 = vld [vmem:[#allocation2 + $0x19] sm:$0xff]  ;;  %v3410_v41 = vpop.f32.mrf.mxu0  ;;  %v843_v49 = vmul.f32 %v4118_v11, %v827_v34  ;;  %v623_v52 = vpop.f32.mrf.mxu1  ;;  %v4168_v17 = vmul.f32 %v4099_v59, %v463_v31 }
  0xef   : > { %v735_v44 = vmul.f32 %v4092_v56, %v719_v39  ;;  %v815_v48 = vadd.f32 %v803_v38, %v785_v37  ;;  %v867_v50 = vld [vmem:[#allocation2 + $0x1c] sm:$0xff]  ;;  %675 = vst [vmem:[#allocation2 + $0x130] sm:$0xff] %v623_v52  ;;  %v894_v63 = vadd.f32 %v882_v47, %v854_v36  ;;  %v786_v12 = vadd.f32 %v774_v60, %v746_v43 }
  0xf0   : > { %v4153_v53 = vpop.f32.mrf.mxu0  ;;  %v868_v54 = vld [vmem:[#allocation2 + $0x24] sm:$0xff]  ;;  %v3506_v7 = vpop.f32.mrf.mxu1  ;;  %v883_v9 = vmul.f32 %v4127_v26, %v867_v50 }
  0xf1   : > { %v936_v55 = vld [vmem:[#allocation2 + $0x25] sm:$0xff]  ;;  %644 = vst [vmem:[#allocation2 + $0x38] sm:$0xff] %v4153_v53  ;;  %v912_v0 = vmul.f32 %v4136_v42, %v868_v54  ;;  %v855_v58 = vadd.f32 %v843_v49, %v815_v48  ;;  %v747_v5 = vadd.f32 %v735_v44, %v707_v51  ;;  %v884_v27 = vmul.f32 %v4127_v26, %v868_v54 }
  0xf2   : > { %v976_v57 = vld [vmem:[#allocation2 + $0x26] sm:$0xff]  ;;  %v3413_v8 = vpop.f32.mrf.mxu0  ;;  %v952_v15 = vmul.f32 %v4142_v45, %v936_v55  ;;  %v628_v18 = vpop.f32.mrf.mxu1 }
  0xf3   : > { %v760_v1 = vld [vmem:[#allocation2 + $0x22] sm:$0xff]  ;;  %v924_v14 = vadd.f32 %v912_v0, %v894_v63  ;;  %v992_v20 = vmul.f32 %v4147_v46, %v976_v57  ;;  %676 = vst [vmem:[#allocation2 + $0x138] sm:$0xff] %v628_v18  ;;  %v895_v29 = vadd.f32 %v883_v9, %v855_v58  ;;  %v787_v32 = vadd.f32 %v775_v13, %v747_v5 }
  0xf4   : > { %v828_v4 = vld [vmem:[#allocation2 + $0x23] sm:$0xff]  ;;  %v804_v2 = vmul.f32 %v4113_v10, %v760_v1  ;;  %v4170_v19 = vpop.f32.mrf.mxu0  ;;  %v869_v21 = vld [vmem:[#allocation2 + $0x2c] sm:$0xff]  ;;  %v3509_v35 = vpop.f32.mrf.mxu1  ;;  %v776_v40 = vmul.f32 %v4107_v3, %v760_v1 }
  0xf5   : > { %v720_v6 = vld [vmem:[#allocation2 + $0x21] sm:$0xff]  ;;  %v937_v22 = vld [vmem:[#allocation2 + $0x2d] sm:$0xff]  ;;  %v844_v25 = vmul.f32 %v4118_v11, %v828_v4  ;;  %645 = vst [vmem:[#allocation2 + $0x40] sm:$0xff] %v4170_v19  ;;  %v964_v28 = vadd.f32 %v952_v15, %v924_v14  ;;  %v913_v30 = vmul.f32 %v4136_v42, %v869_v21  ;;  %v885_v55 = vmul.f32 %v4127_v26, %v869_v21 }
  0xf6   : > { %v736_v16 = vmul.f32 %v4092_v56, %v720_v6  ;;  %v977_v23 = vld [vmem:[#allocation2 + $0x2e] sm:$0xff]  ;;  %v816_v24 = vadd.f32 %v804_v2, %v786_v12  ;;  %v3416_v36 = vpop.f32.mrf.mxu0  ;;  %v953_v37 = vmul.f32 %v4142_v45, %v937_v22  ;;  %v633_v48 = vpop.f32.mrf.mxu1 }
  0xf7   : > { %v761_v31 = vld [vmem:[#allocation2 + $0x2a] sm:$0xff]  ;;  %v4180_v41 = vadd.f32 %v992_v20, %v964_v28  ;;  %v925_v43 = vadd.f32 %v913_v30, %v895_v29  ;;  %v993_v44 = vmul.f32 %v4147_v46, %v977_v23  ;;  %677 = vst [vmem:[#allocation2 + $0x140] sm:$0xf] %v633_v48 }
  0xf8   : > { %v829_v33 = vld [vmem:[#allocation2 + $0x2b] sm:$0xff]  ;;  %v856_v38 = vadd.f32 %v844_v25, %v816_v24  ;;  %v805_v39 = vmul.f32 %v4113_v10, %v761_v31  ;;  %v748_v47 = vadd.f32 %v736_v16, %v708_v61  ;;  %v4183_v49 = vpop.f32.mrf.mxu0  ;;  %v870_v50 = vld [vmem:[#allocation2 + $0x34] sm:$0xff]  ;;  %v3512_v5 = vpop.f32.mrf.mxu1  ;;  %v777_v12 = vmul.f32 %v4107_v3, %v761_v31 }
  0xf9   : > { %v721_v34 = vld [vmem:[#allocation2 + $0x29] sm:$0xff]  ;;  %v938_v51 = vld [vmem:[#allocation2 + $0x35] sm:$0xff]  ;;  %v845_v54 = vmul.f32 %v4118_v11, %v829_v33  ;;  %646 = vst [vmem:[#allocation2 + $0x48] sm:$0xff] %v4183_v49  ;;  %1340 = vrot.lane.b32.xlu0 %v4180_v41, %s3862_s23  ;;  %v4192_v60 = vmul.f32 0.70710677, %v4180_v41  ;;  %v965_v61 = vadd.f32 %v953_v37, %v925_v43  ;;  %v914_v0 = vmul.f32 %v4136_v42, %v870_v50 }
  0xfa   : > { %v817_v52 = vadd.f32 %v805_v39, %v787_v32  ;;  %v737_v57 = vmul.f32 %v4092_v56, %v721_v34  ;;  %v896_v63 = vadd.f32 %v884_v27, %v856_v38  ;;  %v978_v58 = vld [vmem:[#allocation2 + $0x36] sm:$0xff]  ;;  %v3419_v6 = vpop.f32.mrf.mxu0  ;;  %v788_v8 = vadd.f32 %v776_v40, %v748_v47 }
  0xfb   : > { %v4195_v1 = vld [vmem:[#allocation2 + $0x32] sm:$0xff]  ;;  %v1040_v2 = vand.u32 2147483647, %v4192_v60  ;;  %v4201_v13 = vadd.f32 %v993_v44, %v965_v61  ;;  %v954_v15 = vmul.f32 %v4142_v45, %v938_v51  ;;  %v994_v18 = vmul.f32 %v4147_v46, %v978_v58 }
  0xfc   : > { %v830_v4 = vld [vmem:[#allocation2 + $0x33] sm:$0xff]  ;;  %v857_v7 = vadd.f32 %v845_v54, %v817_v52  ;;  %v806_v9 = vmul.f32 %v4113_v10, %v4195_v1  ;;  %v926_v14 = vadd.f32 %v914_v0, %v896_v63  ;;  %v4204_v16 = vpop.f32.mrf.mxu0  ;;  %v4207_v20 = vld [vmem:[#allocation2 + $0x3c] sm:$0xff]  ;;  %v886_v35 = vmul.f32 %v4127_v26, %v870_v50 }
  0xfd   : > { %v939_v22 = vld [vmem:[#allocation2 + $0x3d] sm:$0xff]  ;;  %v846_v25 = vmul.f32 %v4118_v11, %v830_v4  ;;  %v1052_v27 = vmul.f32 0.3275911, %v1040_v2  ;;  %v1208_v28 = vsub.f32 0.0, %v1040_v2  ;;  %647 = vst [vmem:[#allocation2 + $0x50] sm:$0xff] %v4204_v16  ;;  %1342 = vrot.lane.b32.xlu0 %v4201_v13, %s3862_s23  ;;  %v915_v33 = vmul.f32 %v4136_v42, %v4207_v20 }
  0xfe   : > { %v897_v21 = vadd.f32 %v885_v55, %v857_v7  ;;  %v979_v23 = vld [vmem:[#allocation2 + $0x3e] sm:$0xff]  ;;  %v818_v24 = vadd.f32 %v806_v9, %v788_v8  ;;  %v4214_v29 = vmul.f32 0.70710677, %v4201_v13  ;;  %v966_v30 = vadd.f32 %v954_v15, %v926_v14  ;;  %v3422_v32 = vpop.f32.mrf.mxu0 }
  0xff   : > { %v4216_v31 = vld [vmem:[#allocation2 + $0x3a] sm:$0xff]  ;;  %v749_v36 = vadd.f32 %v737_v57, %v4158_v62  ;;  %v1064_v37 = vadd.f32 1.0, %v1052_v27  ;;  %v1220_v38 = vmul.f32 %v1208_v28, %v1040_v2  ;;  %v955_v47 = vmul.f32 %v4142_v45, %v939_v22 }
 0x100   : > { %v858_v34 = vadd.f32 %v846_v25, %v818_v24  ;;  %v1041_v39 = vand.u32 2147483647, %v4214_v29  ;;  %v4223_v40 = vadd.f32 %v994_v18, %v966_v30  ;;  %v4225_v43 = vpop.f32.mrf.mxu0  ;;  %v927_v44 = vadd.f32 %v915_v33, %v897_v21  ;;  %v4229_v51 = vld [vmem:[#allocation2 + $0x44] sm:$0xff]  ;;  %v831_v6 = vld [vmem:[#allocation2 + $0x3b] sm:$0xff]  ;;  %v722_v24 = vld [vmem:[#allocation2 + $0x31] sm:$0xff] }
 0x101   : > { %v995_v48 = vmul.f32 %v4147_v46, %v979_v23  ;;  %v940_v52 = vld [vmem:[#allocation2 + $0x45] sm:$0xff]  ;;  %v807_v50 = vmul.f32 %v4113_v10, %v4216_v31  ;;  %v1232_v62 = vmul.f32 1.442695, %v1220_v38  ;;  %648 = vst [vmem:[#allocation2 + $0x58] sm:$0xff] %v4225_v43  ;;  %v916_v58 = vmul.f32 %v4136_v42, %v4229_v51 }
 0x102   : > { %6035 = vst [vmem:[#allocation3_spill] sm:$0xff] %v4223_v40  ;;  %v1053_v54 = vmul.f32 0.3275911, %v1041_v39  ;;  %v1209_v55 = vsub.f32 0.0, %v1041_v39  ;;  %1344 = vrot.lane.b32.xlu1 %v4223_v40, %s3862_s23  ;;  %v898_v57 = vadd.f32 %v886_v35, %v858_v34  ;;  %v4237_v61 = vmul.f32 0.70710677, %v4223_v40  ;;  %v3425_v63 = vpop.f32.mrf.mxu0 }
 0x103   : > { %v967_v0 = vadd.f32 %v955_v47, %v927_v44  ;;  %v980_v4 = vld [vmem:[#allocation2 + $0x46] sm:$0xff]  ;;  %v789_v5 = vadd.f32 %v777_v12, %v749_v36  ;;  %3684 = vrcp.f32 %v1064_v37  ;;  %v956_v9 = vmul.f32 %v4142_v45, %v940_v52 }
 0x104   : > { %6036 = vst [vmem:[#allocation4_spill] sm:$0xff] %v4237_v61  ;;  %v1065_v7 = vadd.f32 1.0, %v1053_v54  ;;  %v1221_v8 = vmul.f32 %v1209_v55, %v1041_v39  ;;  %v1042_v2 = vand.u32 2147483647, %v4237_v61  ;;  %v4243_v14 = vpop.f32.mrf.mxu0  ;;  %v928_v18 = vadd.f32 %v916_v58, %v898_v57  ;;  %v4247_v22 = vld [vmem:[#allocation2 + $0x4c] sm:$0xff] }
 0x105   : > { %v4245_v15 = vadd.f32 %v995_v48, %v967_v0  ;;  %v819_v21 = vadd.f32 %v807_v50, %v789_v5  ;;  %3686 = vpow2.f32 %v1232_v62  ;;  %649 = vst [vmem:[#allocation2 + $0x60] sm:$0xff] %v4243_v14  ;;  %v996_v12 = vmul.f32 %v4147_v46, %v980_v4  ;;  %v941_v34 = vld [vmem:[#allocation2 + $0x4d] sm:$0xff]  ;;  %v4270_v48 = vld [vmem:[#allocation2 + $0x42] sm:$0xff] }
 0x106   : > { %v847_v23 = vmul.f32 %v4118_v11, %v831_v6  ;;  %v4254_v25 = vmul.f32 %v4099_v59, %v4153_v53  ;;  %v1054_v27 = vmul.f32 0.3275911, %v1042_v2  ;;  %v1210_v28 = vsub.f32 0.0, %v1042_v2  ;;  %v3428_v32 = vpop.f32.mrf.mxu0 }
 0x107   : > { %6037 = vst [vmem:[#allocation5_spill] sm:$0xff] %v4245_v15  ;;  %1346 = vrot.lane.b32.xlu1 %v4245_v15, %s3862_s23  ;;  %v4259_v30 = vmul.f32 0.70710677, %v4245_v15  ;;  %v968_v33 = vadd.f32 %v956_v9, %v928_v18  ;;  %3688 = vrcp.f32 %v1065_v7  ;;  %v887_v36 = vmul.f32 %v4127_v26, %v4207_v20  ;;  %v981_v20 = vld [vmem:[#allocation2 + $0x4e] sm:$0xff] }
 0x108   : > { %v859_v35 = vadd.f32 %v847_v23, %v819_v21  ;;  %v917_v53 = vmul.f32 %v4136_v42, %v4247_v22  ;;  %v1234_v37 = vmul.f32 1.442695, %v1221_v8  ;;  %v1222_v38 = vmul.f32 %v1210_v28, %v1042_v2  ;;  %v4266_v44 = vpop.f32.mrf.mxu0  ;;  %v832_v8 = vld [vmem:[#allocation2 + $0x43] sm:$0xff] }
 0x109   : > { %6038 = vst [vmem:[#allocation6_spill] sm:$0xff] %v4259_v30  ;;  %v1043_v39 = vand.u32 2147483647, %v4259_v30  ;;  %v4268_v47 = vadd.f32 %v996_v12, %v968_v33  ;;  %v1066_v52 = vadd.f32 1.0, %v1054_v27  ;;  %650 = vst [vmem:[#allocation2 + $0x68] sm:$0xff] %v4266_v44  ;;  %v957_v62 = vmul.f32 %v4142_v45, %v941_v34  ;;  %v1391_v34 = vld [vmem:[%s5941_s3 + $0x78] sm:$0xff] }
 0x10a   : > { %v899_v50 = vadd.f32 %v887_v36, %v859_v35  ;;  %v738_v54 = vmul.f32 %v4092_v56, %v722_v24  ;;  %v1236_v55 = vmul.f32 1.442695, %v1222_v38  ;;  %v3431_v0 = vpop.f32.mrf.mxu0  ;;  %v778_v58 = vmul.f32 %v4107_v3, %v4195_v1  ;;  %v4290_v24 = vld [vmem:[#allocation2 + $0x54] sm:$0xff]  ;;  %3513 = vmatprep.subr.mxu1 %v1391_v34 }
 0x10b   : > { %6039 = vst [vmem:[#allocation7_spill] sm:$0xff] %v4268_v47  ;;  %v1055_v57 = vmul.f32 0.3275911, %v1043_v39  ;;  %v1211_v63 = vsub.f32 0.0, %v1043_v39  ;;  %1348 = vrot.lane.b32.xlu0 %v4268_v47, %s3862_s23  ;;  %v4280_v4 = vmul.f32 0.70710677, %v4268_v47  ;;  %v808_v7 = vmul.f32 %v4113_v10, %v4270_v48  ;;  %3514 = vmatpush3.msra.mxu1 %v1391_v34 }
 0x10c   : > { %v929_v5 = vadd.f32 %v917_v53, %v899_v50  ;;  %v750_v6 = vadd.f32 %v738_v54, %v4168_v17  ;;  %3690 = vpow2.f32 %v1234_v37  ;;  %v4285_v18 = vpop.f32.mrf.mxu0  ;;  %v997_v21 = vmul.f32 %v4147_v46, %v981_v20  ;;  %v723_v17 = vld [vmem:[#allocation2 + $0x39] sm:$0xff]  ;;  %v1390_v35 = vld [vmem:[%s5941_s3 + $0x70] sm:$0xff] }
 0x10d   : > { %6040 = vst [vmem:[#allocation8_spill] sm:$0xff] %v4280_v4  ;;  %v1067_v9 = vadd.f32 1.0, %v1055_v57  ;;  %v1223_v2 = vmul.f32 %v1211_v63, %v1043_v39  ;;  %3692 = vrcp.f32 %v1066_v52  ;;  %v1044_v1 = vand.u32 2147483647, %v4280_v4  ;;  %651 = vst [vmem:[#allocation2 + $0x70] sm:$0xff] %v4285_v18  ;;  %v942_v39 = vld [vmem:[#allocation2 + $0x55] sm:$0xff]  ;;  %3515 = vmatprep.subr.mxu1 %v1390_v35 }
 0x10e   : > { %v969_v12 = vadd.f32 %v957_v62, %v929_v5  ;;  %v790_v23 = vadd.f32 %v778_v58, %v750_v6  ;;  %3694 = vpow2.f32 %v1236_v55  ;;  %v3434_v28 = vpop.f32.mrf.mxu0  ;;  %v848_v32 = vmul.f32 %v4118_v11, %v832_v8  ;;  %v4305_v52 = vld [vmem:[#allocation2 + $0x4a] sm:$0xff]  ;;  %v982_v54 = vld [vmem:[#allocation2 + $0x56] sm:$0xff]  ;;  %3516 = vmatpush3.msra.mxu1 %v1390_v35 }
 0x10f   : > { %v1238_v27 = vmul.f32 1.442695, %v1223_v2  ;;  %v4295_v33 = vmul.f32 %v4099_v59, %v4170_v19  ;;  %v1056_v36 = vmul.f32 0.3275911, %v1044_v1  ;;  %v1212_v53 = vsub.f32 0.0, %v1044_v1  ;;  %v833_v5 = vld [vmem:[#allocation2 + $0x4b] sm:$0xff] }
 0x110   : > { %v4303_v37 = vadd.f32 %v997_v21, %v969_v12  ;;  %v820_v38 = vadd.f32 %v808_v7, %v790_v23  ;;  %v4307_v50 = vpop.eup %3684  ;;  %3696 = vrcp.f32 %v1067_v9  ;;  %v4309_v19 = vpop.f32.mrf.mxu0  ;;  %v888_v62 = vmul.f32 %v4127_v26, %v4229_v51  ;;  %v1389_v21 = vld [vmem:[%s5941_s3 + $0x68] sm:$0xff] }
 0x111   : > { %v918_v20 = vmul.f32 %v4136_v42, %v4290_v24  ;;  %v739_v55 = vmul.f32 %v4092_v56, %v723_v17  ;;  %v1068_v57 = vadd.f32 1.0, %v1056_v36  ;;  %v1224_v63 = vmul.f32 %v1212_v53, %v1044_v1  ;;  %652 = vst [vmem:[#allocation2 + $0x78] sm:$0xff] %v4309_v19  ;;  %v1388_v1 = vld [vmem:[%s5941_s3 + $0x60] sm:$0xff]  ;;  %3517 = vmatprep.subr.mxu1 %v1389_v21 }
 0x112   : > { %6041 = vst [vmem:[#allocation9_spill] sm:$0xff] %v4303_v37  ;;  %1350 = vrot.lane.b32.xlu1 %v4303_v37, %s3862_s23  ;;  %v4319_v0 = vmul.f32 0.70710677, %v4303_v37  ;;  %v860_v58 = vadd.f32 %v848_v32, %v820_v38  ;;  %v4322_v51 = vpop.eup %3686  ;;  %v958_v6 = vmul.f32 %v4142_v45, %v942_v39  ;;  %v3437_v7 = vpop.f32.mrf.mxu0  ;;  %v779_v9 = vmul.f32 %v4107_v3, %v4216_v31  ;;  %v4338_v17 = vld [vmem:[#allocation2 + $0x5c] sm:$0xff] }
 0x113   : > { %v751_v8 = vadd.f32 %v739_v55, %v4254_v25  ;;  %v809_v2 = vmul.f32 %v4113_v10, %v4305_v52  ;;  %3698 = vpow2.f32 %v1238_v27  ;;  %v998_v25 = vmul.f32 %v4147_v46, %v982_v54  ;;  %v943_v31 = vld [vmem:[#allocation2 + $0x5d] sm:$0xff]  ;;  %3518 = vmatpush3.msra.mxu1 %v1389_v21  ;;  %v4348_v55 = vld [vmem:[#allocation2 + $0x52] sm:$0xff] }
 0x114   : > { %6042 = vst [vmem:[#allocation10_spill] sm:$0xff] %v4319_v0  ;;  %v1045_v12 = vand.u32 2147483647, %v4319_v0  ;;  %v900_v23 = vadd.f32 %v888_v62, %v860_v58  ;;  %v724_v28 = vld [vmem:[#allocation2 + $0x41] sm:$0xff]  ;;  %v4340_v32 = vpop.eup %3688  ;;  %3700 = vrcp.f32 %v1068_v57  ;;  %v4342_v34 = vpop.f32.mrf.mxu0  ;;  %v849_v36 = vmul.f32 %v4118_v11, %v833_v5  ;;  %3519 = vmatprep.subr.mxu1 %v1388_v1 }
 0x115   : > { %v791_v35 = vadd.f32 %v779_v9, %v751_v8  ;;  %v889_v27 = vmul.f32 %v4127_v26, %v4247_v22  ;;  %v983_v53 = vld [vmem:[#allocation2 + $0x5e] sm:$0xff]  ;;  %v1240_v38 = vmul.f32 1.442695, %v1224_v63  ;;  %653 = vst [vmem:[#allocation2 + $0x80] sm:$0xff] %v4342_v34  ;;  %v919_v58 = vmul.f32 %v4136_v42, %v4338_v17  ;;  %v834_v8 = vld [vmem:[#allocation2 + $0x53] sm:$0xff]  ;;  %3520 = vmatpush3.msra.mxu1 %v1388_v1 }
 0x116   : > { %v1057_v39 = vmul.f32 0.3275911, %v1045_v12  ;;  %v1213_v62 = vsub.f32 0.0, %v1045_v12  ;;  %v930_v54 = vadd.f32 %v918_v20, %v900_v23  ;;  %v959_v5 = vmul.f32 %v4142_v45, %v943_v31  ;;  %v3440_v7 = vpop.f32.mrf.mxu0  ;;  %v4355_v23 = vld [vmem:[#allocation2 + $0x64] sm:$0xff] }
 0x117   : > { %v821_v57 = vadd.f32 %v809_v2, %v791_v35  ;;  %v740_v22 = vmul.f32 %v4092_v56, %v724_v28  ;;  %v999_v20 = vmul.f32 %v4147_v46, %v983_v53  ;;  %v780_v31 = vmul.f32 %v4107_v3, %v4270_v48  ;;  %v725_v35 = vld [vmem:[#allocation2 + $0x49] sm:$0xff]  ;;  %v1387_v7 = vld [vmem:[%s5941_s3 + $0x58] sm:$0xff] }
 0x118   : > { %v1069_v63 = vadd.f32 1.0, %v1057_v39  ;;  %v1225_v9 = vmul.f32 %v1213_v62, %v1045_v12  ;;  %v970_v21 = vadd.f32 %v958_v6, %v930_v54  ;;  %v4357_v37 = vpop.f32.mrf.mxu0  ;;  %v810_v28 = vmul.f32 %v4113_v10, %v4348_v55  ;;  %v984_v53 = vld [vmem:[#allocation2 + $0x66] sm:$0xff]  ;;  %3521 = vmatprep.subr.mxu1 %v1387_v7 }
 0x119   : > { %v861_v0 = vadd.f32 %v849_v36, %v821_v57  ;;  %v752_v2 = vadd.f32 %v740_v22, %v4295_v33  ;;  %v4364_v1 = vpop.eup %3690  ;;  %3702 = vpow2.f32 %v1240_v38  ;;  %654 = vst [vmem:[#allocation2 + $0x88] sm:$0xff] %v4357_v37  ;;  %v850_v12 = vmul.f32 %v4118_v11, %v834_v8  ;;  %v944_v33 = vld [vmem:[#allocation2 + $0x65] sm:$0xff]  ;;  %3522 = vmatpush3.msra.mxu1 %v1387_v7 }
 0x11a   : > { %v4366_v6 = vadd.f32 %v998_v25, %v970_v21  ;;  %v890_v36 = vmul.f32 %v4127_v26, %v4290_v24  ;;  %v4372_v39 = vpop.eup %3692  ;;  %v1242_v48 = vmul.f32 1.442695, %v1225_v9  ;;  %v920_v57 = vmul.f32 %v4136_v42, %v4355_v23  ;;  %v3443_v38 = vpop.f32.mrf.mxu0  ;;  %v4376_v25 = vld [vmem:[#allocation2 + $0x5a] sm:$0xff]  ;;  %v1386_v24 = vld [vmem:[%s5941_s3 + $0x50] sm:$0xff]  ;;  %v1385_v7 = vld [vmem:[%s5941_s3 + $0x48] sm:$0xff] }
 0x11b   : > { %v901_v62 = vadd.f32 %v889_v27, %v861_v0  ;;  %v792_v54 = vadd.f32 %v780_v31, %v752_v2  ;;  %v4384_v22 = vpop.eup %3694  ;;  %3704 = vrcp.f32 %v1069_v63  ;;  %v713_v27 = vmul.f32 %v4099_v59, %v4183_v49  ;;  %v835_v9 = vld [vmem:[#allocation2 + $0x5b] sm:$0xff]  ;;  %3523 = vmatprep.subr.mxu1 %v1386_v24 }
 0x11c   : > { %6043 = vst [vmem:[#allocation11_spill] sm:$0xff] %v4366_v6  ;;  %6044 = vst [vmem:[#allocation12_spill] sm:$0xff] %v4384_v22  ;;  %1352 = vrot.lane.b32.xlu0 %v4366_v6, %s3862_s23  ;;  %v4389_v0 = vmul.f32 0.70710677, %v4366_v6  ;;  %v741_v8 = vmul.f32 %v4092_v56, %v725_v35  ;;  %v960_v31 = vmul.f32 %v4142_v45, %v944_v33  ;;  %v4398_v63 = vpop.f32.mrf.mxu0  ;;  %3706 = vpow2.f32 %v1242_v48 }
 0x11d   : > { %v931_v21 = vadd.f32 %v919_v58, %v901_v62  ;;  %v822_v2 = vadd.f32 %v810_v28, %v792_v54  ;;  %v4396_v38 = vmul.f32 %v4147_v46, %v984_v53  ;;  %v4400_v4 = vpop.eup %3696  ;;  %655 = vst [vmem:[#allocation2 + $0x90] sm:$0xff] %v4398_v63  ;;  %v781_v35 = vmul.f32 %v4107_v3, %v4305_v52  ;;  %v726_v28 = vld [vmem:[#allocation2 + $0x51] sm:$0xff]  ;;  %v1384_v52 = vld [vmem:[%s5941_s3 + $0x40] sm:$0xff] }
 0x11e   : > { %6045 = vst [vmem:[#allocation13_spill] sm:$0xff] %v4389_v0  ;;  %6046 = vst [vmem:[#allocation14_spill] sm:$0xff] %v4400_v4  ;;  %v1046_v6 = vand.u32 2147483647, %v4389_v0  ;;  %v753_v49 = vadd.f32 %v741_v8, %v713_v27  ;;  %v811_v58 = vmul.f32 %v4113_v10, %v4376_v25  ;;  %v851_v62 = vmul.f32 %v4118_v11, %v835_v9  ;;  %v3446_v54 = vpop.f32.mrf.mxu0 }
 0x11f   : > { %v971_v33 = vadd.f32 %v959_v5, %v931_v21  ;;  %v862_v53 = vadd.f32 %v850_v12, %v822_v2  ;;  %3524 = vmatpush3.msra.mxu1 %v1386_v24  ;;  %v891_v48 = vmul.f32 %v4127_v26, %v4338_v17  ;;  %v4417_v5 = vld [vmem:[#allocation2 + $0x62] sm:$0xff]  ;;  %v4423_v21 = vld [vmem:[#allocation2 + $0x6c] sm:$0xff]  ;;  %vm1280_vm2 = vcmp.lt.f32.partialorder %v4192_v60, 0.0 }
 0x120   : > { %v1058_v27 = vmul.f32 0.3275911, %v1046_v6  ;;  %v1214_v8 = vsub.f32 0.0, %v1046_v6  ;;  %v793_v0 = vadd.f32 %v781_v35, %v753_v49  ;;  %3525 = vmatprep.subr.mxu1 %v1385_v7  ;;  %v4419_v12 = vpop.eup %3698  ;;  %v945_v2 = vld [vmem:[#allocation2 + $0x6d] sm:$0xff]  ;;  %v4425_v30 = vpop.f32.mrf.mxu0  ;;  %v714_v49 = vmul.f32 %v4099_v59, %v4204_v16  ;;  %v1557_v40 = vld [vmem:[#allocation2 + $0x81] sm:$0xff] }
 0x121   : > { %6047 = vst [vmem:[#allocation15_spill] sm:$0xff] %v4419_v12  ;;  %v4421_v24 = vadd.f32 %v999_v20, %v971_v33  ;;  %v902_v9 = vadd.f32 %v890_v36, %v862_v53  ;;  %v985_v54 = vld [vmem:[#allocation2 + $0x6e] sm:$0xff]  ;;  %v742_v35 = vmul.f32 %v4092_v56, %v726_v28  ;;  %3526 = vmatpush3.msra.mxu1 %v1385_v7  ;;  %v4430_v17 = vpop.eup %3700  ;;  %656 = vst [vmem:[#allocation2 + $0x98] sm:$0xff] %v4425_v30  ;;  %v836_v36 = vld [vmem:[#allocation2 + $0x63] sm:$0xff] }
 0x122   : > { %6049 = vst [vmem:[#allocation17_spill] sm:$0xff] %v4430_v17  ;;  %v1070_v47 = vadd.f32 1.0, %v1058_v27  ;;  %v1226_v15 = vmul.f32 %v1214_v8, %v1046_v6  ;;  %v823_v12 = vadd.f32 %v811_v58, %v793_v0  ;;  %v782_v20 = vmul.f32 %v4107_v3, %v4348_v55  ;;  %3527 = vmatprep.subr.mxu1 %v1384_v52  ;;  %v3449_v6 = vpop.f32.mrf.mxu0 }
 0x123   : > { %6048 = vst [vmem:[#allocation16_spill] sm:$0xff] %v4421_v24  ;;  %1354 = vrot.lane.b32.xlu1 %v4421_v24, %s3862_s23  ;;  %v4438_v16 = vmul.f32 0.70710677, %v4421_v24  ;;  %v932_v28 = vadd.f32 %v920_v57, %v902_v9  ;;  %v754_v33 = vadd.f32 %v742_v35, %v714_v49  ;;  %v812_v53 = vmul.f32 %v4113_v10, %v4417_v5  ;;  %v4448_v9 = vld [vmem:[#allocation2 + $0x74] sm:$0xff] }
 0x124   : > { %3528 = vmatpush3.msra.mxu1 %v1384_v52  ;;  %v863_v0 = vadd.f32 %v851_v62, %v823_v12  ;;  %v921_v58 = vmul.f32 %v4136_v42, %v4423_v21  ;;  %v961_v55 = vmul.f32 %v4142_v45, %v945_v2  ;;  %v1001_v7 = vmul.f32 %v4147_v46, %v985_v54  ;;  %v4450_v49 = vpop.f32.mrf.mxu0  ;;  %v727_v35 = vld [vmem:[#allocation2 + $0x59] sm:$0xff] }
 0x125   : > { %6050 = vst [vmem:[#allocation18_spill] sm:$0xff] %v4438_v16  ;;  %v1047_v27 = vand.u32 2147483647, %v4438_v16  ;;  %v972_v8 = vadd.f32 %v960_v31, %v932_v28  ;;  %v794_v24 = vadd.f32 %v782_v20, %v754_v33  ;;  %v852_v57 = vmul.f32 %v4118_v11, %v836_v36  ;;  %657 = vst [vmem:[#allocation2 + $0xa0] sm:$0xff] %v4450_v49  ;;  %v4460_v28 = vld [vmem:[#allocation2 + $0x6a] sm:$0xff] }
 0x126   : > { %3708 = vrcp.f32 %v1070_v47  ;;  %v1244_v62 = vmul.f32 1.442695, %v1226_v15  ;;  %v903_v52 = vadd.f32 %v891_v48, %v863_v0  ;;  %v892_v12 = vmul.f32 %v4127_v26, %v4355_v23  ;;  %v4455_v2 = vpop.eup %3702  ;;  %v3452_v33 = vpop.f32.mrf.mxu0  ;;  %v946_v47 = vld [vmem:[#allocation2 + $0x75] sm:$0xff] }
 0x127   : > { %6051 = vst [vmem:[#allocation19_spill] sm:$0xff] %v4455_v2  ;;  %v1059_v54 = vmul.f32 0.3275911, %v1047_v27  ;;  %v1215_v31 = vsub.f32 0.0, %v1047_v27  ;;  %v4458_v20 = vadd.f32 %v4396_v38, %v972_v8  ;;  %v824_v36 = vadd.f32 %v812_v53, %v794_v24  ;;  %v1383_v0 = vld [vmem:[%s5941_s3 + $0x38] sm:$0xff] }
 0x128   : > { %v933_v6 = vadd.f32 %v921_v58, %v903_v52  ;;  %v922_v15 = vmul.f32 %v4136_v42, %v4448_v9  ;;  %v715_v23 = vmul.f32 %v4099_v59, %v4225_v43  ;;  %v743_v48 = vmul.f32 %v4092_v56, %v727_v35  ;;  %v4470_v38 = vpop.eup %3704  ;;  %v986_v8 = vld [vmem:[#allocation2 + $0x76] sm:$0xff]  ;;  %v837_v52 = vld [vmem:[#allocation2 + $0x6b] sm:$0xff]  ;;  %v4479_v35 = vpop.f32.mrf.mxu0  ;;  %3529 = vmatprep.subr.mxu1 %v1383_v0 }
 0x129   : > { %6052 = vst [vmem:[#allocation20_spill] sm:$0xff] %v4458_v20  ;;  %6053 = vst [vmem:[#allocation21_spill] sm:$0xff] %v4470_v38  ;;  %v1071_v24 = vadd.f32 1.0, %v1059_v54  ;;  %1356 = vrot.lane.b32.xlu0 %v4458_v20, %s3862_s23  ;;  %v4475_v53 = vmul.f32 0.70710677, %v4458_v20  ;;  %v864_v58 = vadd.f32 %v852_v57, %v824_v36  ;;  %v783_v43 = vmul.f32 %v4107_v3, %v4376_v25  ;;  %v4486_v38 = vpop.eup %3706 }
 0x12a   : > { %v1227_v33 = vmul.f32 %v1215_v31, %v1047_v27  ;;  %v973_v16 = vadd.f32 %v961_v55, %v933_v6  ;;  %v755_v2 = vadd.f32 %v743_v48, %v715_v23  ;;  %v813_v54 = vmul.f32 %v4113_v10, %v4460_v28  ;;  %658 = vst [vmem:[#allocation2 + $0xa8] sm:$0xff] %v4479_v35  ;;  %v3455_v25 = vpop.f32.mrf.mxu0  ;;  %v4492_v6 = vld [vmem:[#allocation2 + $0x7c] sm:$0xff] }
 0x12b   : > { %6054 = vst [vmem:[#allocation22_spill] sm:$0xff] %v4475_v53  ;;  %3530 = vmatpush3.msra.mxu1 %v1383_v0  ;;  %3710 = vpow2.f32 %v1244_v62  ;;  %v1048_v57 = vand.u32 2147483647, %v4475_v53  ;;  %v904_v36 = vadd.f32 %v892_v12, %v864_v58  ;;  %v962_v20 = vmul.f32 %v4142_v45, %v946_v47  ;;  %6055 = vst [vmem:[#allocation23_spill] sm:$0xff] %v4486_v38  ;;  %v1553_v0 = vld [vmem:[#allocation2 + $0x61] sm:$0xff]  ;;  %v4503_v58 = vld [vmem:[#allocation2 + $0x72] sm:$0xff] }
 0x12c   : > { %v4488_v61 = vadd.f32 %v1001_v7, %v973_v16  ;;  %v1002_v55 = vmul.f32 %v4147_v46, %v986_v8  ;;  %v795_v27 = vadd.f32 %v783_v43, %v755_v2  ;;  %v853_v31 = vmul.f32 %v4118_v11, %v837_v52  ;;  %v4494_v12 = vpop.f32.mrf.mxu0  ;;  %v947_v25 = vld [vmem:[#allocation2 + $0x7d] sm:$0xff]  ;;  %v4640_v38 = vld [vmem:[%s5940_s2 + $0x7] ss:$0 sm:$0xff] }
 0x12d   : > { %3712 = vrcp.f32 %v1071_v24  ;;  %v1060_v23 = vmul.f32 0.3275911, %v1048_v57  ;;  %v1216_v62 = vsub.f32 0.0, %v1048_v57  ;;  %v934_v48 = vadd.f32 %v922_v15, %v904_v36  ;;  %659 = vst [vmem:[#allocation2 + $0xb0] sm:$0xff] %v4494_v12  ;;  %v1560_v4 = vld [vmem:[#allocation2 + $0x99] sm:$0xff] }
 0x12e   : > { %6056 = vst [vmem:[#allocation24_spill] sm:$0xff] %v4488_v61  ;;  %v1246_v47 = vmul.f32 1.442695, %v1227_v33  ;;  %1358 = vrot.lane.b32.xlu1 %v4488_v61, %s3862_s23  ;;  %v4499_v16 = vmul.f32 0.70710677, %v4488_v61  ;;  %v825_v7 = vadd.f32 %v813_v54, %v795_v27  ;;  %v893_v2 = vmul.f32 %v4127_v26, %v4423_v21  ;;  %v3458_v52 = vpop.f32.mrf.mxu0  ;;  %v1382_v33 = vld [vmem:[%s5941_s3 + $0x30] sm:$0xff] }
 0x12f   : > { %v1072_v24 = vadd.f32 1.0, %v1060_v23  ;;  %v1228_v15 = vmul.f32 %v1216_v62, %v1048_v57  ;;  %v974_v8 = vadd.f32 %v962_v20, %v934_v48  ;;  %v923_v43 = vmul.f32 %v4136_v42, %v4492_v6  ;;  %v1381_v54 = vld [vmem:[%s5941_s3 + $0x28] sm:$0xff]  ;;  %3531 = vmatprep.subr.mxu1 %v1382_v33  ;;  %v987_v61 = vld [vmem:[#allocation2 + $0x7e] sm:$0xff] }
 0x130   : > { %6057 = vst [vmem:[#allocation25_spill] sm:$0xff] %v4499_v16  ;;  %v1049_v21 = vand.u32 2147483647, %v4499_v16  ;;  %v865_v36 = vadd.f32 %v853_v31, %v825_v7  ;;  %v1541_v57 = vmul.f32 %v4099_v59, %v4243_v14  ;;  %v1565_v20 = vmul.f32 %v4092_v56, %v1553_v0  ;;  %v4524_v52 = vpop.f32.mrf.mxu0  ;;  %3532 = vmatpush3.msra.mxu1 %v1382_v33  ;;  %v1651_v14 = vld [vmem:[#allocation2 + $0x73] sm:$0xff] }
 0x131   : > { %v1248_v27 = vmul.f32 1.442695, %v1228_v15  ;;  %v4518_v23 = vadd.f32 %v1002_v55, %v974_v8  ;;  %v1601_v62 = vmul.f32 %v4107_v3, %v4417_v5  ;;  %v1627_v48 = vmul.f32 %v4113_v10, %v4503_v58  ;;  %660 = vst [vmem:[#allocation2 + $0xb8] sm:$0xff] %v4524_v52  ;;  %3533 = vmatprep.subr.mxu1 %v1381_v54  ;;  %v1554_v15 = vld [vmem:[#allocation2 + $0x69] sm:$0xff] }
 0x132   : > { %v1061_v31 = vmul.f32 0.3275911, %v1049_v21  ;;  %v1217_v7 = vsub.f32 0.0, %v1049_v21  ;;  %v905_v16 = vadd.f32 %v893_v2, %v865_v36  ;;  %v1577_v59 = vadd.f32 %v1565_v20, %v1541_v57  ;;  %v3461_v5 = vpop.f32.mrf.mxu0  ;;  %3534 = vmatpush3.msra.mxu1 %v1381_v54  ;;  %v4538_v36 = vld [vmem:[#allocation2 + $0x84] sm:$0xff] }
 0x133   : > { %6058 = vst [vmem:[#allocation26_spill] sm:$0xff] %v4518_v23  ;;  %v4527_v56 = vpop.eup %3708  ;;  %3714 = vpow2.f32 %v1246_v47  ;;  %1360 = vrot.lane.b32.xlu0 %v4518_v23, %s3862_s23  ;;  %v4532_v3 = vmul.f32 0.70710677, %v4518_v23  ;;  %v963_v10 = vmul.f32 %v4142_v45, %v947_v25  ;;  %v1003_v47 = vmul.f32 %v4147_v46, %v987_v61  ;;  %v4548_v61 = vld [vmem:[%s5940_s2] ss:$0 sm:$0xff] }
 0x134   : > { %6059 = vst [vmem:[#allocation27_spill] sm:$0xff] %v4527_v56  ;;  %3716 = vrcp.f32 %v1072_v24  ;;  %v1229_v55 = vmul.f32 %v1217_v7, %v1049_v21  ;;  %v935_v0 = vadd.f32 %v923_v43, %v905_v16  ;;  %v1613_v2 = vadd.f32 %v1601_v62, %v1577_v59  ;;  %v4540_v57 = vpop.f32.mrf.mxu0  ;;  %v4542_v24 = vld [vmem:[#allocation2 + $0x7a] sm:$0xff]  ;;  %v1749_v21 = vld [vmem:[#allocation2 + $0x85] sm:$0xff] }
 0x135   : > { %6060 = vst [vmem:[#allocation28_spill] sm:$0xff] %v4532_v3  ;;  %3718 = vpow2.f32 %v1248_v27  ;;  %v1050_v8 = vand.u32 2147483647, %v4532_v3  ;;  %v1663_v33 = vmul.f32 %v4118_v11, %v1651_v14  ;;  %v1073_v20 = vadd.f32 1.0, %v1061_v31  ;;  %661 = vst [vmem:[#allocation2 + $0xc0] sm:$0xff] %v4540_v57  ;;  %v1380_v3 = vld [vmem:[%s5941_s3 + $0x20] sm:$0xff] }
 0x136   : > { %v1250_v25 = vmul.f32 1.442695, %v1229_v55  ;;  %v975_v5 = vadd.f32 %v963_v10, %v935_v0  ;;  %v1639_v54 = vadd.f32 %v1627_v48, %v1613_v2  ;;  %v1542_v11 = vmul.f32 %v4548_v61, %v4266_v44  ;;  %v4555_v27 = vld [vmem:[%s5940_s2 + $0x1] ss:$0 sm:$0xff]  ;;  %v3464_v48 = vpop.f32.mrf.mxu0  ;;  %v1785_v44 = vld [vmem:[#allocation2 + $0x86] sm:$0xff]  ;;  %3535 = vmatprep.subr.mxu1 %v1380_v3 }
 0x137   : > { %v1062_v16 = vmul.f32 0.3275911, %v1050_v8  ;;  %v1218_v43 = vsub.f32 0.0, %v1050_v8  ;;  %v1566_v62 = vmul.f32 %v4555_v27, %v1554_v15  ;;  %v1699_v14 = vmul.f32 %v4127_v26, %v4448_v9  ;;  %v4569_v2 = vld [vmem:[%s5940_s2 + $0x2] ss:$0 sm:$0xff]  ;;  %v4592_v48 = vld [vmem:[#allocation2 + $0x8c] sm:$0xff]  ;;  %3536 = vmatpush3.msra.mxu1 %v1380_v3 }
 0x138   : > { %v4558_v31 = vpop.eup %3710  ;;  %v4560_v7 = vadd.f32 %v1003_v47, %v975_v5  ;;  %v1675_v59 = vadd.f32 %v1663_v33, %v1639_v54  ;;  %v1725_v10 = vmul.f32 %v4136_v42, %v4538_v36  ;;  %v1602_v15 = vmul.f32 %v4569_v2, %v4460_v28  ;;  %v4576_v47 = vld [vmem:[%s5940_s2 + $0x3] ss:$0 sm:$0xff]  ;;  %v1652_v42 = vld [vmem:[#allocation2 + $0x7b] sm:$0xff]  ;;  %v4580_v9 = vpop.f32.mrf.mxu0  ;;  %v1555_v54 = vld [vmem:[#allocation2 + $0x71] sm:$0xff] }
 0x139   : > { %6061 = vst [vmem:[#allocation29_spill] sm:$0xff] %v4558_v31  ;;  %v1230_v55 = vmul.f32 %v1218_v43, %v1050_v8  ;;  %v1578_v0 = vadd.f32 %v1566_v62, %v1542_v11  ;;  %v1628_v26 = vmul.f32 %v4576_v47, %v4542_v24  ;;  %3720 = vrcp.f32 %v1073_v20  ;;  %662 = vst [vmem:[#allocation2 + $0xc8] sm:$0xff] %v4580_v9 }
 0x13a   : > { %6062 = vst [vmem:[#allocation30_spill] sm:$0xff] %v4560_v7  ;;  %v4582_v8 = vpop.eup %3712  ;;  %1362 = vrot.lane.b32.xlu1 %v4560_v7, %s3862_s23  ;;  %v4587_v33 = vmul.f32 0.70710677, %v4560_v7  ;;  %v1711_v28 = vadd.f32 %v1699_v14, %v1675_v59  ;;  %v1761_v5 = vmul.f32 %v4142_v45, %v1749_v21  ;;  %3722 = vpow2.f32 %v1250_v25  ;;  %v3467_v20 = vpop.f32.mrf.mxu0  ;;  %v1379_v59 = vld [vmem:[%s5941_s3 + $0x18] sm:$0xff]  ;;  %v4604_v25 = vld [vmem:[%s5940_s2 + $0x4] ss:$0 sm:$0xff] }
 0x13b   : > { %6063 = vst [vmem:[#allocation31_spill] sm:$0xff] %v4582_v8  ;;  %v1074_v43 = vadd.f32 1.0, %v1062_v16  ;;  %v1797_v11 = vmul.f32 %v4147_v46, %v1785_v44  ;;  %v1614_v62 = vadd.f32 %v1602_v15, %v1578_v0  ;;  %v1664_v46 = vmul.f32 %v4604_v25, %v1652_v42  ;;  %v4610_v16 = vld [vmem:[%s5940_s2 + $0x5] ss:$0 sm:$0xff]  ;;  %v1750_v15 = vld [vmem:[#allocation2 + $0x8d] sm:$0xff]  ;;  %3537 = vmatprep.subr.mxu1 %v1379_v59 }
 0x13c   : > { %6064 = vst [vmem:[#allocation32_spill] sm:$0xff] %v4587_v33  ;;  %v1051_v45 = vand.u32 2147483647, %v4587_v33  ;;  %v1737_v21 = vadd.f32 %v1725_v10, %v1711_v28  ;;  %v1700_v14 = vmul.f32 %v4610_v16, %v4492_v6  ;;  %v4614_v44 = vld [vmem:[#allocation2 + $0x82] sm:$0xff]  ;;  %v1252_v0 = vmul.f32 1.442695, %v1230_v55  ;;  %v4619_v33 = vpop.f32.mrf.mxu0  ;;  %3538 = vmatpush3.msra.mxu1 %v1379_v59 }
 0x13d   : > { %v1640_v10 = vadd.f32 %v1628_v26, %v1614_v62  ;;  %v1786_v28 = vld [vmem:[#allocation2 + $0x8e] sm:$0xff]  ;;  %v1543_v20 = vmul.f32 %v4548_v61, %v4285_v18  ;;  %v1567_v42 = vmul.f32 %v4555_v27, %v1555_v54  ;;  %v4624_v6 = vld [vmem:[%s5940_s2 + $0x6] ss:$0 sm:$0xff]  ;;  %663 = vst [vmem:[#allocation2 + $0xd0] sm:$0xff] %v4619_v33  ;;  %v1603_v3 = vmul.f32 %v4569_v2, %v4503_v58  ;;  %v4646_v58 = vld [vmem:[%s5940_s2 + $0x8] ss:$0 sm:$0xff] }
 0x13e   : > { %v1063_v7 = vmul.f32 0.3275911, %v1051_v45  ;;  %v1219_v23 = vsub.f32 0.0, %v1051_v45  ;;  %v1773_v53 = vadd.f32 %v1761_v5, %v1737_v21  ;;  %v1726_v55 = vmul.f32 %v4624_v6, %v4592_v48  ;;  %v1653_v26 = vld [vmem:[#allocation2 + $0x83] sm:$0xff]  ;;  %v3470_v62 = vpop.f32.mrf.mxu0  ;;  %v1556_v59 = vld [vmem:[#allocation2 + $0x79] sm:$0xff] }
 0x13f   : > { %v1676_v18 = vadd.f32 %v1664_v46, %v1640_v10  ;;  %v1579_v54 = vadd.f32 %v1567_v42, %v1543_v20  ;;  %v1629_v5 = vmul.f32 %v4576_v47, %v4614_v44  ;;  %3724 = vrcp.f32 %v1074_v43  ;;  %v4652_v42 = vld [vmem:[#allocation2 + $0x94] sm:$0xff] }
 0x140   : > { %v4633_v21 = vpop.eup %3714  ;;  %v4635_v31 = vadd.f32 %v1797_v11, %v1773_v53  ;;  %v1762_v46 = vmul.f32 %v4640_v38, %v1750_v15  ;;  %v1798_v10 = vmul.f32 %v4646_v58, %v1786_v28  ;;  %3726 = vpow2.f32 %v1252_v0  ;;  %v1751_v62 = vld [vmem:[#allocation2 + $0x95] sm:$0xff]  ;;  %v4665_v0 = vld [vmem:[#allocation2 + $0x8a] sm:$0xff] }
 0x141   : > { %6065 = vst [vmem:[#allocation33_spill] sm:$0xff] %v4633_v21  ;;  %v4649_v20 = vpop.eup %3716  ;;  %v1712_v53 = vadd.f32 %v1700_v14, %v1676_v18  ;;  %v1615_v43 = vadd.f32 %v1603_v3, %v1579_v54  ;;  %v1665_v11 = vmul.f32 %v4604_v25, %v1653_v26  ;;  %v4654_v21 = vpop.f32.mrf.mxu0  ;;  %v1075_v8 = vadd.f32 1.0, %v1063_v7 }
 0x142   : > { %6066 = vst [vmem:[#allocation34_spill] sm:$0xff] %v4635_v31  ;;  %6067 = vst [vmem:[#allocation35_spill] sm:$0xff] %v4649_v20  ;;  %v4656_v15 = vpop.eup %3718  ;;  %v1231_v56 = vmul.f32 %v1219_v23, %v1051_v45  ;;  %2145 = vrot.lane.b32.xlu0 %v4635_v31, %s3862_s23  ;;  %v4661_v28 = vmul.f32 0.70710677, %v4635_v31  ;;  %v1701_v14 = vmul.f32 %v4610_v16, %v4538_v36  ;;  %v1787_v36 = vld [vmem:[#allocation2 + $0x96] sm:$0xff]  ;;  %vm1281_vm3 = vcmp.lt.f32.partialorder %v4214_v29, 0.0 }
 0x143   : > { %6068 = vst [vmem:[#allocation36_spill] sm:$0xff] %v4656_v15  ;;  %664 = vst [vmem:[#allocation2 + $0xd8] sm:$0xff] %v4654_v21  ;;  %v1738_v26 = vadd.f32 %v1726_v55, %v1712_v53  ;;  %v1641_v18 = vadd.f32 %v1629_v5, %v1615_v43  ;;  %v1544_v54 = vmul.f32 %v4548_v61, %v4309_v19  ;;  %v3473_v7 = vpop.f32.mrf.mxu0  ;;  %v1654_v53 = vld [vmem:[#allocation2 + $0x8b] sm:$0xff]  ;;  %3728 = vrcp.f32 %v1075_v8 }
 0x144   : > { %6069 = vst [vmem:[#allocation37_spill] sm:$0xff] %v4661_v28  ;;  %v1568_v23 = vmul.f32 %v4555_v27, %v1556_v59  ;;  %v1845_v45 = vand.u32 2147483647, %v4661_v28  ;;  %v1727_v3 = vmul.f32 %v4624_v6, %v4652_v42  ;;  %v1763_v31 = vmul.f32 %v4640_v38, %v1751_v62 }
 0x145   : > { %v1604_v15 = vmul.f32 %v4569_v2, %v4542_v24  ;;  %v1774_v20 = vadd.f32 %v1762_v46, %v1738_v26  ;;  %v1677_v55 = vadd.f32 %v1665_v11, %v1641_v18  ;;  %v1630_v19 = vmul.f32 %v4576_v47, %v4665_v0  ;;  %v4679_v59 = vpop.f32.mrf.mxu0  ;;  %v4687_v26 = vld [vmem:[#allocation2 + $0x9c] sm:$0xff] }
 0x146   : > { %v1580_v5 = vadd.f32 %v1568_v23, %v1544_v54  ;;  %v1254_v43 = vmul.f32 1.442695, %v1231_v56  ;;  %v1857_v7 = vmul.f32 0.3275911, %v1845_v45  ;;  %v2013_v28 = vsub.f32 0.0, %v1845_v45  ;;  %665 = vst [vmem:[#allocation2 + $0xe0] sm:$0xff] %v4679_v59  ;;  %v4682_v62 = vpop.eup %3720 }
 0x147   : > { %6070 = vst [vmem:[#allocation38_spill] sm:$0xff] %v4682_v62  ;;  %v4684_v17 = vadd.f32 %v1798_v10, %v1774_v20  ;;  %v1713_v24 = vadd.f32 %v1701_v14, %v1677_v55  ;;  %v1799_v46 = vmul.f32 %v4646_v58, %v1787_v36  ;;  %v3476_v18 = vpop.f32.mrf.mxu0  ;;  %v4689_v54 = vpop.eup %3722  ;;  %v1666_v23 = vmul.f32 %v4604_v25, %v1654_v53  ;;  %v4700_v36 = vld [vmem:[#allocation2 + $0x92] sm:$0xff]  ;;  %v1752_v53 = vld [vmem:[#allocation2 + $0x9d] sm:$0xff] }
 0x148   : > { %v1616_v11 = vadd.f32 %v1604_v15, %v1580_v5  ;;  %6072 = vst [vmem:[#allocation40_spill] sm:$0xff] %v4689_v54  ;;  %v1869_v8 = vadd.f32 1.0, %v1857_v7  ;;  %v2025_v56 = vmul.f32 %v2013_v28, %v1845_v45  ;;  %v1545_v22 = vmul.f32 %v4548_v61, %v4342_v34  ;;  %v1378_v18 = vld [vmem:[%s5941_s3 + $0x10] sm:$0xff]  ;;  %v4730_v54 = vld [vmem:[#allocation2 + $0xa4] sm:$0xff] }
 0x149   : > { %6071 = vst [vmem:[#allocation39_spill] sm:$0xff] %v4684_v17  ;;  %2147 = vrot.lane.b32.xlu1 %v4684_v17, %s3862_s23  ;;  %v4697_v10 = vmul.f32 0.70710677, %v4684_v17  ;;  %v1739_v20 = vadd.f32 %v1727_v3, %v1713_v24  ;;  %v1569_v14 = vmul.f32 %v4555_v27, %v1557_v40  ;;  %v4702_v55 = vpop.f32.mrf.mxu0  ;;  %3730 = vpow2.f32 %v1254_v43  ;;  %v1788_v40 = vld [vmem:[#allocation2 + $0x9e] sm:$0xff]  ;;  %3539 = vmatprep.subr.mxu1 %v1378_v18 }
 0x14a   : > { %v1642_v15 = vadd.f32 %v1630_v19, %v1616_v11  ;;  %v2037_v28 = vmul.f32 1.442695, %v2025_v56  ;;  %v1702_v45 = vmul.f32 %v4610_v16, %v4592_v48  ;;  %v1728_v34 = vmul.f32 %v4624_v6, %v4687_v26  ;;  %666 = vst [vmem:[#allocation2 + $0xe8] sm:$0xff] %v4702_v55  ;;  %v1655_v11 = vld [vmem:[#allocation2 + $0x93] sm:$0xff]  ;;  %3540 = vmatpush3.msra.mxu1 %v1378_v18  ;;  %v1753_v18 = vld [vmem:[#allocation2 + $0xa5] sm:$0xff] }
 0x14b   : > { %6073 = vst [vmem:[#allocation41_spill] sm:$0xff] %v4697_v10  ;;  %v1846_v5 = vand.u32 2147483647, %v4697_v10  ;;  %v1775_v3 = vadd.f32 %v1763_v31, %v1739_v20  ;;  %v1581_v7 = vadd.f32 %v1569_v14, %v1545_v22  ;;  %v3479_v24 = vpop.f32.mrf.mxu0  ;;  %3732 = vrcp.f32 %v1869_v8  ;;  %v1377_v31 = vld [vmem:[%s5941_s3 + $0x8] sm:$0xff] }
 0x14c   : > { %v1678_v19 = vadd.f32 %v1666_v23, %v1642_v15  ;;  %v1605_v43 = vmul.f32 %v4569_v2, %v4614_v44  ;;  %v1631_v48 = vmul.f32 %v4576_v47, %v4700_v36  ;;  %v4720_v56 = vpop.eup %3724  ;;  %v1558_v44 = vld [vmem:[#allocation2 + $0x89] sm:$0xff]  ;;  %3734 = vpow2.f32 %v2037_v28  ;;  %3541 = vmatprep.subr.mxu1 %v1377_v31 }
 0x14d   : > { %6074 = vst [vmem:[#allocation42_spill] sm:$0xff] %v4720_v56  ;;  %v1858_v22 = vmul.f32 0.3275911, %v1846_v5  ;;  %v2014_v23 = vsub.f32 0.0, %v1846_v5  ;;  %v4722_v8 = vadd.f32 %v1799_v46, %v1775_v3  ;;  %v4724_v15 = vpop.f32.mrf.mxu0  ;;  %v4726_v14 = vpop.eup %3726  ;;  %v1764_v24 = vmul.f32 %v4640_v38, %v1752_v53  ;;  %3542 = vmatpush3.msra.mxu1 %v1377_v31 }
 0x14e   : > { %v1714_v20 = vadd.f32 %v1702_v45, %v1678_v19  ;;  %6076 = vst [vmem:[#allocation44_spill] sm:$0xff] %v4726_v14  ;;  %v1800_v10 = vmul.f32 %v4646_v58, %v1788_v40  ;;  %v1617_v17 = vadd.f32 %v1605_v43, %v1581_v7  ;;  %667 = vst [vmem:[#allocation2 + $0xf0] sm:$0xff] %v4724_v15  ;;  %v4741_v19 = vld [vmem:[#allocation2 + $0x9a] sm:$0xff]  ;;  %v1789_v14 = vld [vmem:[#allocation2 + $0xa6] sm:$0xff] }
 0x14f   : > { %6075 = vst [vmem:[#allocation43_spill] sm:$0xff] %v4722_v8  ;;  %2149 = vrot.lane.b32.xlu0 %v4722_v8, %s3862_s23  ;;  %v4736_v46 = vmul.f32 0.70710677, %v4722_v8  ;;  %v1667_v3 = vmul.f32 %v4604_v25, %v1655_v11  ;;  %v1546_v28 = vmul.f32 %v4548_v61, %v4357_v37  ;;  %v3482_v53 = vpop.f32.mrf.mxu0  ;;  %v1870_v40 = vadd.f32 1.0, %v1858_v22 }
 0x150   : > { %v1740_v45 = vadd.f32 %v1728_v34, %v1714_v20  ;;  %v2026_v7 = vmul.f32 %v2014_v23, %v1846_v5  ;;  %v1643_v43 = vadd.f32 %v1631_v48, %v1617_v17  ;;  %v1570_v56 = vmul.f32 %v4555_v27, %v1558_v44  ;;  %v1656_v48 = vld [vmem:[#allocation2 + $0x9b] sm:$0xff]  ;;  %v4756_v31 = vpop.eup %3728 }
 0x151   : > { %6077 = vst [vmem:[#allocation45_spill] sm:$0xff] %v4736_v46  ;;  %v1847_v8 = vand.u32 2147483647, %v4736_v46  ;;  %v1703_v11 = vmul.f32 %v4610_v16, %v4652_v42  ;;  %v1729_v37 = vmul.f32 %v4624_v6, %v4730_v54  ;;  %v4749_v20 = vpop.f32.mrf.mxu0  ;;  %v1606_v17 = vmul.f32 %v4569_v2, %v4665_v0  ;;  %6078 = vst [vmem:[#allocation46_spill] sm:$0xff] %v4756_v31 }
 0x152   : > { %v1776_v34 = vadd.f32 %v1764_v24, %v1740_v45  ;;  %v1679_v53 = vadd.f32 %v1667_v3, %v1643_v43  ;;  %v1582_v22 = vadd.f32 %v1570_v56, %v1546_v28  ;;  %v1632_v5 = vmul.f32 %v4576_v47, %v4741_v19  ;;  %668 = vst [vmem:[#allocation2 + $0xf8] sm:$0xff] %v4749_v20  ;;  %v1559_v45 = vld [vmem:[#allocation2 + $0x91] sm:$0xff] }
 0x153   : > { %v2015_v23 = vsub.f32 0.0, %v1847_v8  ;;  %v1765_v44 = vmul.f32 %v4640_v38, %v1753_v18  ;;  %v1801_v24 = vmul.f32 %v4646_v58, %v1789_v14  ;;  %v3485_v56 = vpop.f32.mrf.mxu0  ;;  %3736 = vrcp.f32 %v1870_v40  ;;  %v4762_v43 = vld [vmem:[#allocation2 + $0xac] sm:$0xff]  ;;  %v4772_v18 = vld [vmem:[#allocation2 + $0xa2] sm:$0xff] }
 0x154   : > { %v4758_v42 = vadd.f32 %v1800_v10, %v1776_v34  ;;  %v2039_v3 = vmul.f32 1.442695, %v2026_v7  ;;  %v1715_v0 = vadd.f32 %v1703_v11, %v1679_v53  ;;  %v1618_v28 = vadd.f32 %v1606_v17, %v1582_v22  ;;  %v1754_v56 = vld [vmem:[#allocation2 + $0xad] sm:$0xff] }
 0x155   : > { %v1859_v46 = vmul.f32 0.3275911, %v1847_v8  ;;  %v1668_v10 = vmul.f32 %v4604_v25, %v1656_v48  ;;  %v1704_v14 = vmul.f32 %v4610_v16, %v4687_v26  ;;  %v1547_v34 = vmul.f32 %v4548_v61, %v4398_v63 }
 0x156   : > { %6079 = vst [vmem:[#allocation47_spill] sm:$0xff] %v4758_v42  ;;  %2151 = vrot.lane.b32.xlu1 %v4758_v42, %s3862_s23  ;;  %v4767_v31 = vmul.f32 0.70710677, %v4758_v42  ;;  %v1741_v40 = vadd.f32 %v1729_v37, %v1715_v0  ;;  %v1644_v7 = vadd.f32 %v1632_v5, %v1618_v28  ;;  %v1571_v11 = vmul.f32 %v4555_v27, %v1559_v45  ;;  %v4777_v53 = vpop.eup %3730  ;;  %v1790_v5 = vld [vmem:[#allocation2 + $0xae] sm:$0xff] }
 0x157   : > { %6081 = vst [vmem:[#allocation49_spill] sm:$0xff] %v4777_v53  ;;  %v2027_v22 = vmul.f32 %v2015_v23, %v1847_v8  ;;  %v1730_v48 = vmul.f32 %v4624_v6, %v4762_v43  ;;  %v1607_v26 = vmul.f32 %v4569_v2, %v4700_v36  ;;  %v1633_v63 = vmul.f32 %v4576_v47, %v4772_v18  ;;  %v1657_v23 = vld [vmem:[#allocation2 + $0xa3] sm:$0xff] }
 0x158   : > { %6080 = vst [vmem:[#allocation48_spill] sm:$0xff] %v4767_v31  ;;  %v1848_v17 = vand.u32 2147483647, %v4767_v31  ;;  %v1777_v42 = vadd.f32 %v1765_v44, %v1741_v40  ;;  %v1680_v37 = vadd.f32 %v1668_v10, %v1644_v7  ;;  %v1583_v0 = vadd.f32 %v1571_v11, %v1547_v34  ;;  %v4786_v45 = vpop.eup %3732  ;;  %v4794_v34 = vld [vmem:[#allocation2 + $0xb4] sm:$0xff]  ;;  %v4802_v11 = vld [vmem:[#allocation2 + $0xaa] sm:$0xff] }
 0x159   : > { %3738 = vpow2.f32 %v2039_v3  ;;  %v1766_v53 = vmul.f32 %v4640_v38, %v1754_v56  ;;  %v4791_v36 = vpop.eup %3734  ;;  %v1871_v44 = vadd.f32 1.0, %v1859_v46  ;;  %v2041_v10 = vmul.f32 1.442695, %v2027_v22 }
 0x15a   : > { %v2016_v8 = vsub.f32 0.0, %v1848_v17  ;;  %v4788_v28 = vadd.f32 %v1801_v24, %v1777_v42  ;;  %v1716_v31 = vadd.f32 %v1704_v14, %v1680_v37  ;;  %v1619_v62 = vadd.f32 %v1607_v26, %v1583_v0  ;;  %6083 = vst [vmem:[#allocation51_spill] sm:$0xff] %v4791_v36 }
 0x15b   : > { %v1860_v40 = vmul.f32 0.3275911, %v1848_v17  ;;  %v1802_v7 = vmul.f32 %v4646_v58, %v1790_v5  ;;  %v1669_v14 = vmul.f32 %v4604_v25, %v1657_v23  ;;  %v1705_v46 = vmul.f32 %v4610_v16, %v4730_v54 }
 0x15c   : > { %6082 = vst [vmem:[#allocation50_spill] sm:$0xff] %v4788_v28  ;;  %2153 = vrot.lane.b32.xlu0 %v4788_v28, %s3862_s23  ;;  %v4799_v42 = vmul.f32 0.70710677, %v4788_v28  ;;  %v1742_v24 = vadd.f32 %v1730_v48, %v1716_v31  ;;  %v1645_v3 = vadd.f32 %v1633_v63, %v1619_v62  ;;  %v2028_v56 = vmul.f32 %v2016_v8, %v1848_v17  ;;  %v1755_v31 = vld [vmem:[#allocation2 + $0xb5] sm:$0xff] }
 0x15d   : > { %v1548_v22 = vmul.f32 %v4548_v61, %v4425_v30  ;;  %v1572_v26 = vmul.f32 %v4555_v27, %v1560_v4  ;;  %v1731_v62 = vmul.f32 %v4624_v6, %v4794_v34  ;;  %v1791_v48 = vld [vmem:[#allocation2 + $0xb6] sm:$0xff]  ;;  %3740 = vrcp.f32 %v1871_v44  ;;  %v1658_v30 = vld [vmem:[#allocation2 + $0xab] sm:$0xff]  ;;  %v1376_v4 = vld [vmem:[%s5941_s3] sm:$0xff] }
 0x15e   : > { %6084 = vst [vmem:[#allocation52_spill] sm:$0xff] %v4799_v42  ;;  %v1849_v37 = vand.u32 2147483647, %v4799_v42  ;;  %v1778_v5 = vadd.f32 %v1766_v53, %v1742_v24  ;;  %v1681_v0 = vadd.f32 %v1669_v14, %v1645_v3  ;;  %v1608_v17 = vmul.f32 %v4569_v2, %v4741_v19  ;;  %v1561_v24 = vld [vmem:[#allocation2 + $0xa1] sm:$0xff]  ;;  %3543 = vmatprep.subr.mxu1 %v1376_v4 }
 0x15f   : > { %v1584_v63 = vadd.f32 %v1572_v26, %v1548_v22  ;;  %v1634_v54 = vmul.f32 %v4576_v47, %v4802_v11  ;;  %3742 = vpow2.f32 %v2041_v10  ;;  %v1872_v53 = vadd.f32 1.0, %v1860_v40  ;;  %v4825_v26 = vld [vmem:[#allocation2 + $0xbc] sm:$0xff]  ;;  %3544 = vmatpush3.msra.mxu1 %v1376_v4 }
 0x160   : > { %v4819_v8 = vadd.f32 %v1802_v7, %v1778_v5  ;;  %v1717_v23 = vadd.f32 %v1705_v46, %v1681_v0  ;;  %v4821_v44 = vpop.eup %3736  ;;  %v2043_v3 = vmul.f32 1.442695, %v2028_v56  ;;  %v1767_v19 = vmul.f32 %v4640_v38, %v1755_v31  ;;  %v4833_v46 = vld [vmem:[#allocation2 + $0xb2] sm:$0xff] }
 0x161   : > { %v1803_v14 = vmul.f32 %v4646_v58, %v1791_v48  ;;  %v1620_v22 = vadd.f32 %v1608_v17, %v1584_v63  ;;  %v2017_v28 = vsub.f32 0.0, %v1849_v37  ;;  %v1670_v7 = vmul.f32 %v4604_v25, %v1658_v30  ;;  %v1756_v30 = vld [vmem:[#allocation2 + $0xbd] sm:$0xff] }
 0x162   : > { %6085 = vst [vmem:[#allocation53_spill] sm:$0xff] %v4819_v8  ;;  %2155 = vrot.lane.b32.xlu1 %v4819_v8, %s3862_s23  ;;  %v4830_v10 = vmul.f32 0.70710677, %v4819_v8  ;;  %v1743_v40 = vadd.f32 %v1731_v62, %v1717_v23  ;;  %v1861_v56 = vmul.f32 0.3275911, %v1849_v37  ;;  %v1549_v0 = vmul.f32 %v4548_v61, %v4450_v49 }
 0x163   : > { %v1646_v5 = vadd.f32 %v1634_v54, %v1620_v22  ;;  %v1573_v31 = vmul.f32 %v4555_v27, %v1561_v24  ;;  %v1706_v17 = vmul.f32 %v4610_v16, %v4762_v43  ;;  %v1732_v62 = vmul.f32 %v4624_v6, %v4825_v26  ;;  %v1659_v43 = vld [vmem:[#allocation2 + $0xb3] sm:$0xff] }
 0x164   : > { %6086 = vst [vmem:[#allocation54_spill] sm:$0xff] %v4830_v10  ;;  %v1850_v48 = vand.u32 2147483647, %v4830_v10  ;;  %v1779_v63 = vadd.f32 %v1767_v19, %v1743_v40  ;;  %v1609_v54 = vmul.f32 %v4569_v2, %v4772_v18  ;;  %v1635_v49 = vmul.f32 %v4576_v47, %v4833_v46  ;;  %v1792_v40 = vld [vmem:[#allocation2 + $0xbe] sm:$0xff] }
 0x165   : > { %v1682_v4 = vadd.f32 %v1670_v7, %v1646_v5  ;;  %v1585_v23 = vadd.f32 %v1573_v31, %v1549_v0  ;;  %3744 = vrcp.f32 %v1872_v53  ;;  %v2029_v24 = vmul.f32 %v2017_v28, %v1849_v37  ;;  %v4851_v7 = vld [vmem:[#allocation2 + $0xc4] sm:$0xff] }
 0x166   : > { %v4847_v22 = vpop.eup %3738  ;;  %v4849_v19 = vadd.f32 %v1803_v14, %v1779_v63  ;;  %3746 = vpow2.f32 %v2043_v3  ;;  %v1873_v5 = vadd.f32 1.0, %v1861_v56  ;;  %v2018_v0 = vsub.f32 0.0, %v1850_v48  ;;  %v1562_v28 = vld [vmem:[#allocation2 + $0xa9] sm:$0xff] }
 0x167   : > { %6087 = vst [vmem:[#allocation55_spill] sm:$0xff] %v4847_v22  ;;  %v1718_v10 = vadd.f32 %v1706_v17, %v1682_v4  ;;  %v1621_v8 = vadd.f32 %v1609_v54, %v1585_v23  ;;  %v1768_v53 = vmul.f32 %v4640_v38, %v1756_v30  ;;  %v1804_v14 = vmul.f32 %v4646_v58, %v1792_v40  ;;  %v4865_v23 = vld [vmem:[#allocation2 + $0xba] sm:$0xff] }
 0x168   : > { %6088 = vst [vmem:[#allocation56_spill] sm:$0xff] %v4849_v19  ;;  %2157 = vrot.lane.b32.xlu0 %v4849_v19, %s3862_s23  ;;  %v4856_v18 = vmul.f32 0.70710677, %v4849_v19  ;;  %v1671_v3 = vmul.f32 %v4604_v25, %v1659_v43  ;;  %v2045_v63 = vmul.f32 1.442695, %v2029_v24  ;;  %v1707_v56 = vmul.f32 %v4610_v16, %v4794_v34  ;;  %v1757_v24 = vld [vmem:[#allocation2 + $0xc5] sm:$0xff] }
 0x169   : > { %v1744_v37 = vadd.f32 %v1732_v62, %v1718_v10  ;;  %v1647_v31 = vadd.f32 %v1635_v49, %v1621_v8  ;;  %v1862_v17 = vmul.f32 0.3275911, %v1850_v48  ;;  %v1733_v4 = vmul.f32 %v4624_v6, %v4851_v7 }
 0x16a   : > { %6089 = vst [vmem:[#allocation57_spill] sm:$0xff] %v4856_v18  ;;  %v1550_v10 = vmul.f32 %v4548_v61, %v4479_v35  ;;  %v1574_v62 = vmul.f32 %v4555_v27, %v1562_v28  ;;  %v4870_v8 = vpop.eup %3740  ;;  %3748 = vrcp.f32 %v1873_v5  ;;  %v2030_v30 = vmul.f32 %v2018_v0, %v1850_v48  ;;  %v1660_v5 = vld [vmem:[#allocation2 + $0xbb] sm:$0xff]  ;;  %v1563_v48 = vld [vmem:[#allocation2 + $0xb1] sm:$0xff] }
 0x16b   : > { %v1780_v54 = vadd.f32 %v1768_v53, %v1744_v37  ;;  %v1683_v19 = vadd.f32 %v1671_v3, %v1647_v31  ;;  %v1851_v49 = vand.u32 2147483647, %v4856_v18  ;;  %v1610_v34 = vmul.f32 %v4569_v2, %v4802_v11  ;;  %v1793_v37 = vld [vmem:[#allocation2 + $0xc6] sm:$0xff] }
 0x16c   : > { %v4875_v40 = vpop.eup %3742  ;;  %v1586_v31 = vadd.f32 %v1574_v62, %v1550_v10  ;;  %v1636_v35 = vmul.f32 %v4576_v47, %v4865_v23  ;;  %3750 = vpow2.f32 %v2045_v63  ;;  %v1874_v28 = vadd.f32 1.0, %v1862_v17  ;;  %v4888_v62 = vld [vmem:[#allocation2 + $0xcc] sm:$0xff] }
 0x16d   : > { %6090 = vst [vmem:[#allocation58_spill] sm:$0xff] %v4875_v40  ;;  %v4877_v43 = vadd.f32 %v1804_v14, %v1780_v54  ;;  %v1719_v53 = vadd.f32 %v1707_v56, %v1683_v19  ;;  %v1769_v14 = vmul.f32 %v4640_v38, %v1757_v24  ;;  %v2047_v19 = vmul.f32 1.442695, %v2030_v30  ;;  %v4892_v40 = vld [vmem:[#allocation2 + $0xc2] sm:$0xff] }
 0x16e   : > { %v1622_v3 = vadd.f32 %v1610_v34, %v1586_v31  ;;  %v1863_v56 = vmul.f32 0.3275911, %v1851_v49  ;;  %v2019_v54 = vsub.f32 0.0, %v1851_v49  ;;  %v1805_v10 = vmul.f32 %v4646_v58, %v1793_v37 }
 0x16f   : > { %6091 = vst [vmem:[#allocation59_spill] sm:$0xff] %v4877_v43  ;;  %2159 = vrot.lane.b32.xlu1 %v4877_v43, %s3862_s23  ;;  %v4884_v0 = vmul.f32 0.70710677, %v4877_v43  ;;  %v1745_v11 = vadd.f32 %v1733_v4, %v1719_v53  ;;  %v1672_v18 = vmul.f32 %v4604_v25, %v1660_v5  ;;  %v1575_v42 = vmul.f32 %v4555_v27, %v1563_v48  ;;  %v1564_v5 = vld [vmem:[#allocation2 + $0xb9] sm:$0xff] }
 0x170   : > { %v1648_v17 = vadd.f32 %v1636_v35, %v1622_v3  ;;  %3752 = vrcp.f32 %v1874_v28  ;;  %v1708_v4 = vmul.f32 %v4610_v16, %v4825_v26  ;;  %v1551_v30 = vmul.f32 %v4548_v61, %v4494_v12  ;;  %v1758_v35 = vld [vmem:[#allocation2 + $0xcd] sm:$0xff] }
 0x171   : > { %6092 = vst [vmem:[#allocation60_spill] sm:$0xff] %v4884_v0  ;;  %v1781_v63 = vadd.f32 %v1769_v14, %v1745_v11  ;;  %v1852_v34 = vand.u32 2147483647, %v4884_v0  ;;  %v1734_v31 = vmul.f32 %v4624_v6, %v4888_v62  ;;  %3754 = vpow2.f32 %v2047_v19  ;;  %v1661_v11 = vld [vmem:[#allocation2 + $0xc3] sm:$0xff]  ;;  %v1794_v19 = vld [vmem:[#allocation2 + $0xce] sm:$0xff] }
 0x172   : > { %v4898_v24 = vpop.eup %3744  ;;  %v1684_v37 = vadd.f32 %v1672_v18, %v1648_v17  ;;  %v1587_v28 = vadd.f32 %v1575_v42, %v1551_v30  ;;  %v1611_v26 = vmul.f32 %v4569_v2, %v4833_v46  ;;  %v1637_v12 = vmul.f32 %v4576_v47, %v4892_v40  ;;  %v4923_v43 = vld [vmem:[#allocation2 + $0xd4] sm:$0xff] }
 0x173   : > { %v4901_v53 = vadd.f32 %v1805_v10, %v1781_v63  ;;  %v4905_v48 = vpop.eup %3746  ;;  %v1875_v14 = vadd.f32 1.0, %v1863_v56  ;;  %v2031_v3 = vmul.f32 %v2019_v54, %v1851_v49  ;;  %v4916_v63 = vld [vmem:[#allocation2 + $0xca] sm:$0xff]  ;;  %v1770_v42 = vmul.f32 %v4640_v38, %v1758_v35 }
 0x174   : > { %6094 = vst [vmem:[#allocation62_spill] sm:$0xff] %v4905_v48  ;;  %v1720_v10 = vadd.f32 %v1708_v4, %v1684_v37  ;;  %v1623_v17 = vadd.f32 %v1611_v26, %v1587_v28  ;;  %v1552_v46 = vmul.f32 %v4548_v61, %v4524_v52  ;;  %v1576_v30 = vmul.f32 %v4555_v27, %v1564_v5  ;;  %v1759_v4 = vld [vmem:[#allocation2 + $0xd5] sm:$0xff] }
 0x175   : > { %6093 = vst [vmem:[#allocation61_spill] sm:$0xff] %v4901_v53  ;;  %2161 = vrot.lane.b32.xlu0 %v4901_v53, %s3862_s23  ;;  %v4914_v18 = vmul.f32 0.70710677, %v4901_v53  ;;  %v1864_v56 = vmul.f32 0.3275911, %v1852_v34  ;;  %v2020_v49 = vsub.f32 0.0, %v1852_v34  ;;  %v1673_v0 = vmul.f32 %v4604_v25, %v1661_v11 }
 0x176   : > { %v1746_v54 = vadd.f32 %v1734_v31, %v1720_v10  ;;  %v1649_v53 = vadd.f32 %v1637_v12, %v1623_v17  ;;  %v1588_v37 = vadd.f32 %v1576_v30, %v1552_v46  ;;  %v1612_v35 = vmul.f32 %v4569_v2, %v4865_v23  ;;  %v1662_v11 = vld [vmem:[#allocation2 + $0xcb] sm:$0xff]  ;;  %v4937_v46 = vld [vmem:[#allocation2 + $0xdc] sm:$0xff] }
 0x177   : > { %6095 = vst [vmem:[#allocation63_spill] sm:$0xff] %v4914_v18  ;;  %v1638_v28 = vmul.f32 %v4576_v47, %v4916_v63  ;;  %v4929_v26 = vpop.eup %3748  ;;  %3756 = vrcp.f32 %v1875_v14  ;;  %v1853_v52 = vand.u32 2147483647, %v4914_v18  ;;  %v1806_v31 = vmul.f32 %v4646_v58, %v1794_v19  ;;  %v2358_v19 = vld [vmem:[#allocation2 + $0xc1] sm:$0xff] }
 0x178   : > { %v1782_v5 = vadd.f32 %v1770_v42, %v1746_v54  ;;  %v1685_v10 = vadd.f32 %v1673_v0, %v1649_v53  ;;  %v1709_v12 = vmul.f32 %v4610_v16, %v4851_v7  ;;  %v1735_v17 = vmul.f32 %v4624_v6, %v4923_v43  ;;  %v1795_v53 = vld [vmem:[#allocation2 + $0xd6] sm:$0xff] }
 0x179   : > { %v1624_v23 = vadd.f32 %v1612_v35, %v1588_v37  ;;  %v4939_v30 = vpop.eup %3750  ;;  %v2049_v48 = vmul.f32 1.442695, %v2031_v3  ;;  %v1876_v14 = vadd.f32 1.0, %v1864_v56  ;;  %v1771_v42 = vmul.f32 %v4640_v38, %v1759_v4  ;;  %v4954_v4 = vld [vmem:[#allocation2 + $0xd2] sm:$0xff]  ;;  %v1760_v35 = vld [vmem:[#allocation2 + $0xdd] sm:$0xff] }
 0x17a   : > { %6096 = vst [vmem:[#allocation64_spill] sm:$0xff] %v4939_v30  ;;  %v4941_v22 = vadd.f32 %v1806_v31, %v1782_v5  ;;  %v2032_v54 = vmul.f32 %v2020_v49, %v1852_v34  ;;  %v1721_v0 = vadd.f32 %v1709_v12, %v1685_v10  ;;  %v1674_v7 = vmul.f32 %v4604_v25, %v1662_v11 }
 0x17b   : > { %v1650_v18 = vadd.f32 %v1638_v28, %v1624_v23  ;;  %v1865_v36 = vmul.f32 0.3275911, %v1853_v52  ;;  %v1710_v3 = vmul.f32 %v4610_v16, %v4888_v62  ;;  %v1736_v56 = vmul.f32 %v4624_v6, %v4937_v46 }
 0x17c   : > { %6097 = vst [vmem:[#allocation65_spill] sm:$0xff] %v4941_v22  ;;  %2163 = vrot.lane.b32.xlu1 %v4941_v22, %s3862_s23  ;;  %v4948_v37 = vmul.f32 0.70710677, %v4941_v22  ;;  %v1747_v34 = vadd.f32 %v1735_v17, %v1721_v0  ;;  %v2346_v28 = vmul.f32 %v4548_v61, %v4540_v57  ;;  %v2370_v5 = vmul.f32 %v4555_v27, %v2358_v19  ;;  %v1796_v22 = vld [vmem:[#allocation2 + $0xde] sm:$0xff]  ;;  %v2359_v0 = vld [vmem:[#allocation2 + $0xc9] sm:$0xff] }
 0x17d   : > { %v1686_v49 = vadd.f32 %v1674_v7, %v1650_v18  ;;  %v4959_v31 = vpop.eup %3752  ;;  %3758 = vpow2.f32 %v2049_v48  ;;  %v2021_v11 = vsub.f32 0.0, %v1853_v52  ;;  %v1807_v10 = vmul.f32 %v4646_v58, %v1795_v53  ;;  %v4969_v57 = vld [vmem:[%s5941_s3 + $0x78] sm:$0xff] }
 0x17e   : > { %6098 = vst [vmem:[#allocation66_spill] sm:$0xff] %v4948_v37  ;;  %v2406_v62 = vmul.f32 %v4569_v2, %v4892_v40  ;;  %v1783_v12 = vadd.f32 %v1771_v42, %v1747_v34  ;;  %v2382_v17 = vadd.f32 %v2370_v5, %v2346_v28  ;;  %v2432_v18 = vmul.f32 %v4576_v47, %v4954_v4  ;;  %v4971_v48 = vpop.eup %3754  ;;  %v2456_v42 = vld [vmem:[#allocation2 + $0xd3] sm:$0xff] }
 0x17f   : > { %v1722_v23 = vadd.f32 %v1710_v3, %v1686_v49  ;;  %6099 = vst [vmem:[#allocation67_spill] sm:$0xff] %v4971_v48  ;;  %3760 = vrcp.f32 %v1876_v14  ;;  %v2051_v19 = vmul.f32 1.442695, %v2032_v54  ;;  %v1877_v53 = vadd.f32 1.0, %v1865_v36  ;;  %3563 = vmatprep.subr.mxu1 %v4969_v57  ;;  %v4978_v28 = vld [vmem:[#allocation2 + $0xda] sm:$0xff]  ;;  %v4981_v48 = vld [vmem:[#allocation2 + $0xe4] sm:$0xff] }
 0x180   : > { %v1772_v40 = vmul.f32 %v4640_v38, %v1760_v35  ;;  %v1854_v7 = vand.u32 2147483647, %v4948_v37  ;;  %v4976_v3 = vadd.f32 %v1807_v10, %v1783_v12  ;;  %v2418_v49 = vadd.f32 %v2406_v62, %v2382_v17  ;;  %v2361_v37 = vld [vmem:[#allocation2 + $0xd9] sm:$0xff] }
 0x181   : > { %v1748_v34 = vadd.f32 %v1736_v56, %v1722_v23  ;;  %v2033_v5 = vmul.f32 %v2021_v11, %v1853_v52  ;;  %v1808_v30 = vmul.f32 %v4646_v58, %v1796_v22  ;;  %v2347_v36 = vmul.f32 %v4548_v61, %v4580_v9 }
 0x182   : > { %6100 = vst [vmem:[#allocation68_spill] sm:$0xff] %v4976_v3  ;;  %v2371_v14 = vmul.f32 %v4555_v27, %v2359_v0  ;;  %2165 = vrot.lane.b32.xlu0 %v4976_v3, %s3862_s23  ;;  %v4989_v54 = vmul.f32 0.70710677, %v4976_v3  ;;  %v2444_v35 = vadd.f32 %v2432_v18, %v2418_v49  ;;  %v2468_v10 = vmul.f32 %v4604_v25, %v2456_v42  ;;  %v2554_v0 = vld [vmem:[#allocation2 + $0xe5] sm:$0xff] }
 0x183   : > { %v1784_v56 = vadd.f32 %v1772_v40, %v1748_v34  ;;  %v2504_v22 = vmul.f32 %v4610_v16, %v4923_v43  ;;  %v2407_v11 = vmul.f32 %v4569_v2, %v4916_v63  ;;  %v2433_v9 = vmul.f32 %v4576_v47, %v4978_v28  ;;  %v2457_v40 = vld [vmem:[#allocation2 + $0xdb] sm:$0xff]  ;;  %v2590_v43 = vld [vmem:[#allocation2 + $0xe6] sm:$0xff] }
 0x184   : > { %6101 = vst [vmem:[#allocation69_spill] sm:$0xff] %v4989_v54  ;;  %v2383_v52 = vadd.f32 %v2371_v14, %v2347_v36  ;;  %v4998_v62 = vpop.eup %3756  ;;  %v1866_v12 = vmul.f32 0.3275911, %v1854_v7  ;;  %v2480_v17 = vadd.f32 %v2468_v10, %v2444_v35  ;;  %v2530_v18 = vmul.f32 %v4624_v6, %v4981_v48  ;;  %v5007_v36 = vld [vmem:[#allocation2 + $0xec] sm:$0xff] }
 0x185   : > { %v5000_v23 = vadd.f32 %v1808_v30, %v1784_v56  ;;  %3762 = vpow2.f32 %v2051_v19  ;;  %v2022_v34 = vsub.f32 0.0, %v1854_v7  ;;  %v1855_v63 = vand.u32 2147483647, %v4989_v54  ;;  %v2360_v30 = vld [vmem:[#allocation2 + $0xd1] sm:$0xff] }
 0x186   : > { %v2419_v42 = vadd.f32 %v2407_v11, %v2383_v52  ;;  %3764 = vrcp.f32 %v1877_v53  ;;  %v2516_v49 = vadd.f32 %v2504_v22, %v2480_v17  ;;  %v2053_v14 = vmul.f32 1.442695, %v2033_v5  ;;  %v5014_v11 = vld [vmem:[#allocation2 + $0xe2] sm:$0xff] }
 0x187   : > { %6102 = vst [vmem:[#allocation70_spill] sm:$0xff] %v5000_v23  ;;  %2167 = vrot.lane.b32.xlu1 %v5000_v23, %s3862_s23  ;;  %v2566_v56 = vmul.f32 %v4640_v38, %v2554_v0  ;;  %v2469_v10 = vmul.f32 %v4604_v25, %v2457_v40  ;;  %v1878_v19 = vadd.f32 1.0, %v1866_v12  ;;  %v2602_v53 = vmul.f32 %v4646_v58, %v2590_v43  ;;  %v2555_v40 = vld [vmem:[#allocation2 + $0xed] sm:$0xff] }
 0x188   : > { %v2445_v35 = vadd.f32 %v2433_v9, %v2419_v42  ;;  %v2542_v3 = vadd.f32 %v2530_v18, %v2516_v49  ;;  %v2505_v52 = vmul.f32 %v4610_v16, %v4937_v46  ;;  %v2531_v22 = vmul.f32 %v4624_v6, %v5007_v36  ;;  %v2591_v49 = vld [vmem:[#allocation2 + $0xee] sm:$0xff] }
 0x189   : > { %v2348_v5 = vmul.f32 %v4548_v61, %v4619_v33  ;;  %v2372_v9 = vmul.f32 %v4555_v27, %v2360_v30  ;;  %v2034_v12 = vmul.f32 %v2022_v34, %v1854_v7  ;;  %v1867_v18 = vmul.f32 0.3275911, %v1855_v63  ;;  %v2458_v7 = vld [vmem:[#allocation2 + $0xe3] sm:$0xff] }
 0x18a   : > { %v2481_v54 = vadd.f32 %v2469_v10, %v2445_v35  ;;  %v5021_v17 = vpop.eup %3758  ;;  %v5024_v0 = vmul.f32 0.70710677, %v5000_v23  ;;  %v2408_v46 = vmul.f32 %v4569_v2, %v4954_v4  ;;  %v2578_v43 = vadd.f32 %v2566_v56, %v2542_v3 }
 0x18b   : > { %v2384_v35 = vadd.f32 %v2372_v9, %v2348_v5  ;;  %v2434_v61 = vmul.f32 %v4576_v47, %v5014_v11  ;;  %3766 = vpow2.f32 %v2053_v14  ;;  %v2023_v27 = vsub.f32 0.0, %v1855_v63  ;;  %v5047_v5 = vld [vmem:[%s5940_s2] ss:$0 sm:$0xff] }
 0x18c   : > { %6103 = vst [vmem:[#allocation71_spill] sm:$0xff] %v5024_v0  ;;  %v2517_v42 = vadd.f32 %v2505_v52, %v2481_v54  ;;  %v5030_v33 = vpop.eup %3760  ;;  %v5032_v34 = vadd.f32 %v2602_v53, %v2578_v43  ;;  %v2567_v10 = vmul.f32 %v4640_v38, %v2555_v40  ;;  %3768 = vrcp.f32 %v1878_v19  ;;  %v5036_v54 = vld [vmem:[#allocation2 + $0xf4] sm:$0xff]  ;;  %v2399_v52 = vld [vmem:[#allocation2 + $0xea] sm:$0xff] }
 0x18d   : > { %v2420_v23 = vadd.f32 %v2408_v46, %v2384_v35  ;;  %v2055_v2 = vmul.f32 1.442695, %v2034_v12  ;;  %v1879_v4 = vadd.f32 1.0, %v1867_v18  ;;  %v2603_v3 = vmul.f32 %v4646_v58, %v2591_v49  ;;  %v5054_v12 = vld [vmem:[%s5940_s2 + $0x1] ss:$0 sm:$0xff]  ;;  %v2363_v40 = vld [vmem:[#allocation2 + $0xe9] sm:$0xff] }
 0x18e   : > { %6104 = vst [vmem:[#allocation72_spill] sm:$0xff] %v5032_v34  ;;  %v2543_v30 = vadd.f32 %v2531_v22, %v2517_v42  ;;  %v1856_v47 = vand.u32 2147483647, %v5024_v0  ;;  %2950 = vrot.lane.b32.xlu0 %v5032_v34, %s3862_s23  ;;  %v2470_v53 = vmul.f32 %v4604_v25, %v2458_v7  ;;  %v2035_v22 = vmul.f32 %v2023_v27, %v1855_v63  ;;  %v5069_v42 = vld [vmem:[%s5940_s2 + $0x2] ss:$0 sm:$0xff]  ;;  %v2459_v35 = vld [vmem:[#allocation2 + $0xeb] sm:$0xff] }
 0x18f   : > { %v2446_v56 = vadd.f32 %v2434_v61, %v2420_v23  ;;  %v2506_v19 = vmul.f32 %v4610_v16, %v4981_v48  ;;  %v2349_v9 = vmul.f32 %v5047_v5, %v4654_v21  ;;  %v2373_v23 = vmul.f32 %v5054_v12, %v2361_v37  ;;  %v2556_v21 = vld [vmem:[#allocation2 + $0xf5] sm:$0xff]  ;;  %v5076_v49 = vld [vmem:[%s5940_s2 + $0x3] ss:$0 sm:$0xff] }
 0x190   : > { %v2579_v14 = vadd.f32 %v2567_v10, %v2543_v30  ;;  %v5058_v63 = vmul.f32 0.70710677, %v5032_v34  ;;  %v2532_v48 = vmul.f32 %v4624_v6, %v5036_v54  ;;  %3770 = vpow2.f32 %v2055_v2  ;;  %v5083_v10 = vld [vmem:[#allocation2 + $0xfa] sm:$0xff] }
 0x191   : > { %v2482_v16 = vadd.f32 %v2470_v53, %v2446_v56  ;;  %v2385_v43 = vadd.f32 %v2373_v23, %v2349_v9  ;;  %v2409_v37 = vmul.f32 %v5069_v42, %v4978_v28  ;;  %v2435_v6 = vmul.f32 %v5076_v49, %v2399_v52  ;;  %v2592_v2 = vld [vmem:[#allocation2 + $0xf6] sm:$0xff] }
 0x192   : > { %6105 = vst [vmem:[#allocation73_spill] sm:$0xff] %v5058_v63  ;;  %v5060_v18 = vadd.f32 %v2603_v3, %v2579_v14  ;;  %v5064_v46 = vpop.eup %3762  ;;  %3772 = vrcp.f32 %v1879_v4  ;;  %v1868_v27 = vmul.f32 0.3275911, %v1856_v47  ;;  %v2024_v7 = vsub.f32 0.0, %v1856_v47  ;;  %v2497_v0 = vld [vmem:[#allocation2 + $0xfc] sm:$0xff] }
 0x193   : > { %6107 = vst [vmem:[#allocation75_spill] sm:$0xff] %v5064_v46  ;;  %v5079_v61 = vpop.eup %3764  ;;  %v2518_v30 = vadd.f32 %v2506_v19, %v2482_v16  ;;  %v2057_v28 = vmul.f32 1.442695, %v2035_v22  ;;  %v2421_v3 = vadd.f32 %v2409_v37, %v2385_v43  ;;  %v2351_v14 = vmul.f32 %v5047_v5, %v4702_v55 }
 0x194   : > { %6106 = vst [vmem:[#allocation74_spill] sm:$0xff] %v5060_v18  ;;  %2952 = vrot.lane.b32.xlu1 %v5060_v18, %s3862_s23  ;;  %v2375_v56 = vmul.f32 %v5054_v12, %v2363_v40  ;;  %v2650_v53 = vand.u32 2147483647, %v5058_v63  ;;  %v2568_v4 = vmul.f32 %v4640_v38, %v2556_v21  ;;  %v2471_v23 = vmul.f32 %v4604_v25, %v2459_v35  ;;  %v2461_v25 = vld [vmem:[#allocation2 + $0xfb] sm:$0xff] }
 0x195   : > { %v2544_v9 = vadd.f32 %v2532_v48, %v2518_v30  ;;  %v2447_v34 = vadd.f32 %v2435_v6, %v2421_v3  ;;  %v2411_v16 = vmul.f32 %v5069_v42, %v2399_v52  ;;  %v2437_v22 = vmul.f32 %v5076_v49, %v5083_v10  ;;  %v5098_v48 = vld [vmem:[%s5940_s2 + $0x5] ss:$0 sm:$0xff]  ;;  %v2557_v6 = vld [vmem:[#allocation2 + $0xfd] sm:$0xff] }
 0x196   : > { %v2387_v19 = vadd.f32 %v2375_v56, %v2351_v14  ;;  %v1880_v43 = vadd.f32 1.0, %v1868_v27  ;;  %v2036_v37 = vmul.f32 %v2024_v7, %v1856_v47  ;;  %v2604_v55 = vmul.f32 %v4646_v58, %v2592_v2  ;;  %v5110_v47 = vld [vmem:[%s5940_s2 + $0x6] ss:$0 sm:$0xff]  ;;  %v2593_v2 = vld [vmem:[#allocation2 + $0xfe] sm:$0xff] }
 0x197   : > { %v2507_v38 = vmul.f32 %v5098_v48, %v5007_v36  ;;  %v5103_v40 = vmul.f32 0.70710677, %v5060_v18  ;;  %v2580_v52 = vadd.f32 %v2568_v4, %v2544_v9  ;;  %v2483_v21 = vadd.f32 %v2471_v23, %v2447_v34  ;;  %v5118_v34 = vld [vmem:[%s5940_s2 + $0x4] ss:$0 sm:$0xff]  ;;  %v5126_v23 = vld [vmem:[%s5940_s2 + $0x7] ss:$0 sm:$0xff] }
 0x198   : > { %v2423_v35 = vadd.f32 %v2411_v16, %v2387_v19  ;;  %v5105_v27 = vpop.eup %3766  ;;  %3774 = vpow2.f32 %v2057_v28  ;;  %v2662_v58 = vmul.f32 0.3275911, %v2650_v53  ;;  %v2533_v7 = vmul.f32 %v5110_v47, %v2497_v0  ;;  %v2362_v14 = vld [vmem:[#allocation2 + $0xe1] sm:$0xff]  ;;  %v5129_v16 = vld [vmem:[#allocation2 + $0x10c] sm:$0xff] }
 0x199   : > { %6108 = vst [vmem:[#allocation76_spill] sm:$0xff] %v5103_v40  ;;  %6109 = vst [vmem:[#allocation77_spill] sm:$0xff] %v5105_v27  ;;  %v5113_v36 = vadd.f32 %v2604_v55, %v2580_v52  ;;  %v2519_v30 = vadd.f32 %v2507_v38, %v2483_v21  ;;  %v2473_v28 = vmul.f32 %v5118_v34, %v2461_v25  ;;  %v5121_v56 = vpop.eup %3768  ;;  %3776 = vrcp.f32 %v1880_v43  ;;  %v5138_v52 = vld [vmem:[%s5940_s2 + $0x8] ss:$0 sm:$0xff]  ;;  %v2595_v18 = vld [vmem:[#allocation2 + $0x10e] sm:$0xff] }
 0x19a   : > { %v2449_v3 = vadd.f32 %v2437_v22, %v2423_v35  ;;  %v2059_v9 = vmul.f32 1.442695, %v2036_v37  ;;  %v2818_v4 = vsub.f32 0.0, %v2650_v53  ;;  %v2569_v19 = vmul.f32 %v5126_v23, %v2557_v6  ;;  %v2400_v37 = vld [vmem:[#allocation2 + $0xf2] sm:$0xff] }
 0x19b   : > { %6110 = vst [vmem:[#allocation78_spill] sm:$0xff] %v5113_v36  ;;  %v2651_v22 = vand.u32 2147483647, %v5103_v40  ;;  %2954 = vrot.lane.b32.xlu0 %v5113_v36, %s3862_s23  ;;  %v2545_v55 = vadd.f32 %v2533_v7, %v2519_v30  ;;  %v2509_v43 = vmul.f32 %v5098_v48, %v2497_v0  ;;  %v2674_v25 = vadd.f32 1.0, %v2662_v58  ;;  %v2559_v6 = vld [vmem:[#allocation2 + $0x10d] sm:$0xff] }
 0x19c   : > { %v2485_v38 = vadd.f32 %v2473_v28, %v2449_v3  ;;  %v2605_v21 = vmul.f32 %v5138_v52, %v2593_v2  ;;  %v2350_v35 = vmul.f32 %v5047_v5, %v4679_v59  ;;  %v2374_v40 = vmul.f32 %v5054_v12, %v2362_v14 }
 0x19d   : > { %v5145_v7 = vmul.f32 0.70710677, %v5113_v36  ;;  %v2581_v30 = vadd.f32 %v2569_v19, %v2545_v55  ;;  %v2535_v58 = vmul.f32 %v5110_v47, %v5129_v16  ;;  %v5149_v3 = vpop.eup %3770  ;;  %v2830_v28 = vmul.f32 %v2818_v4, %v2650_v53 }
 0x19e   : > { %v2521_v0 = vadd.f32 %v2509_v43, %v2485_v38  ;;  %6112 = vst [vmem:[#allocation80_spill] sm:$0xff] %v5149_v3  ;;  %v2386_v63 = vadd.f32 %v2374_v40, %v2350_v35  ;;  %v2410_v2 = vmul.f32 %v5069_v42, %v5014_v11  ;;  %v2436_v59 = vmul.f32 %v5076_v49, %v2400_v37  ;;  %v2460_v38 = vld [vmem:[#allocation2 + $0xf3] sm:$0xff] }
 0x19f   : > { %6111 = vst [vmem:[#allocation79_spill] sm:$0xff] %v5145_v7  ;;  %v5154_v27 = vpop.eup %3772  ;;  %v2819_v14 = vsub.f32 0.0, %v2651_v22  ;;  %v5156_v36 = vadd.f32 %v2605_v21, %v2581_v30  ;;  %v2571_v55 = vmul.f32 %v5126_v23, %v2559_v6  ;;  %3778 = vpow2.f32 %v2059_v9  ;;  %v2364_v35 = vld [vmem:[#allocation2 + $0xf1] sm:$0xff]  ;;  %v2498_v30 = vld [vmem:[#allocation2 + $0x104] sm:$0xff] }
 0x1a0   : > { %v2547_v19 = vadd.f32 %v2535_v58, %v2521_v0  ;;  %v2663_v43 = vmul.f32 0.3275911, %v2651_v22  ;;  %v2422_v3 = vadd.f32 %v2410_v2, %v2386_v63  ;;  %v1100_v53 = vmul.f32 1.0614054, %v4307_v50 }
 0x1a1   : > { %6113 = vst [vmem:[#allocation81_spill] sm:$0xff] %v5156_v36  ;;  %v2652_v40 = vand.u32 2147483647, %v5145_v7  ;;  %2956 = vrot.lane.b32.xlu1 %v5156_v36, %s3862_s23  ;;  %v5164_v11 = vmul.f32 0.70710677, %v5156_v36  ;;  %v2607_v21 = vmul.f32 %v5138_v52, %v2595_v18  ;;  %3780 = vrcp.f32 %v2674_v25  ;;  %v2558_v36 = vld [vmem:[#allocation2 + $0x105] sm:$0xff] }
 0x1a2   : > { %v2583_v4 = vadd.f32 %v2571_v55, %v2547_v19  ;;  %v2448_v6 = vadd.f32 %v2436_v59, %v2422_v3  ;;  %v2472_v9 = vmul.f32 %v5118_v34, %v2460_v38  ;;  %v1112_v63 = vadd.f32 -1.4531521, %v1100_v53 }
 0x1a3   : > { %6114 = vst [vmem:[#allocation82_spill] sm:$0xff] %v5164_v11  ;;  %v2842_v0 = vmul.f32 1.442695, %v2830_v28  ;;  %v2831_v58 = vmul.f32 %v2819_v14, %v2651_v22  ;;  %v2508_v7 = vmul.f32 %v5098_v48, %v5036_v54  ;;  %v2352_v18 = vmul.f32 %v5047_v5, %v4724_v15  ;;  %v2594_v14 = vld [vmem:[#allocation2 + $0x106] sm:$0xff] }
 0x1a4   : > { %v5168_v2 = vadd.f32 %v2607_v21, %v2583_v4  ;;  %v2484_v46 = vadd.f32 %v2472_v9, %v2448_v6  ;;  %v1124_v19 = vmul.f32 %v4307_v50, %v1112_v63  ;;  %v2376_v25 = vmul.f32 %v5054_v12, %v2364_v35  ;;  %v5186_v6 = vld [vmem:[#allocation2 + $0x102] sm:$0xff] }
 0x1a5   : > { %v5176_v3 = vpop.eup %3774  ;;  %v2675_v59 = vadd.f32 1.0, %v2663_v43  ;;  %v2820_v55 = vsub.f32 0.0, %v2652_v40  ;;  %v2653_v22 = vand.u32 2147483647, %v5164_v11  ;;  %v2534_v54 = vmul.f32 %v5110_v47, %v2498_v30  ;;  %v2462_v9 = vld [vmem:[#allocation2 + $0x103] sm:$0xff] }
 0x1a6   : > { %6115 = vst [vmem:[#allocation83_spill] sm:$0xff] %v5168_v2  ;;  %6116 = vst [vmem:[#allocation84_spill] sm:$0xff] %v5176_v3  ;;  %2960 = vrot.lane.b32.xlu1 %v5168_v2, %s3862_s23  ;;  %v2520_v28 = vadd.f32 %v2508_v7, %v2484_v46  ;;  %v1136_v38 = vadd.f32 1.4214138, %v1124_v19  ;;  %v2388_v53 = vadd.f32 %v2376_v25, %v2352_v18  ;;  %v5183_v15 = vpop.eup %3776  ;;  %3782 = vpow2.f32 %v2842_v0  ;;  %v2365_v25 = vld [vmem:[#allocation2 + $0xf9] sm:$0xff] }
 0x1a7   : > { %v2412_v4 = vmul.f32 %v5069_v42, %v2400_v37  ;;  %6117 = vst [vmem:[#allocation85_spill] sm:$0xff] %v5183_v15  ;;  %v2844_v21 = vmul.f32 1.442695, %v2831_v58  ;;  %v2664_v35 = vmul.f32 0.3275911, %v2652_v40  ;;  %v2570_v43 = vmul.f32 %v5126_v23, %v2558_v36 }
 0x1a8   : > { %v2546_v63 = vadd.f32 %v2534_v54, %v2520_v28  ;;  %v1148_v11 = vmul.f32 %v4307_v50, %v1136_v38  ;;  %v2438_v46 = vmul.f32 %v5076_v49, %v5186_v6  ;;  %3784 = vrcp.f32 %v2675_v59 }
 0x1a9   : > { %v2424_v3 = vadd.f32 %v2412_v4, %v2388_v53  ;;  %v2832_v7 = vmul.f32 %v2820_v55, %v2652_v40  ;;  %v2665_v37 = vmul.f32 0.3275911, %v2653_v22  ;;  %v2606_v19 = vmul.f32 %v5138_v52, %v2594_v14  ;;  %v5205_v53 = vld [vmem:[#allocation2 + $0x114] sm:$0xff] }
 0x1aa   : > { %v2582_v0 = vadd.f32 %v2570_v43, %v2546_v63  ;;  %v1160_v58 = vadd.f32 -0.28449672, %v1148_v11  ;;  %v2474_v36 = vmul.f32 %v5118_v34, %v2462_v9  ;;  %3786 = vpow2.f32 %v2844_v21  ;;  %v2560_v4 = vld [vmem:[#allocation2 + $0x115] sm:$0xff] }
 0x1ab   : > { %v2450_v18 = vadd.f32 %v2438_v46, %v2424_v3  ;;  %v2676_v15 = vadd.f32 1.0, %v2664_v35  ;;  %v2821_v54 = vsub.f32 0.0, %v2653_v22  ;;  %v5194_v28 = vmul.f32 0.5, %v4180_v41 }
 0x1ac   : > { %v5196_v38 = vadd.f32 %v2606_v19, %v2582_v0  ;;  %v1172_v59 = vmul.f32 %v4307_v50, %v1160_v58  ;;  %v2510_v55 = vmul.f32 %v5098_v48, %v2498_v30  ;;  %v5200_v14 = vpop.eup %3778  ;;  %v2846_v11 = vmul.f32 1.442695, %v2832_v7  ;;  %v2596_v7 = vld [vmem:[#allocation2 + $0x116] sm:$0xff] }
 0x1ad   : > { %v2486_v40 = vadd.f32 %v2474_v36, %v2450_v18  ;;  %6119 = vst [vmem:[#allocation87_spill] sm:$0xff] %v5200_v14  ;;  %v5203_v3 = vmul.f32 0.70710677, %v5168_v2  ;;  %v2353_v41 = vmul.f32 %v5047_v5, %v4749_v20  ;;  %v2377_v21 = vmul.f32 %v5054_v12, %v2365_v25  ;;  %v5221_v18 = vld [vmem:[#allocation2 + $0x10a] sm:$0xff] }
 0x1ae   : > { %6118 = vst [vmem:[#allocation86_spill] sm:$0xff] %v5196_v38  ;;  %v2677_v35 = vadd.f32 1.0, %v2665_v37  ;;  %2958 = vrot.lane.b32.xlu0 %v5196_v38, %s3862_s23  ;;  %v1184_v43 = vadd.f32 0.2548296, %v1172_v59  ;;  %v2536_v9 = vmul.f32 %v5110_v47, %v5205_v53  ;;  %v5214_v63 = vpop.eup %3780  ;;  %v2833_v46 = vmul.f32 %v2821_v54, %v2653_v22  ;;  %v2463_v36 = vld [vmem:[#allocation2 + $0x10b] sm:$0xff] }
 0x1af   : > { %6120 = vst [vmem:[#allocation88_spill] sm:$0xff] %v5203_v3  ;;  %v2522_v30 = vadd.f32 %v2510_v55, %v2486_v40  ;;  %v2389_v19 = vadd.f32 %v2377_v21, %v2353_v41  ;;  %v2413_v20 = vmul.f32 %v5069_v42, %v5083_v10  ;;  %3788 = vrcp.f32 %v2676_v15  ;;  %v2366_v40 = vld [vmem:[#allocation2 + $0x101] sm:$0xff] }
 0x1b0   : > { %v1196_v37 = vmul.f32 %v4307_v50, %v1184_v43  ;;  %v2572_v58 = vmul.f32 %v5126_v23, %v2560_v4  ;;  %3790 = vpow2.f32 %v2846_v11  ;;  %v2655_v25 = vand.u32 2147483647, %v5203_v3  ;;  %v2342_v50 = vld [vmem:[#allocation2 + $0x100] sm:$0xff] }
 0x1b1   : > { %v2548_v0 = vadd.f32 %v2536_v9, %v2522_v30  ;;  %v2425_v22 = vadd.f32 %v2413_v20, %v2389_v19  ;;  %v2439_v54 = vmul.f32 %v5076_v49, %v5221_v18  ;;  %3792 = vrcp.f32 %v2677_v35 }
 0x1b2   : > { %v1256_v59 = vmul.f32 %v4322_v51, %v1196_v37  ;;  %v2608_v15 = vmul.f32 %v5138_v52, %v2596_v7  ;;  %v2848_v55 = vmul.f32 1.442695, %v2833_v46  ;;  %v2475_v41 = vmul.f32 %v5118_v34, %v2463_v36  ;;  %v5239_v7 = vld [vmem:[#allocation2 + $0x11c] sm:$0xff] }
 0x1b3   : > { %v2584_v10 = vadd.f32 %v2572_v58, %v2548_v0  ;;  %v2451_v4 = vadd.f32 %v2439_v54, %v2425_v22  ;;  %v1101_v11 = vmul.f32 1.0614054, %v4340_v32  ;;  %v5230_v21 = vpop.eup %3782  ;;  %v5233_v43 = vmul.f32 0.70710677, %v5196_v38  ;;  %v2561_v46 = vld [vmem:[#allocation2 + $0x11d] sm:$0xff]  ;;  %v5243_v0 = vld [vmem:[#allocation2 + $0x112] sm:$0xff] }
 0x1b4   : > { %6121 = vst [vmem:[#allocation89_spill] sm:$0xff] %v5230_v21  ;;  %v1268_v30 = vsub.f32 1.0, %v1256_v59  ;;  %v2511_v51 = vmul.f32 %v5098_v48, %v5129_v16  ;;  %v2354_v20 = vmul.f32 %v5047_v5, %v2342_v50  ;;  %v2378_v37 = vmul.f32 %v5054_v12, %v2366_v40  ;;  %v1341_v21 = vpop.permute.xlu0 %1340 }
 0x1b5   : > { %6122 = vst [vmem:[#allocation90_spill] sm:$0xff] %v5233_v43  ;;  %v5235_v35 = vadd.f32 %v2608_v15, %v2584_v10  ;;  %v2487_v9 = vadd.f32 %v2475_v41, %v2451_v4  ;;  %v1113_v19 = vadd.f32 -1.4531521, %v1101_v11  ;;  %v5245_v58 = vpop.eup %3784  ;;  %v2667_v36 = vmul.f32 0.3275911, %v2655_v25  ;;  %v2597_v10 = vld [vmem:[#allocation2 + $0x11e] sm:$0xff] }
 0x1b6   : > { %v2823_v22 = vsub.f32 0.0, %v2655_v25  ;;  %v1292_v54 = vsub.f32 0.0, %v1268_v30  ;;  %v2537_v16 = vmul.f32 %v5110_v47, %v5239_v7  ;;  %v2390_v50 = vadd.f32 %v2378_v37, %v2354_v20  ;;  %v2464_v4 = vld [vmem:[#allocation2 + $0x113] sm:$0xff]  ;;  %v5262_v37 = vld [vmem:[#allocation2 + $0x124] sm:$0xff] }
 0x1b7   : > { %6123 = vst [vmem:[#allocation91_spill] sm:$0xff] %v5235_v35  ;;  %2962 = vrot.lane.b32.xlu0 %v5235_v35, %s3862_s23  ;;  %v2523_v59 = vadd.f32 %v2511_v51, %v2487_v9  ;;  %v1125_v15 = vmul.f32 %v4340_v32, %v1113_v19  ;;  %v2414_v40 = vmul.f32 %v5069_v42, %v5186_v6  ;;  %v5254_v41 = vpop.eup %3786  ;;  %v2654_v11 = vand.u32 2147483647, %v5233_v43 }
 0x1b8   : > { %6124 = vst [vmem:[#allocation92_spill] sm:$0xff] %v5254_v41  ;;  %v1304_v38 = vsel %vm1280_vm2, %v1292_v54, %v1268_v30  ;;  %v2573_v2 = vmul.f32 %v5126_v23, %v2561_v46  ;;  %v2440_v51 = vmul.f32 %v5076_v49, %v5243_v0  ;;  %v2835_v6 = vmul.f32 %v2823_v22, %v2655_v25  ;;  %v2367_v22 = vld [vmem:[#allocation2 + $0x109] sm:$0xff] }
 0x1b9   : > { %v1316_v9 = vadd.f32 1.0, %v1304_v38  ;;  %v2549_v3 = vadd.f32 %v2537_v16, %v2523_v59  ;;  %v1137_v19 = vadd.f32 1.4214138, %v1125_v15  ;;  %v2426_v20 = vadd.f32 %v2414_v40, %v2390_v50  ;;  %v2562_v16 = vld [vmem:[#allocation2 + $0x125] sm:$0xff] }
 0x1ba   : > { %v2609_v41 = vmul.f32 %v5138_v52, %v2597_v10  ;;  %v2476_v43 = vmul.f32 %v5118_v34, %v2464_v4  ;;  %v2512_v60 = vmul.f32 %v5098_v48, %v5205_v53  ;;  %v2343_v59 = vld [vmem:[#allocation2 + $0x108] sm:$0xff]  ;;  %v2679_v15 = vadd.f32 1.0, %v2667_v36 }
 0x1bb   : > { %v1328_v30 = vmul.f32 %v1316_v9, %v5194_v28  ;;  %v2585_v46 = vadd.f32 %v2573_v2, %v2549_v3  ;;  %v1149_v54 = vmul.f32 %v4340_v32, %v1137_v19  ;;  %v2452_v38 = vadd.f32 %v2440_v51, %v2426_v20  ;;  %v2598_v36 = vld [vmem:[#allocation2 + $0x126] sm:$0xff] }
 0x1bc   : > { %v2666_v50 = vmul.f32 0.3275911, %v2654_v11  ;;  %v2822_v40 = vsub.f32 0.0, %v2654_v11  ;;  %v2538_v25 = vmul.f32 %v5110_v47, %v5262_v37  ;;  %v5272_v10 = vpop.eup %3788  ;;  %3794 = vpow2.f32 %v2848_v55 }
 0x1bd   : > { %v1364_v4 = vmul.f32 %v1341_v21, %v1328_v30  ;;  %v5274_v14 = vadd.f32 %v2609_v41, %v2585_v46  ;;  %v1161_v53 = vadd.f32 -0.28449672, %v1149_v54  ;;  %v2488_v28 = vadd.f32 %v2476_v43, %v2452_v38  ;;  %v5276_v2 = vpop.eup %3790  ;;  %v5289_v41 = vld [vmem:[#allocation2 + $0x11a] sm:$0xff] }
 0x1be   : > { %6126 = vst [vmem:[#allocation94_spill] sm:$0xff] %v5276_v2  ;;  %v2852_v3 = vmul.f32 1.442695, %v2835_v6  ;;  %v2574_v51 = vmul.f32 %v5126_v23, %v2562_v16  ;;  %v2355_v9 = vmul.f32 %v5047_v5, %v2343_v59  ;;  %v5280_v19 = vpop.eup %3792  ;;  %v5283_v20 = vmul.f32 0.70710677, %v5235_v35  ;;  %v2465_v35 = vld [vmem:[#allocation2 + $0x11b] sm:$0xff] }
 0x1bf   : > { %6125 = vst [vmem:[#allocation93_spill] sm:$0xff] %v5274_v14  ;;  %6127 = vst [vmem:[#allocation95_spill] sm:$0xff] %v5280_v19  ;;  %2964 = vrot.lane.b32.xlu1 %v5274_v14, %s3862_s23  ;;  %3545 = vmatprep.mubr.f32.mxu1 %v1364_v4  ;;  %v1173_v21 = vmul.f32 %v4340_v32, %v1161_v53  ;;  %v2524_v43 = vadd.f32 %v2512_v60, %v2488_v28  ;;  %3796 = vrcp.f32 %v2679_v15  ;;  %v5301_v53 = vld [vmem:[#allocation2 + $0x12c] sm:$0xff] }
 0x1c0   : > { %6128 = vst [vmem:[#allocation96_spill] sm:$0xff] %v5283_v20  ;;  %v2379_v55 = vmul.f32 %v5054_v12, %v2367_v22  ;;  %v2678_v6 = vadd.f32 1.0, %v2666_v50  ;;  %v2834_v30 = vmul.f32 %v2822_v40, %v2654_v11  ;;  %v2415_v46 = vmul.f32 %v5069_v42, %v5221_v18  ;;  %v2344_v18 = vld [vmem:[#allocation2 + $0x110] sm:$0xff] }
 0x1c1   : > { %v1185_v54 = vadd.f32 0.2548296, %v1173_v21  ;;  %v2550_v38 = vadd.f32 %v2538_v25, %v2524_v43  ;;  %v2610_v16 = vmul.f32 %v5138_v52, %v2598_v36  ;;  %3798 = vpow2.f32 %v2852_v3  ;;  %v2368_v50 = vld [vmem:[#allocation2 + $0x111] sm:$0xff] }
 0x1c2   : > { %v2391_v59 = vadd.f32 %v2379_v55, %v2355_v9  ;;  %v1017_v4 = vmul.f32 0.5, %v4201_v13  ;;  %v2441_v60 = vmul.f32 %v5076_v49, %v5289_v41  ;;  %v2656_v22 = vand.u32 2147483647, %v5283_v20 }
 0x1c3   : > { %v1197_v15 = vmul.f32 %v4340_v32, %v1185_v54  ;;  %v2586_v11 = vadd.f32 %v2574_v51, %v2550_v38  ;;  %3800 = vrcp.f32 %v2678_v6  ;;  %v2477_v25 = vmul.f32 %v5118_v34, %v2465_v35  ;;  %v2563_v51 = vld [vmem:[#allocation2 + $0x12d] sm:$0xff]  ;;  %v2430_v35 = vld [vmem:[#allocation2 + $0x122] sm:$0xff] }
 0x1c4   : > { %v2427_v40 = vadd.f32 %v2415_v46, %v2391_v59  ;;  %v1102_v13 = vmul.f32 1.0614054, %v4372_v39  ;;  %v2850_v28 = vmul.f32 1.442695, %v2834_v30  ;;  %v2513_v32 = vmul.f32 %v5098_v48, %v5239_v7  ;;  %v2466_v30 = vld [vmem:[#allocation2 + $0x123] sm:$0xff]  ;;  %v2599_v7 = vld [vmem:[#allocation2 + $0x12e] sm:$0xff] }
 0x1c5   : > { %v1257_v3 = vmul.f32 %v4364_v1, %v1197_v15  ;;  %v5305_v36 = vadd.f32 %v2610_v16, %v2586_v11  ;;  %v2356_v43 = vmul.f32 %v5047_v5, %v2344_v18  ;;  %v2380_v55 = vmul.f32 %v5054_v12, %v2368_v50 }
 0x1c6   : > { %v2453_v9 = vadd.f32 %v2441_v60, %v2427_v40  ;;  %v1114_v21 = vadd.f32 -1.4531521, %v1102_v13  ;;  %v2668_v6 = vmul.f32 0.3275911, %v2656_v22  ;;  %v2824_v46 = vsub.f32 0.0, %v2656_v22 }
 0x1c7   : > { %6129 = vst [vmem:[#allocation97_spill] sm:$0xff] %v5305_v36  ;;  %v1269_v54 = vsub.f32 1.0, %v1257_v3  ;;  %2966 = vrot.lane.b32.xlu0 %v5305_v36, %s3862_s23  ;;  %v2539_v1 = vmul.f32 %v5110_v47, %v5301_v53  ;;  %v2392_v59 = vadd.f32 %v2380_v55, %v2356_v43  ;;  %v2416_v60 = vmul.f32 %v5069_v42, %v5243_v0 }
 0x1c8   : > { %v2489_v38 = vadd.f32 %v2477_v25, %v2453_v9  ;;  %v1126_v16 = vmul.f32 %v4372_v39, %v1114_v21  ;;  %v5319_v15 = vmul.f32 0.70710677, %v5274_v14  ;;  %v2575_v18 = vmul.f32 %v5126_v23, %v2563_v51  ;;  %v2528_v9 = vld [vmem:[#allocation2 + $0x134] sm:$0xff] }
 0x1c9   : > { %v1293_v11 = vsub.f32 0.0, %v1269_v54  ;;  %v2442_v50 = vmul.f32 %v5076_v49, %v2430_v35  ;;  %v2428_v3 = vadd.f32 %v2416_v60, %v2392_v59  ;;  %v2478_v25 = vmul.f32 %v5118_v34, %v2466_v30  ;;  %v5324_v20 = vpop.eup %3794 }
 0x1ca   : > { %6130 = vst [vmem:[#allocation98_spill] sm:$0xff] %v5319_v15  ;;  %v2525_v40 = vadd.f32 %v2513_v32, %v2489_v38  ;;  %v1138_v13 = vadd.f32 1.4214138, %v1126_v16  ;;  %6131 = vst [vmem:[#allocation99_spill] sm:$0xff] %v5324_v20  ;;  %v2836_v21 = vmul.f32 %v2824_v46, %v2656_v22  ;;  %v2611_v43 = vmul.f32 %v5138_v52, %v2599_v7  ;;  %v2564_v38 = vld [vmem:[#allocation2 + $0x135] sm:$0xff]  ;;  %v1343_v46 = vpop.permute.xlu0 %1342 }
 0x1cb   : > { %v1305_v0 = vsel %vm1281_vm3, %v1293_v11, %v1269_v54  ;;  %v2514_v55 = vmul.f32 %v5098_v48, %v5262_v37  ;;  %v2454_v35 = vadd.f32 %v2442_v50, %v2428_v3  ;;  %v2345_v16 = vld [vmem:[#allocation2 + $0x118] sm:$0xff]  ;;  %3802 = vpow2.f32 %v2850_v28 }
 0x1cc   : > { %v1317_v51 = vadd.f32 1.0, %v1305_v0  ;;  %v2551_v14 = vadd.f32 %v2539_v1, %v2525_v40  ;;  %v1150_v32 = vmul.f32 %v4372_v39, %v1138_v13  ;;  %v5332_v30 = vpop.eup %3796  ;;  %v2657_v22 = vand.u32 2147483647, %v5319_v15  ;;  %v2369_v37 = vld [vmem:[#allocation2 + $0x119] sm:$0xff] }
 0x1cd   : > { %6132 = vst [vmem:[#allocation100_spill] sm:$0xff] %v5332_v30  ;;  %v2540_v29 = vmul.f32 %v5110_v47, %v2528_v9  ;;  %v2490_v60 = vadd.f32 %v2478_v25, %v2454_v35  ;;  %v2680_v1 = vadd.f32 1.0, %v2668_v6  ;;  %v2854_v40 = vmul.f32 1.442695, %v2836_v21  ;;  %v2600_v13 = vld [vmem:[#allocation2 + $0x136] sm:$0xff] }
 0x1ce   : > { %v1329_v54 = vmul.f32 %v1317_v51, %v1017_v4  ;;  %v2587_v7 = vadd.f32 %v2575_v18, %v2551_v14  ;;  %v1162_v59 = vadd.f32 -0.28449672, %v1150_v32  ;;  %v5336_v11 = vpop.eup %3798  ;;  %v2576_v50 = vmul.f32 %v5126_v23, %v2564_v38  ;;  %v2431_v4 = vld [vmem:[#allocation2 + $0x12a] sm:$0xff] }
 0x1cf   : > { %6133 = vst [vmem:[#allocation101_spill] sm:$0xff] %v5336_v11  ;;  %v2357_v3 = vmul.f32 %v5047_v5, %v2345_v16  ;;  %v2526_v9 = vadd.f32 %v2514_v55, %v2490_v60  ;;  %v2669_v18 = vmul.f32 0.3275911, %v2657_v22  ;;  %v2825_v25 = vsub.f32 0.0, %v2657_v22  ;;  %v5351_v5 = vld [vmem:[%s5941_s3 + $0x70] sm:$0xff] }
 0x1d0   : > { %v1365_v28 = vmul.f32 %v1343_v46, %v1329_v54  ;;  %v5340_v0 = vadd.f32 %v2611_v43, %v2587_v7  ;;  %v1174_v15 = vmul.f32 %v4372_v39, %v1162_v59  ;;  %v5343_v14 = vpop.eup %3800  ;;  %v2381_v51 = vmul.f32 %v5054_v12, %v2369_v37  ;;  %v2467_v12 = vld [vmem:[#allocation2 + $0x12b] sm:$0xff] }
 0x1d1   : > { %6135 = vst [vmem:[#allocation103_spill] sm:$0xff] %v5343_v14  ;;  %v2417_v6 = vmul.f32 %v5069_v42, %v5289_v41  ;;  %v5354_v21 = vmul.f32 0.70710677, %v5305_v36  ;;  %v2552_v55 = vadd.f32 %v2540_v29, %v2526_v9  ;;  %v2612_v32 = vmul.f32 %v5138_v52, %v2600_v13  ;;  %v5364_v41 = vld [vmem:[%s5941_s3 + $0x68] sm:$0xff]  ;;  %v6140_v13 = vld [vmem:[#allocation17_spill] sm:$0xff]  ;;  %v6141_v9 = vld [vmem:[#allocation3_spill] sm:$0xff] }
 0x1d2   : > { %6134 = vst [vmem:[#allocation102_spill] sm:$0xff] %v5340_v0  ;;  %2968 = vrot.lane.b32.xlu1 %v5340_v0, %s3862_s23  ;;  %3546 = vmatmul.mubr.f32.vlgmr.msra.gmra.mxu1 %v1365_v28  ;;  %v1186_v43 = vadd.f32 0.2548296, %v1174_v15  ;;  %3804 = vrcp.f32 %v2680_v1  ;;  %v2393_v35 = vadd.f32 %v2381_v51, %v2357_v3  ;;  %v2443_v42 = vmul.f32 %v5076_v49, %v2431_v4  ;;  %v6137_v54 = vld [vmem:[#allocation14_spill] sm:$0xff]  ;;  %v2529_v1 = vld [vmem:[#allocation2 + $0x13c] sm:$0xff]  ;;  %v6159_v11 = vld [vmem:[#allocation19_spill] sm:$0xff] }
 0x1d3   : > { %6136 = vst [vmem:[#allocation104_spill] sm:$0xff] %v5354_v21  ;;  %3564 = vmatpush3.msra.mxu1 %v4969_v57  ;;  %3806 = vpow2.f32 %v2854_v40  ;;  %v2588_v16 = vadd.f32 %v2576_v50, %v2552_v55  ;;  %v2681_v15 = vadd.f32 1.0, %v2669_v18  ;;  %v2479_v29 = vmul.f32 %v5118_v34, %v2467_v12  ;;  %v5374_v57 = vld [vmem:[%s5941_s3 + $0x60] sm:$0xff] }
 0x1d4   : > { %v1198_v38 = vmul.f32 %v4372_v39, %v1186_v43  ;;  %3565 = vmatprep.subr.mxu1 %v5351_v5  ;;  %v2429_v46 = vadd.f32 %v2417_v6, %v2393_v35  ;;  %v1103_v7 = vmul.f32 1.0614054, %v6137_v54  ;;  %v2837_v49 = vmul.f32 %v2825_v25, %v2657_v22  ;;  %v6138_v39 = vld [vmem:[#allocation12_spill] sm:$0xff] }
 0x1d5   : > { %3566 = vmatpush3.msra.mxu1 %v5351_v5  ;;  %v2658_v59 = vand.u32 2147483647, %v5354_v21  ;;  %v5378_v37 = vadd.f32 %v2612_v32, %v2588_v16  ;;  %v2515_v40 = vmul.f32 %v5098_v48, %v5301_v53  ;;  %v1104_v3 = vmul.f32 1.0614054, %v6140_v13  ;;  %v5388_v22 = vld [vmem:[%s5941_s3 + $0x58] sm:$0xff]  ;;  %v5401_v32 = vld [vmem:[%s5941_s3 + $0x50] sm:$0xff] }
 0x1d6   : > { %v1258_v60 = vmul.f32 %v6138_v39, %v1198_v38  ;;  %3567 = vmatprep.subr.mxu1 %v5364_v41  ;;  %v2455_v34 = vadd.f32 %v2443_v42, %v2429_v46  ;;  %v1115_v50 = vadd.f32 -1.4531521, %v1103_v7  ;;  %v1018_v4 = vmul.f32 0.5, %v6141_v9  ;;  %v6142_v25 = vld [vmem:[#allocation4_spill] sm:$0xff]  ;;  %v5415_v7 = vld [vmem:[%s5941_s3 + $0x48] sm:$0xff]  ;;  %v6156_v21 = vld [vmem:[#allocation15_spill] sm:$0xff] }
 0x1d7   : > { %6139 = vst [vmem:[#allocation14_spill] sm:$0xff] %v5378_v37  ;;  %3568 = vmatpush3.msra.mxu1 %v5364_v41  ;;  %v2826_v28 = vsub.f32 0.0, %v2658_v59  ;;  %vm1282_vm4 = vcmp.lt.f32.partialorder %v6142_v25, 0.0  ;;  %2970 = vrot.lane.b32.xlu0 %v5378_v37, %s3862_s23  ;;  %v2565_v48 = vld [vmem:[#allocation2 + $0x13d] sm:$0xff]  ;;  %v2541_v51 = vmul.f32 %v5110_v47, %v2529_v1  ;;  %v1116_v55 = vadd.f32 -1.4531521, %v1104_v3  ;;  %v1345_v3 = vpop.permute.xlu1 %1344 }
 0x1d8   : > { %v1270_v18 = vsub.f32 1.0, %v1258_v60  ;;  %3569 = vmatprep.subr.mxu1 %v5374_v57  ;;  %v2491_v53 = vadd.f32 %v2479_v29, %v2455_v34  ;;  %v2601_v6 = vld [vmem:[#allocation2 + $0x13e] sm:$0xff]  ;;  %v1127_v43 = vmul.f32 %v6137_v54, %v1115_v50  ;;  %v5403_v12 = vpop.eup %3802  ;;  %3808 = vrcp.f32 %v2681_v15 }
 0x1d9   : > { %3570 = vmatpush3.msra.mxu1 %v5374_v57  ;;  %6143 = vst [vmem:[#allocation12_spill] sm:$0xff] %v5403_v12  ;;  %v2856_v35 = vmul.f32 1.442695, %v2837_v49  ;;  %v5406_v42 = vmul.f32 0.70710677, %v5340_v0  ;;  %v2577_v16 = vmul.f32 %v5126_v23, %v2565_v48  ;;  %v1128_v29 = vmul.f32 %v6140_v13, %v1116_v55  ;;  %v5426_v50 = vld [vmem:[%s5941_s3 + $0x40] sm:$0xff] }
 0x1da   : > { %v1294_v38 = vsub.f32 0.0, %v1270_v18  ;;  %3571 = vmatprep.subr.mxu1 %v5388_v22  ;;  %v2527_v47 = vadd.f32 %v2515_v40, %v2491_v53  ;;  %v1139_v46 = vadd.f32 1.4214138, %v1127_v43  ;;  %v2670_v15 = vmul.f32 0.3275911, %v2658_v59 }
 0x1db   : > { %6144 = vst [vmem:[#allocation17_spill] sm:$0xff] %v5406_v42  ;;  %3572 = vmatpush3.msra.mxu1 %v5388_v22  ;;  %v2838_v49 = vmul.f32 %v2826_v28, %v2658_v59  ;;  %v2613_v60 = vmul.f32 %v5138_v52, %v2601_v6  ;;  %v1140_v40 = vadd.f32 1.4214138, %v1128_v29  ;;  %3810 = vpow2.f32 %v2856_v35  ;;  %v6146_v28 = vld [vmem:[#allocation21_spill] sm:$0xff] }
 0x1dc   : > { %v1306_v39 = vsel %vm1282_vm4, %v1294_v38, %v1270_v18  ;;  %3573 = vmatprep.subr.mxu1 %v5401_v32  ;;  %v2553_v1 = vadd.f32 %v2541_v51, %v2527_v47  ;;  %v1151_v34 = vmul.f32 %v6137_v54, %v1139_v46  ;;  %v2659_v59 = vand.u32 2147483647, %v5406_v42  ;;  %v5439_v51 = vld [vmem:[%s5941_s3 + $0x38] sm:$0xff] }
 0x1dd   : > { %v1318_v23 = vadd.f32 1.0, %v1306_v39  ;;  %3574 = vmatpush3.msra.mxu1 %v5401_v32  ;;  %v5430_v52 = vmul.f32 0.70710677, %v5378_v37  ;;  %v1105_v9 = vmul.f32 1.0614054, %v6146_v28  ;;  %v1152_v53 = vmul.f32 %v6140_v13, %v1140_v40  ;;  %v6154_v37 = vld [vmem:[#allocation31_spill] sm:$0xff] }
 0x1de   : > { %3575 = vmatprep.subr.mxu1 %v5415_v7  ;;  %v2589_v25 = vadd.f32 %v2577_v16, %v2553_v1  ;;  %v1163_v48 = vadd.f32 -0.28449672, %v1151_v34  ;;  %v2682_v43 = vadd.f32 1.0, %v2670_v15  ;;  %v5443_v55 = vmul.f32 1.442695, %v2838_v49  ;;  %v6151_v49 = vld [vmem:[#allocation27_spill] sm:$0xff] }
 0x1df   : > { %6145 = vst [vmem:[#allocation3_spill] sm:$0xff] %v5430_v52  ;;  %v1330_v18 = vmul.f32 %v1318_v23, %v1018_v4  ;;  %3576 = vmatpush3.msra.mxu1 %v5415_v7  ;;  %v5441_v6 = vpop.eup %3804  ;;  %v2827_v35 = vsub.f32 0.0, %v2659_v59  ;;  %v1117_v38 = vadd.f32 -1.4531521, %v1105_v9  ;;  %v1164_v29 = vadd.f32 -0.28449672, %v1152_v53 }
 0x1e0   : > { %6147 = vst [vmem:[#allocation4_spill] sm:$0xff] %v5441_v6  ;;  %3577 = vmatprep.subr.mxu1 %v5426_v50  ;;  %v5446_v4 = vpop.eup %3806  ;;  %v5448_v16 = vadd.f32 %v2613_v60, %v2589_v25  ;;  %v1175_v46 = vmul.f32 %v6137_v54, %v1163_v48  ;;  %v2671_v39 = vmul.f32 0.3275911, %v2659_v59  ;;  %v6150_v23 = vld [vmem:[#allocation5_spill] sm:$0xff]  ;;  %v1106_v34 = vmul.f32 1.0614054, %v6151_v49 }
 0x1e1   : > { %6148 = vst [vmem:[#allocation21_spill] sm:$0xff] %v5446_v4  ;;  %v1366_v47 = vmul.f32 %v1345_v3, %v1330_v18  ;;  %3578 = vmatpush3.msra.mxu1 %v5426_v50  ;;  %v5453_v1 = vmul.f32 0.5, %v6150_v23  ;;  %v1129_v15 = vmul.f32 %v6146_v28, %v1117_v38  ;;  %v5461_v60 = vld [vmem:[%s5941_s3 + $0x30] sm:$0xff]  ;;  %v2660_v40 = vand.u32 2147483647, %v5430_v52  ;;  %v5473_v48 = vld [vmem:[%s5941_s3 + $0x28] sm:$0xff] }
 0x1e2   : > { %6149 = vst [vmem:[#allocation105_spill] sm:$0xff] %v5448_v16  ;;  %3579 = vmatprep.subr.mxu1 %v5439_v51  ;;  %2972 = vrot.lane.b32.xlu1 %v5448_v16, %s3862_s23  ;;  %v1187_v3 = vadd.f32 0.2548296, %v1175_v46  ;;  %v6152_v9 = vld [vmem:[#allocation7_spill] sm:$0xff]  ;;  %v1176_v25 = vmul.f32 %v6140_v13, %v1164_v29  ;;  %3812 = vrcp.f32 %v2682_v43  ;;  %v6153_v53 = vld [vmem:[#allocation6_spill] sm:$0xff]  ;;  %v5480_v29 = vadd.f32 1.0, %v2671_v39 }
 0x1e3   : > { %3548 = vmatprep.mubr.f32.mxu1 %v1366_v47  ;;  %v5467_v18 = vmul.f32 0.5, %v6152_v9  ;;  %vm1283_vm5 = vcmp.lt.f32.partialorder %v6153_v53, 0.0  ;;  %v1141_v38 = vadd.f32 1.4214138, %v1129_v15  ;;  %v1118_v23 = vadd.f32 -1.4531521, %v1106_v34  ;;  %3580 = vmatpush3.msra.mxu1 %v5439_v51 }
 0x1e4   : > { %v1107_v52 = vmul.f32 1.0614054, %v6154_v37  ;;  %v2839_v47 = vmul.f32 %v2827_v35, %v2659_v59  ;;  %v2828_v46 = vsub.f32 0.0, %v2660_v40  ;;  %v1199_v9 = vmul.f32 %v6137_v54, %v1187_v3  ;;  %3581 = vmatprep.subr.mxu1 %v5461_v60  ;;  %v6157_v54 = vld [vmem:[#allocation8_spill] sm:$0xff] }
 0x1e5   : > { %v1188_v0 = vadd.f32 0.2548296, %v1176_v25  ;;  %v1153_v42 = vmul.f32 %v6146_v28, %v1141_v38  ;;  %v1130_v43 = vmul.f32 %v6151_v49, %v1118_v23  ;;  %3582 = vmatpush3.msra.mxu1 %v5461_v60  ;;  %v5485_v15 = vpop.eup %3808  ;;  %v2672_v34 = vmul.f32 0.3275911, %v2660_v40  ;;  %v6158_v38 = vld [vmem:[#allocation35_spill] sm:$0xff] }
 0x1e6   : > { %v1119_v36 = vadd.f32 -1.4531521, %v1107_v52  ;;  %6155 = vst [vmem:[#allocation5_spill] sm:$0xff] %v5485_v15  ;;  %v1259_v59 = vmul.f32 %v6156_v21, %v1199_v9  ;;  %vm1284_vm6 = vcmp.lt.f32.partialorder %v6157_v54, 0.0  ;;  %3583 = vmatprep.subr.mxu1 %v5473_v48  ;;  %v1108_v23 = vmul.f32 1.0614054, %v6158_v38 }
 0x1e7   : > { %v1200_v35 = vmul.f32 %v6140_v13, %v1188_v0  ;;  %v1165_v39 = vadd.f32 -0.28449672, %v1153_v42  ;;  %v1142_v3 = vadd.f32 1.4214138, %v1130_v43  ;;  %3584 = vmatpush3.msra.mxu1 %v5473_v48  ;;  %v5494_v52 = vmul.f32 1.442695, %v2839_v47 }
 0x1e8   : > { %v1131_v25 = vmul.f32 %v6154_v37, %v1119_v36  ;;  %v2840_v4 = vmul.f32 %v2828_v46, %v2660_v40  ;;  %v1271_v12 = vsub.f32 1.0, %v1259_v59  ;;  %v3846_v0 = vld [vmem:[%s5941_s3 + $0x20] sm:$0xff]  ;;  %v1120_v9 = vadd.f32 -1.4531521, %v1108_v23  ;;  %v5502_v43 = vpop.eup %3810 }
 0x1e9   : > { %v1260_v21 = vmul.f32 %v6159_v11, %v1200_v35  ;;  %3585 = vmatprep.subr.mxu1 %v3846_v0  ;;  %v1177_v13 = vmul.f32 %v6146_v28, %v1165_v39  ;;  %v1154_v42 = vmul.f32 %v6151_v49, %v1142_v3  ;;  %6160 = vst [vmem:[#allocation27_spill] sm:$0xff] %v5502_v43  ;;  %v5504_v47 = vadd.f32 1.0, %v2672_v34  ;;  %v6161_v59 = vld [vmem:[#allocation9_spill] sm:$0xff]  ;;  %v3847_v35 = vld [vmem:[%s5941_s3 + $0x18] sm:$0xff]  ;;  %v6165_v43 = vld [vmem:[#allocation38_spill] sm:$0xff] }
 0x1ea   : > { %v1143_v36 = vadd.f32 1.4214138, %v1131_v25  ;;  %3586 = vmatpush3.msra.mxu1 %v3846_v0  ;;  %v1295_v40 = vsub.f32 0.0, %v1271_v12  ;;  %v5507_v11 = vmul.f32 0.5, %v6161_v59  ;;  %v1132_v25 = vmul.f32 %v6158_v38, %v1120_v9  ;;  %v6163_v0 = vld [vmem:[#allocation10_spill] sm:$0xff]  ;;  %v3848_v59 = vld [vmem:[%s5941_s3 + $0x10] sm:$0xff] }
 0x1eb   : > { %v1272_v46 = vsub.f32 1.0, %v1260_v21  ;;  %3587 = vmatprep.subr.mxu1 %v3847_v35  ;;  %v1189_v39 = vadd.f32 0.2548296, %v1177_v13  ;;  %v1166_v15 = vadd.f32 -0.28449672, %v1154_v42  ;;  %vm1285_vm7 = vcmp.lt.f32.partialorder %v6163_v0, 0.0 }
 0x1ec   : > { %v1155_v3 = vmul.f32 %v6154_v37, %v1143_v36  ;;  %3588 = vmatpush3.msra.mxu1 %v3847_v35  ;;  %v5514_v23 = vmul.f32 1.442695, %v2840_v4  ;;  %v1307_v34 = vsel %vm1283_vm5, %v1295_v40, %v1271_v12  ;;  %v1347_v4 = vpop.permute.xlu1 %1346  ;;  %v6164_v12 = vld [vmem:[#allocation11_spill] sm:$0xff]  ;;  %v1144_v35 = vadd.f32 1.4214138, %v1132_v25  ;;  %v1349_v25 = vpop.permute.xlu0 %1348 }
 0x1ed   : > { %v1296_v21 = vsub.f32 0.0, %v1272_v46  ;;  %3589 = vmatprep.subr.mxu1 %v3848_v59  ;;  %v1319_v13 = vadd.f32 1.0, %v1307_v34  ;;  %v1201_v42 = vmul.f32 %v6146_v28, %v1189_v39  ;;  %v1178_v36 = vmul.f32 %v6151_v49, %v1166_v15  ;;  %v3849_v34 = vld [vmem:[%s5941_s3 + $0x8] sm:$0xff]  ;;  %v6166_v39 = vld [vmem:[#allocation23_spill] sm:$0xff] }
 0x1ee   : > { %6162 = vst [vmem:[#allocation7_spill] sm:$0xff] %v5514_v23  ;;  %v1167_v9 = vadd.f32 -0.28449672, %v1155_v3  ;;  %3590 = vmatpush3.msra.mxu1 %v3848_v59  ;;  %v5527_v40 = vmul.f32 0.5, %v6164_v12  ;;  %v1109_v23 = vmul.f32 1.0614054, %v6165_v43  ;;  %v1156_v20 = vmul.f32 %v6158_v38, %v1144_v35 }
 0x1ef   : > { %v1308_v53 = vsel %vm1284_vm6, %v1296_v21, %v1272_v46  ;;  %3591 = vmatprep.subr.mxu1 %v3849_v34  ;;  %v1331_v28 = vmul.f32 %v1319_v13, %v5453_v1  ;;  %v1261_v3 = vmul.f32 %v6166_v39, %v1201_v42  ;;  %v1190_v59 = vadd.f32 0.2548296, %v1178_v36  ;;  %v5535_v54 = vpop.eup %3812  ;;  %v6169_v21 = vld [vmem:[#allocation13_spill] sm:$0xff] }
 0x1f0   : > { %v1320_v15 = vadd.f32 1.0, %v1308_v53  ;;  %3592 = vmatpush3.msra.mxu1 %v3849_v34  ;;  %6167 = vst [vmem:[#allocation6_spill] sm:$0xff] %v5535_v54  ;;  %v5538_v46 = vmul.f32 0.70710677, %v5448_v16  ;;  %vm1286_vm8 = vcmp.lt.f32.partialorder %v6169_v21, 0.0  ;;  %v1179_v12 = vmul.f32 %v6154_v37, %v1167_v9  ;;  %v3850_v1 = vld [vmem:[%s5941_s3] sm:$0xff]  ;;  %v1351_v6 = vpop.permute.xlu1 %1350  ;;  %v1353_v19 = vpop.permute.xlu0 %1352 }
 0x1f1   : > { %v1121_v2 = vadd.f32 -1.4531521, %v1109_v23  ;;  %3593 = vmatprep.subr.mxu1 %v3850_v1  ;;  %v1367_v13 = vmul.f32 %v1347_v4, %v1331_v28  ;;  %v1273_v36 = vsub.f32 1.0, %v1261_v3  ;;  %v1202_v53 = vmul.f32 %v6151_v49, %v1190_v59  ;;  %v6170_v34 = vld [vmem:[#allocation16_spill] sm:$0xff]  ;;  %v6171_v35 = vld [vmem:[#allocation29_spill] sm:$0xff]  ;;  %v6172_v49 = vld [vmem:[#allocation42_spill] sm:$0xff] }
 0x1f2   : > { %6168 = vst [vmem:[#allocation31_spill] sm:$0xff] %v5538_v46  ;;  %v1332_v42 = vmul.f32 %v1320_v15, %v5467_v18  ;;  %3594 = vmatpush3.msra.mxu1 %v3850_v1  ;;  %v1023_v39 = vmul.f32 0.5, %v6170_v34  ;;  %v1191_v16 = vadd.f32 0.2548296, %v1179_v12  ;;  %v1168_v54 = vadd.f32 -0.28449672, %v1156_v20 }
 0x1f3   : > { %v1133_v9 = vmul.f32 %v6165_v43, %v1121_v2  ;;  %v5553_v23 = vld [vmem:[%s5941_s3 + $0x78] sm:$0xff]  ;;  %3549 = vmatmul.mubr.f32.gmra.mxu1 %v1367_v13  ;;  %v1297_v18 = vsub.f32 0.0, %v1273_v36  ;;  %v1262_v28 = vmul.f32 %v6171_v35, %v1202_v53  ;;  %v1110_v15 = vmul.f32 1.0614054, %v6172_v49  ;;  %v6173_v13 = vld [vmem:[#allocation18_spill] sm:$0xff]  ;;  %v6174_v53 = vld [vmem:[#allocation33_spill] sm:$0xff] }
 0x1f4   : > { %3613 = vmatprep.subr.mxu1 %v5553_v23  ;;  %v1368_v4 = vmul.f32 %v1349_v25, %v1332_v42  ;;  %v5559_v3 = vand.u32 2147483647, %v5538_v46  ;;  %v1203_v20 = vmul.f32 %v6154_v37, %v1191_v16  ;;  %v1180_v2 = vmul.f32 %v6158_v38, %v1168_v54  ;;  %v6175_v37 = vld [vmem:[#allocation20_spill] sm:$0xff] }
 0x1f5   : > { %v1145_v59 = vadd.f32 1.4214138, %v1133_v9  ;;  %v1309_v12 = vsel %vm1285_vm7, %v1297_v18, %v1273_v36  ;;  %v1274_v1 = vsub.f32 1.0, %v1262_v28  ;;  %vm1287_vm9 = vcmp.lt.f32.partialorder %v6173_v13, 0.0  ;;  %v6176_v9 = vld [vmem:[#allocation46_spill] sm:$0xff] }
 0x1f6   : > { %3551 = vmatprep.mubr.f32.mxu1 %v1368_v4  ;;  %v1122_v25 = vadd.f32 -1.4531521, %v1110_v15  ;;  %v1321_v42 = vadd.f32 1.0, %v1309_v12  ;;  %v1263_v34 = vmul.f32 %v6174_v53, %v1203_v20  ;;  %v1192_v35 = vadd.f32 0.2548296, %v1180_v2 }
 0x1f7   : > { %v1157_v46 = vmul.f32 %v6165_v43, %v1145_v59  ;;  %v1298_v14 = vsub.f32 0.0, %v1274_v1  ;;  %v1024_v16 = vmul.f32 0.5, %v6175_v37  ;;  %v1111_v4 = vmul.f32 1.0614054, %v6176_v9 }
 0x1f8   : > { %v1134_v54 = vmul.f32 %v6172_v49, %v1122_v25  ;;  %v1333_v0 = vmul.f32 %v1321_v42, %v5507_v11  ;;  %v1275_v36 = vsub.f32 1.0, %v1263_v34  ;;  %v1204_v18 = vmul.f32 %v6158_v38, %v1192_v35  ;;  %v6177_v25 = vld [vmem:[#allocation36_spill] sm:$0xff]  ;;  %v6178_v35 = vld [vmem:[#allocation22_spill] sm:$0xff] }
 0x1f9   : > { %v1169_v28 = vadd.f32 -0.28449672, %v1157_v46  ;;  %v5574_v15 = vmul.f32 0.3275911, %v5559_v3  ;;  %v1310_v20 = vsel %vm1286_vm8, %v1298_v14, %v1274_v1  ;;  %v1123_v59 = vadd.f32 -1.4531521, %v1111_v4 }
 0x1fa   : > { %v1146_v2 = vadd.f32 1.4214138, %v1134_v54  ;;  %v1369_v12 = vmul.f32 %v1351_v6, %v1333_v0  ;;  %v1322_v53 = vadd.f32 1.0, %v1310_v20  ;;  %v1299_v37 = vsub.f32 0.0, %v1275_v36 }
 0x1fb   : > { %v1264_v30 = vmul.f32 %v6177_v25, %v1204_v18  ;;  %v1181_v11 = vmul.f32 %v6165_v43, %v1169_v28  ;;  %v1135_v38 = vmul.f32 %v6176_v9, %v1123_v59  ;;  %v1905_v46 = vmul.f32 1.0614054, %v4786_v45  ;;  %v1355_v18 = vpop.permute.xlu1 %1354 }
 0x1fc   : > { %v1158_v42 = vmul.f32 %v6172_v49, %v1146_v2  ;;  %v2829_v34 = vsub.f32 0.0, %v5559_v3  ;;  %3552 = vmatmul.mubr.f32.gmra.mxu1 %v1369_v12  ;;  %v1334_v14 = vmul.f32 %v1322_v53, %v5527_v40  ;;  %v1311_v6 = vsel %vm1287_vm9, %v1299_v37, %v1275_v36 }
 0x1fd   : > { %v1276_v21 = vsub.f32 1.0, %v1264_v30  ;;  %v1323_v1 = vadd.f32 1.0, %v1311_v6  ;;  %vm1288_vm10 = vcmp.lt.f32.partialorder %v6178_v35, 0.0  ;;  %v1193_v54 = vadd.f32 0.2548296, %v1181_v11  ;;  %v6179_v30 = vld [vmem:[#allocation24_spill] sm:$0xff] }
 0x1fe   : > { %v1170_v4 = vadd.f32 -0.28449672, %v1158_v42  ;;  %v1370_v0 = vmul.f32 %v1353_v19, %v1334_v14  ;;  %v1147_v20 = vadd.f32 1.4214138, %v1135_v38  ;;  %v1917_v2 = vadd.f32 -1.4531521, %v1905_v46 }
 0x1ff   : > { %v1300_v28 = vsub.f32 0.0, %v1276_v21  ;;  %v1335_v59 = vmul.f32 %v1323_v1, %v1023_v39  ;;  %v1205_v25 = vmul.f32 %v6165_v43, %v1193_v54  ;;  %v1906_v40 = vmul.f32 1.0614054, %v4821_v44  ;;  %v6180_v42 = vld [vmem:[#allocation40_spill] sm:$0xff]  ;;  %v1357_v43 = vpop.permute.xlu0 %1356  ;;  %v6181_v35 = vld [vmem:[#allocation25_spill] sm:$0xff] }
 0x200   : > { %v1182_v12 = vmul.f32 %v6172_v49, %v1170_v4  ;;  %3554 = vmatprep.mubr.f32.mxu1 %v1370_v0  ;;  %v1025_v36 = vmul.f32 0.5, %v6179_v30  ;;  %v1159_v53 = vmul.f32 %v6176_v9, %v1147_v20  ;;  %v1929_v37 = vmul.f32 %v4786_v45, %v1917_v2  ;;  %v6182_v2 = vld [vmem:[#allocation26_spill] sm:$0xff] }
 0x201   : > { %v1312_v13 = vsel %vm1288_vm10, %v1300_v28, %v1276_v21  ;;  %v1371_v19 = vmul.f32 %v1355_v18, %v1335_v59  ;;  %v1265_v38 = vmul.f32 %v6180_v42, %v1205_v25  ;;  %3814 = vpow2.f32 %v5443_v55  ;;  %v6183_v25 = vld [vmem:[#allocation44_spill] sm:$0xff] }
 0x202   : > { %v1324_v11 = vadd.f32 1.0, %v1312_v13  ;;  %v1194_v46 = vadd.f32 0.2548296, %v1182_v12  ;;  %v1171_v39 = vadd.f32 -0.28449672, %v1159_v53  ;;  %vm1289_vm11 = vcmp.lt.f32.partialorder %v6181_v35, 0.0 }
 0x203   : > { %v1941_v14 = vadd.f32 1.4214138, %v1929_v37  ;;  %v1918_v6 = vadd.f32 -1.4531521, %v1906_v40  ;;  %3555 = vmatmul.mubr.f32.gmra.mxu1 %v1371_v19  ;;  %v1277_v21 = vsub.f32 1.0, %v1265_v38  ;;  %v1026_v59 = vmul.f32 0.5, %v6182_v2 }
 0x204   : > { %v1336_v1 = vmul.f32 %v1324_v11, %v1024_v16  ;;  %v1206_v54 = vmul.f32 %v6172_v49, %v1194_v46  ;;  %v1183_v4 = vmul.f32 %v6176_v9, %v1171_v39  ;;  %v1907_v28 = vmul.f32 1.0614054, %v4870_v8  ;;  %v6184_v53 = vld [vmem:[#allocation28_spill] sm:$0xff]  ;;  %v1359_v46 = vpop.permute.xlu1 %1358  ;;  %v6185_v39 = vld [vmem:[#allocation30_spill] sm:$0xff] }
 0x205   : > { %v1953_v0 = vmul.f32 %v4786_v45, %v1941_v14  ;;  %v1930_v18 = vmul.f32 %v4821_v44, %v1918_v6  ;;  %v1301_v20 = vsub.f32 0.0, %v1277_v21  ;;  %3816 = vrcp.f32 %v5480_v29 }
 0x206   : > { %v1372_v55 = vmul.f32 %v1357_v43, %v1336_v1  ;;  %v1266_v12 = vmul.f32 %v6183_v25, %v1206_v54  ;;  %v1195_v16 = vadd.f32 0.2548296, %v1183_v4  ;;  %vm1290_vm12 = vcmp.lt.f32.partialorder %v6184_v53, 0.0  ;;  %v6188_v53 = vld [vmem:[#allocation34_spill] sm:$0xff] }
 0x207   : > { %v1965_v40 = vadd.f32 -0.28449672, %v1953_v0  ;;  %v1942_v13 = vadd.f32 1.4214138, %v1930_v18  ;;  %v1313_v49 = vsel %vm1289_vm11, %v1301_v20, %v1277_v21  ;;  %v1919_v37 = vadd.f32 -1.4531521, %v1907_v28 }
 0x208   : > { %3557 = vmatprep.mubr.f32.mxu1 %v1372_v55  ;;  %v1278_v30 = vsub.f32 1.0, %v1266_v12  ;;  %v1325_v19 = vadd.f32 1.0, %v1313_v49  ;;  %v1207_v11 = vmul.f32 %v6176_v9, %v1195_v16  ;;  %v1027_v29 = vmul.f32 0.5, %v6185_v39  ;;  %v6186_v21 = vld [vmem:[#allocation49_spill] sm:$0xff]  ;;  %v6187_v18 = vld [vmem:[#allocation32_spill] sm:$0xff]  ;;  %v1361_v12 = vpop.permute.xlu0 %1360 }
 0x209   : > { %v1977_v42 = vmul.f32 %v4786_v45, %v1965_v40  ;;  %v1954_v38 = vmul.f32 %v4821_v44, %v1942_v13  ;;  %v1931_v14 = vmul.f32 %v4870_v8, %v1919_v37  ;;  %v1908_v6 = vmul.f32 1.0614054, %v4898_v24 }
 0x20a   : > { %v1302_v43 = vsub.f32 0.0, %v1278_v30  ;;  %v1337_v1 = vmul.f32 %v1325_v19, %v1025_v36  ;;  %v1267_v35 = vmul.f32 %v6186_v21, %v1207_v11  ;;  %vm1291_vm13 = vcmp.lt.f32.partialorder %v6187_v18, 0.0  ;;  %v6189_v19 = vld [vmem:[#allocation51_spill] sm:$0xff] }
 0x20b   : > { %v1989_v54 = vadd.f32 0.2548296, %v1977_v42  ;;  %v1966_v4 = vadd.f32 -0.28449672, %v1954_v38  ;;  %v1943_v9 = vadd.f32 1.4214138, %v1931_v14  ;;  %3818 = vpow2.f32 %v5494_v52 }
 0x20c   : > { %v1314_v0 = vsel %vm1290_vm12, %v1302_v43, %v1278_v30  ;;  %v1920_v28 = vadd.f32 -1.4531521, %v1908_v6  ;;  %v1373_v55 = vmul.f32 %v1359_v46, %v1337_v1  ;;  %v1279_v2 = vsub.f32 1.0, %v1267_v35 }
 0x20d   : > { %v1326_v20 = vadd.f32 1.0, %v1314_v0  ;;  %v2001_v25 = vmul.f32 %v4786_v45, %v1989_v54  ;;  %v1978_v16 = vmul.f32 %v4821_v44, %v1966_v4  ;;  %v1955_v40 = vmul.f32 %v4870_v8, %v1943_v9  ;;  %v1363_v54 = vpop.permute.xlu1 %1362  ;;  %v6190_v4 = vld [vmem:[#allocation37_spill] sm:$0xff] }
 0x20e   : > { %v1932_v36 = vmul.f32 %v4898_v24, %v1920_v28  ;;  %v1909_v13 = vmul.f32 1.0614054, %v4929_v26  ;;  %3558 = vmatmul.mubr.f32.gmra.mxu1 %v1373_v55  ;;  %v1303_v30 = vsub.f32 0.0, %v1279_v2  ;;  %v1821_v37 = vmul.f32 0.5, %v6188_v53  ;;  %v5621_v42 = vpop.eup %3814  ;;  %v6191_v55 = vld [vmem:[#allocation55_spill] sm:$0xff] }
 0x20f   : > { %v1338_v49 = vmul.f32 %v1326_v20, %v1026_v59  ;;  %v2061_v11 = vmul.f32 %v6189_v19, %v2001_v25  ;;  %v1990_v45 = vadd.f32 0.2548296, %v1978_v16  ;;  %v1967_v38 = vadd.f32 -0.28449672, %v1955_v40  ;;  %v2146_v19 = vpop.permute.xlu0 %2145 }
 0x210   : > { %v1944_v46 = vadd.f32 1.4214138, %v1932_v36  ;;  %v1315_v39 = vsel %vm1291_vm13, %v1303_v30, %v1279_v2  ;;  %v1921_v6 = vadd.f32 -1.4531521, %v1909_v13  ;;  %vm2085_vm14 = vcmp.lt.f32.partialorder %v6190_v4, 0.0 }
 0x211   : > { %v1374_v43 = vmul.f32 %v1361_v12, %v1338_v49  ;;  %v2073_v14 = vsub.f32 1.0, %v2061_v11  ;;  %v1327_v1 = vadd.f32 1.0, %v1315_v39  ;;  %v2002_v59 = vmul.f32 %v4821_v44, %v1990_v45  ;;  %v6192_v12 = vld [vmem:[#allocation39_spill] sm:$0xff]  ;;  %v6193_v11 = vld [vmem:[#allocation41_spill] sm:$0xff]  ;;  %v6194_v39 = vld [vmem:[#allocation58_spill] sm:$0xff] }
 0x212   : > { %v1979_v21 = vmul.f32 %v4870_v8, %v1967_v38  ;;  %v1956_v35 = vmul.f32 %v4898_v24, %v1944_v46  ;;  %v1933_v0 = vmul.f32 %v4929_v26, %v1921_v6  ;;  %v1910_v9 = vmul.f32 1.0614054, %v4959_v31  ;;  %v5632_v18 = vpop.eup %3816 }
 0x213   : > { %3560 = vmatprep.mubr.f32.mxu1 %v1374_v43  ;;  %v2097_v52 = vsub.f32 0.0, %v2073_v14  ;;  %v1339_v28 = vmul.f32 %v1327_v1, %v1027_v29  ;;  %v2062_v20 = vmul.f32 %v6191_v55, %v2002_v59  ;;  %v1822_v16 = vmul.f32 0.5, %v6192_v12  ;;  %v2148_v55 = vpop.permute.xlu1 %2147  ;;  %v6196_v12 = vld [vmem:[#allocation62_spill] sm:$0xff] }
 0x214   : > { %v1991_v2 = vadd.f32 0.2548296, %v1979_v21  ;;  %v1968_v44 = vadd.f32 -0.28449672, %v1956_v35  ;;  %v1945_v40 = vadd.f32 1.4214138, %v1933_v0  ;;  %3820 = vrcp.f32 %v5504_v47 }
 0x215   : > { %v2109_v25 = vsel %vm2085_vm14, %v2097_v52, %v2073_v14  ;;  %v1922_v36 = vadd.f32 -1.4531521, %v1910_v9  ;;  %v1375_v13 = vmul.f32 %v1363_v54, %v1339_v28  ;;  %v2074_v30 = vsub.f32 1.0, %v2062_v20  ;;  %v6195_v47 = vld [vmem:[#allocation45_spill] sm:$0xff] }
 0x216   : > { %v2121_v49 = vadd.f32 1.0, %v2109_v25  ;;  %v2003_v53 = vmul.f32 %v4870_v8, %v1991_v2  ;;  %vm2086_vm15 = vcmp.lt.f32.partialorder %v6193_v11, 0.0  ;;  %v1980_v45 = vmul.f32 %v4898_v24, %v1968_v44 }
 0x217   : > { %v1957_v29 = vmul.f32 %v4929_v26, %v1945_v40  ;;  %v1934_v38 = vmul.f32 %v4959_v31, %v1922_v36  ;;  %3561 = vmatmul.mubr.f32.gmra.mxu1 %v1375_v13  ;;  %v2098_v43 = vsub.f32 0.0, %v2074_v30  ;;  %v1911_v6 = vmul.f32 1.0614054, %v4998_v62  ;;  %v6197_v13 = vld [vmem:[#allocation43_spill] sm:$0xff] }
 0x218   : > { %v2133_v46 = vmul.f32 %v2121_v49, %v1821_v37  ;;  %v2063_v14 = vmul.f32 %v6194_v39, %v2003_v53  ;;  %v1992_v1 = vadd.f32 0.2548296, %v1980_v45  ;;  %v5648_v28 = vadd.f32 1.0, %v5574_v15  ;;  %v5652_v44 = vpop.eup %3818 }
 0x219   : > { %v1969_v8 = vadd.f32 -0.28449672, %v1957_v29  ;;  %v1946_v59 = vadd.f32 1.4214138, %v1934_v38  ;;  %v2110_v35 = vsel %vm2086_vm15, %v2098_v43, %v2074_v30  ;;  %v1923_v4 = vadd.f32 -1.4531521, %v1911_v6  ;;  %v2150_v38 = vpop.permute.xlu0 %2149 }
 0x21a   : > { %v2169_v21 = vmul.f32 %v2146_v19, %v2133_v46  ;;  %v2075_v54 = vsub.f32 1.0, %v2063_v14  ;;  %v2122_v52 = vadd.f32 1.0, %v2110_v35  ;;  %v2004_v0 = vmul.f32 %v4898_v24, %v1992_v1  ;;  %v6198_v46 = vld [vmem:[#allocation47_spill] sm:$0xff]  ;;  %v6200_v35 = vld [vmem:[#allocation48_spill] sm:$0xff] }
 0x21b   : > { %v1981_v9 = vmul.f32 %v4929_v26, %v1969_v8  ;;  %v1958_v37 = vmul.f32 %v4959_v31, %v1946_v59  ;;  %vm2087_vm0 = vcmp.lt.f32.partialorder %v6195_v47, 0.0  ;;  %v1935_v2 = vmul.f32 %v4998_v62, %v1923_v4  ;;  %v6199_v8 = vld [vmem:[#allocation64_spill] sm:$0xff] }
 0x21c   : > { %3595 = vmatprep.mubr.f32.mxu1 %v2169_v21  ;;  %v2099_v20 = vsub.f32 0.0, %v2075_v54  ;;  %v2134_v25 = vmul.f32 %v2122_v52, %v1822_v16  ;;  %v2064_v40 = vmul.f32 %v6196_v12, %v2004_v0  ;;  %v1823_v49 = vmul.f32 0.5, %v6197_v13 }
 0x21d   : > { %v1993_v24 = vadd.f32 0.2548296, %v1981_v9  ;;  %v1970_v36 = vadd.f32 -0.28449672, %v1958_v37  ;;  %v1947_v53 = vadd.f32 1.4214138, %v1935_v2  ;;  %3822 = vrcp.f32 %v5648_v28 }
 0x21e   : > { %v2111_v30 = vsel %vm2087_vm0, %v2099_v20, %v2075_v54  ;;  %v1912_v15 = vmul.f32 1.0614054, %v5030_v33  ;;  %v2170_v19 = vmul.f32 %v2148_v55, %v2134_v25  ;;  %v2076_v45 = vsub.f32 1.0, %v2064_v40  ;;  %v2152_v25 = vpop.permute.xlu1 %2151 }
 0x21f   : > { %v2123_v11 = vadd.f32 1.0, %v2111_v30  ;;  %v2005_v29 = vmul.f32 %v4929_v26, %v1993_v24  ;;  %v1824_v43 = vmul.f32 0.5, %v6198_v46  ;;  %v1982_v16 = vmul.f32 %v4959_v31, %v1970_v36 }
 0x220   : > { %v1959_v39 = vmul.f32 %v4998_v62, %v1947_v53  ;;  %v1924_v14 = vadd.f32 -1.4531521, %v1912_v15  ;;  %3596 = vmatmul.mubr.f32.vlgmr.msra.gmra.mxu1 %v2170_v19  ;;  %v2100_v1 = vsub.f32 0.0, %v2076_v45  ;;  %v1913_v21 = vmul.f32 1.0614054, %v5079_v61  ;;  %v6203_v53 = vld [vmem:[#allocation50_spill] sm:$0xff] }
 0x221   : > { %v2135_v6 = vmul.f32 %v2123_v11, %v1823_v49  ;;  %v2065_v59 = vmul.f32 %v6199_v8, %v2005_v29  ;;  %vm2088_vm2 = vcmp.lt.f32.partialorder %v6200_v35, 0.0  ;;  %v1994_v54 = vadd.f32 0.2548296, %v1982_v16  ;;  %3614 = vmatpush3.msra.mxu1 %v5553_v23  ;;  %v6201_v23 = vld [vmem:[#allocation52_spill] sm:$0xff]  ;;  %v5674_v36 = vpop.eup %3820 }
 0x222   : > { %v1971_v26 = vadd.f32 -0.28449672, %v1959_v39  ;;  %v1936_v4 = vmul.f32 %v5030_v33, %v1924_v14  ;;  %v2112_v0 = vsel %vm2088_vm2, %v2100_v1, %v2076_v45  ;;  %3615 = vmatprep.subr.mxu1 %v5351_v5  ;;  %v1925_v37 = vadd.f32 -1.4531521, %v1913_v21  ;;  %v6204_v39 = vld [vmem:[#allocation53_spill] sm:$0xff] }
 0x223   : > { %v2171_v52 = vmul.f32 %v2150_v38, %v2135_v6  ;;  %v2077_v9 = vsub.f32 1.0, %v2065_v59  ;;  %v2124_v55 = vadd.f32 1.0, %v2112_v0  ;;  %v2006_v47 = vmul.f32 %v4959_v31, %v1994_v54  ;;  %3616 = vmatpush3.msra.mxu1 %v5351_v5  ;;  %v6202_v31 = vld [vmem:[#allocation67_spill] sm:$0xff] }
 0x224   : > { %v1983_v20 = vmul.f32 %v4998_v62, %v1971_v26  ;;  %v1948_v2 = vadd.f32 1.4214138, %v1936_v4  ;;  %vm2089_vm3 = vcmp.lt.f32.partialorder %v6201_v23, 0.0  ;;  %3617 = vmatprep.subr.mxu1 %v5364_v41  ;;  %v1937_v40 = vmul.f32 %v5079_v61, %v1925_v37  ;;  %v6207_v23 = vld [vmem:[#allocation85_spill] sm:$0xff] }
 0x225   : > { %3598 = vmatprep.mubr.f32.mxu1 %v2171_v52  ;;  %v2101_v12 = vsub.f32 0.0, %v2077_v9  ;;  %v1914_v24 = vmul.f32 1.0614054, %v5121_v56  ;;  %v2136_v13 = vmul.f32 %v2124_v55, %v1824_v43  ;;  %v2066_v49 = vmul.f32 %v6202_v31, %v2006_v47  ;;  %3618 = vmatpush3.msra.mxu1 %v5364_v41  ;;  %v2154_v43 = vpop.permute.xlu0 %2153  ;;  %v6208_v31 = vld [vmem:[#allocation56_spill] sm:$0xff] }
 0x226   : > { %v1995_v30 = vadd.f32 0.2548296, %v1983_v20  ;;  %v1960_v5 = vmul.f32 %v5030_v33, %v1948_v2  ;;  %v1825_v15 = vmul.f32 0.5, %v6203_v53  ;;  %3619 = vmatprep.subr.mxu1 %v5374_v57  ;;  %v1949_v11 = vadd.f32 1.4214138, %v1937_v40  ;;  %v2156_v20 = vpop.permute.xlu1 %2155  ;;  %v6206_v2 = vld [vmem:[#allocation57_spill] sm:$0xff] }
 0x227   : > { %v2113_v19 = vsel %vm2089_vm3, %v2101_v12, %v2077_v9  ;;  %v1926_v45 = vadd.f32 -1.4531521, %v1914_v24  ;;  %v2172_v29 = vmul.f32 %v2152_v25, %v2136_v13  ;;  %v2078_v46 = vsub.f32 1.0, %v2066_v49  ;;  %3620 = vmatpush3.msra.mxu1 %v5374_v57 }
 0x228   : > { %v2125_v38 = vadd.f32 1.0, %v2113_v19  ;;  %v2007_v16 = vmul.f32 %v4998_v62, %v1995_v30  ;;  %v1826_v14 = vmul.f32 0.5, %v6204_v39  ;;  %v1972_v41 = vadd.f32 -0.28449672, %v1960_v5  ;;  %3621 = vmatprep.subr.mxu1 %v5388_v22  ;;  %v6205_v62 = vld [vmem:[#allocation54_spill] sm:$0xff] }
 0x229   : > { %v1961_v6 = vmul.f32 %v5079_v61, %v1949_v11  ;;  %v1938_v1 = vmul.f32 %v5121_v56, %v1926_v45  ;;  %3599 = vmatmul.mubr.f32.gmra.mxu1 %v2172_v29  ;;  %v2102_v59 = vsub.f32 0.0, %v2078_v46  ;;  %v1915_v35 = vmul.f32 1.0614054, %v5154_v27  ;;  %v6209_v11 = vld [vmem:[#allocation75_spill] sm:$0xff] }
 0x22a   : > { %v2137_v8 = vmul.f32 %v2125_v38, %v1825_v15  ;;  %v2067_v21 = vmul.f32 %v5021_v17, %v2007_v16  ;;  %vm2090_vm4 = vcmp.lt.f32.partialorder %v6205_v62, 0.0  ;;  %v1984_v57 = vmul.f32 %v5030_v33, %v1972_v41  ;;  %3622 = vmatpush3.msra.mxu1 %v5388_v22  ;;  %v6210_v38 = vld [vmem:[#allocation59_spill] sm:$0xff]  ;;  %v6211_v41 = vld [vmem:[#allocation77_spill] sm:$0xff] }
 0x22b   : > { %v1973_v54 = vadd.f32 -0.28449672, %v1961_v6  ;;  %v1950_v26 = vadd.f32 1.4214138, %v1938_v1  ;;  %v2114_v52 = vsel %vm2090_vm4, %v2102_v59, %v2078_v46  ;;  %3623 = vmatprep.subr.mxu1 %v5401_v32  ;;  %v1927_v9 = vadd.f32 -1.4531521, %v1915_v35 }
 0x22c   : > { %v2173_v4 = vmul.f32 %v2154_v43, %v2137_v8  ;;  %v2079_v0 = vsub.f32 1.0, %v2067_v21  ;;  %v2126_v37 = vadd.f32 1.0, %v2114_v52  ;;  %v1996_v55 = vadd.f32 0.2548296, %v1984_v57  ;;  %3624 = vmatpush3.msra.mxu1 %v5401_v32  ;;  %v6213_v52 = vld [vmem:[#allocation63_spill] sm:$0xff] }
 0x22d   : > { %v1985_v17 = vmul.f32 %v5079_v61, %v1973_v54  ;;  %v1962_v47 = vmul.f32 %v5121_v56, %v1950_v26  ;;  %vm2091_vm5 = vcmp.lt.f32.partialorder %v6206_v2, 0.0  ;;  %3625 = vmatprep.subr.mxu1 %v5415_v7  ;;  %v1939_v25 = vmul.f32 %v5154_v27, %v1927_v9  ;;  %v6212_v54 = vld [vmem:[#allocation60_spill] sm:$0xff]  ;;  %v6215_v2 = vld [vmem:[#allocation61_spill] sm:$0xff] }
 0x22e   : > { %3601 = vmatprep.mubr.f32.mxu1 %v2173_v4  ;;  %v2103_v22 = vsub.f32 0.0, %v2079_v0  ;;  %v1916_v12 = vmul.f32 1.0614054, %v6207_v23  ;;  %v2138_v40 = vmul.f32 %v2126_v37, %v1826_v14  ;;  %v2008_v24 = vmul.f32 %v5030_v33, %v1996_v55  ;;  %3626 = vmatpush3.msra.mxu1 %v5415_v7  ;;  %v2158_v33 = vpop.permute.xlu0 %2157  ;;  %v6214_v37 = vld [vmem:[#allocation80_spill] sm:$0xff] }
 0x22f   : > { %v1997_v13 = vadd.f32 0.2548296, %v1985_v17  ;;  %v1974_v32 = vadd.f32 -0.28449672, %v1962_v47  ;;  %v1827_v49 = vmul.f32 0.5, %v6208_v31  ;;  %3627 = vmatprep.subr.mxu1 %v5426_v50  ;;  %v1828_v46 = vmul.f32 0.5, %v6210_v38 }
 0x230   : > { %v2115_v30 = vsel %vm2091_vm5, %v2103_v22, %v2079_v0  ;;  %v1951_v5 = vadd.f32 1.4214138, %v1939_v25  ;;  %v1928_v53 = vadd.f32 -1.4531521, %v1916_v12  ;;  %v2174_v15 = vmul.f32 %v2156_v20, %v2138_v40  ;;  %3628 = vmatpush3.msra.mxu1 %v5426_v50  ;;  %v2989_v47 = vld [vmem:[%s5941_s3 + $0x18] sm:$0xff]  ;;  %v2160_v20 = vpop.permute.xlu1 %2159 }
 0x231   : > { %v2127_v19 = vadd.f32 1.0, %v2115_v30  ;;  %v2068_v45 = vmul.f32 %v6209_v11, %v2008_v24  ;;  %v2009_v29 = vmul.f32 %v5079_v61, %v1997_v13  ;;  %v1986_v7 = vmul.f32 %v5121_v56, %v1974_v32  ;;  %3629 = vmatprep.subr.mxu1 %v5439_v51  ;;  %v6216_v30 = vld [vmem:[#allocation66_spill] sm:$0xff] }
 0x232   : > { %v1963_v16 = vmul.f32 %v5154_v27, %v1951_v5  ;;  %v1940_v43 = vmul.f32 %v6207_v23, %v1928_v53  ;;  %3602 = vmatmul.mubr.f32.gmra.mxu1 %v2174_v15  ;;  %v2710_v61 = vmul.f32 1.0614054, %v5214_v63  ;;  %v5717_v50 = vmul.f32 %v2829_v34, %v5559_v3 }
 0x233   : > { %v2139_v39 = vmul.f32 %v2127_v19, %v1827_v49  ;;  %v2080_v14 = vsub.f32 1.0, %v2068_v45  ;;  %v2069_v6 = vmul.f32 %v6211_v41, %v2009_v29  ;;  %v1998_v1 = vadd.f32 0.2548296, %v1986_v7  ;;  %3630 = vmatpush3.msra.mxu1 %v5439_v51  ;;  %v2990_v51 = vld [vmem:[%s5941_s3 + $0x20] sm:$0xff]  ;;  %v2162_v49 = vpop.permute.xlu0 %2161  ;;  %v6217_v29 = vld [vmem:[#allocation84_spill] sm:$0xff] }
 0x234   : > { %v1975_v8 = vadd.f32 -0.28449672, %v1963_v16  ;;  %v1952_v59 = vadd.f32 1.4214138, %v1940_v43  ;;  %3631 = vmatprep.subr.mxu1 %v5461_v60  ;;  %v2722_v57 = vadd.f32 -1.4531521, %v2710_v61 }
 0x235   : > { %v2175_v21 = vmul.f32 %v2158_v33, %v2139_v39  ;;  %v2104_v35 = vsub.f32 0.0, %v2080_v14  ;;  %v2081_v62 = vsub.f32 1.0, %v2069_v6  ;;  %vm2092_vm6 = vcmp.lt.f32.partialorder %v6212_v54, 0.0  ;;  %3632 = vmatpush3.msra.mxu1 %v5461_v60  ;;  %v6218_v39 = vld [vmem:[#allocation65_spill] sm:$0xff] }
 0x236   : > { %v2010_v26 = vmul.f32 %v5121_v56, %v1998_v1  ;;  %v1987_v4 = vmul.f32 %v5154_v27, %v1975_v8  ;;  %v1964_v3 = vmul.f32 %v6207_v23, %v1952_v59  ;;  %vm2093_vm7 = vcmp.lt.f32.partialorder %v6213_v52, 0.0  ;;  %3633 = vmatprep.subr.mxu1 %v5473_v48 }
 0x237   : > { %3604 = vmatprep.mubr.f32.mxu1 %v2175_v21  ;;  %v2116_v34 = vsel %vm2092_vm6, %v2104_v35, %v2080_v14  ;;  %v2105_v0 = vsub.f32 0.0, %v2081_v62  ;;  %v2734_v9 = vmul.f32 %v5214_v63, %v2722_v57  ;;  %3634 = vmatpush3.msra.mxu1 %v5473_v48  ;;  %v1829_v22 = vmul.f32 0.5, %v6215_v2  ;;  %v2988_v48 = vld [vmem:[%s5941_s3 + $0x10] sm:$0xff]  ;;  %v2986_v21 = vld [vmem:[%s5941_s3] sm:$0xff]  ;;  %v2164_v35 = vpop.permute.xlu1 %2163  ;;  %v2166_v2 = vpop.permute.xlu0 %2165 }
 0x238   : > { %v2128_v56 = vadd.f32 1.0, %v2116_v34  ;;  %v2070_v55 = vmul.f32 %v6214_v37, %v2010_v26  ;;  %v1999_v17 = vadd.f32 0.2548296, %v1987_v4  ;;  %v1976_v60 = vadd.f32 -0.28449672, %v1964_v3  ;;  %3635 = vmatprep.subr.mxu1 %v2990_v51  ;;  %v6220_v26 = vld [vmem:[#allocation95_spill] sm:$0xff] }
 0x239   : > { %v2117_v25 = vsel %vm2093_vm7, %v2105_v0, %v2081_v62  ;;  %v2746_v12 = vadd.f32 1.4214138, %v2734_v9  ;;  %v2711_v40 = vmul.f32 1.0614054, %v5245_v58  ;;  %3636 = vmatpush3.msra.mxu1 %v2990_v51  ;;  %vm2094_vm8 = vcmp.lt.f32.partialorder %v6216_v30, 0.0  ;;  %v6219_v62 = vld [vmem:[#allocation69_spill] sm:$0xff] }
 0x23a   : > { %v2140_v24 = vmul.f32 %v2128_v56, %v1828_v46  ;;  %v2129_v13 = vadd.f32 1.0, %v2117_v25  ;;  %v2082_v32 = vsub.f32 1.0, %v2070_v55  ;;  %v2011_v31 = vmul.f32 %v5154_v27, %v1999_v17  ;;  %3637 = vmatprep.subr.mxu1 %v2989_v47  ;;  %v2987_v27 = vld [vmem:[%s5941_s3 + $0x8] sm:$0xff]  ;;  %v6221_v51 = vld [vmem:[#allocation87_spill] sm:$0xff]  ;;  %v6222_v0 = vld [vmem:[#allocation68_spill] sm:$0xff] }
 0x23b   : > { %v1988_v5 = vmul.f32 %v6207_v23, %v1976_v60  ;;  %v2758_v53 = vmul.f32 %v5214_v63, %v2746_v12  ;;  %v2723_v15 = vadd.f32 -1.4531521, %v2711_v40  ;;  %3638 = vmatpush3.msra.mxu1 %v2989_v47  ;;  %v2712_v16 = vmul.f32 1.0614054, %v5272_v10 }
 0x23c   : > { %v2176_v19 = vmul.f32 %v2160_v20, %v2140_v24  ;;  %v2141_v11 = vmul.f32 %v2129_v13, %v1829_v22  ;;  %v2106_v45 = vsub.f32 0.0, %v2082_v32  ;;  %v2071_v33 = vmul.f32 %v6217_v29, %v2011_v31  ;;  %3639 = vmatprep.subr.mxu1 %v2988_v48  ;;  %v6223_v22 = vld [vmem:[#allocation70_spill] sm:$0xff]  ;;  %v6224_v31 = vld [vmem:[#allocation89_spill] sm:$0xff] }
 0x23d   : > { %v2000_v38 = vadd.f32 0.2548296, %v1988_v5  ;;  %v2770_v46 = vadd.f32 -0.28449672, %v2758_v53  ;;  %v2735_v7 = vmul.f32 %v5245_v58, %v2723_v15  ;;  %v1830_v14 = vmul.f32 0.5, %v6218_v39  ;;  %3640 = vmatpush3.msra.mxu1 %v2988_v48  ;;  %v6226_v5 = vld [vmem:[#allocation71_spill] sm:$0xff] }
 0x23e   : > { %3605 = vmatmul.mubr.f32.gmra.mxu1 %v2176_v19  ;;  %v2177_v43 = vmul.f32 %v2162_v49, %v2141_v11  ;;  %v2118_v41 = vsel %vm2094_vm8, %v2106_v45, %v2082_v32  ;;  %v2083_v6 = vsub.f32 1.0, %v2071_v33  ;;  %vm2095_vm9 = vcmp.lt.f32.partialorder %v6219_v62, 0.0  ;;  %3641 = vmatprep.subr.mxu1 %v2987_v27  ;;  %v6225_v49 = vld [vmem:[#allocation100_spill] sm:$0xff] }
 0x23f   : > { %v2130_v61 = vadd.f32 1.0, %v2118_v41  ;;  %v2012_v1 = vmul.f32 %v6207_v23, %v2000_v38  ;;  %v2782_v8 = vmul.f32 %v5214_v63, %v2770_v46  ;;  %v2747_v59 = vadd.f32 1.4214138, %v2735_v7  ;;  %3642 = vmatpush3.msra.mxu1 %v2987_v27  ;;  %v2168_v7 = vpop.permute.xlu1 %2167 }
 0x240   : > { %3607 = vmatprep.mubr.f32.mxu1 %v2177_v43  ;;  %v2107_v57 = vsub.f32 0.0, %v2083_v6  ;;  %v2724_v54 = vadd.f32 -1.4531521, %v2712_v16  ;;  %v2713_v4 = vmul.f32 1.0614054, %v6220_v26  ;;  %v1831_v9 = vmul.f32 0.5, %v6222_v0  ;;  %3643 = vmatprep.subr.mxu1 %v2986_v21 }
 0x241   : > { %v2142_v3 = vmul.f32 %v2130_v61, %v1830_v14  ;;  %v2072_v23 = vmul.f32 %v6221_v51, %v2012_v1  ;;  %v2794_v34 = vadd.f32 0.2548296, %v2782_v8  ;;  %v2759_v52 = vmul.f32 %v5245_v58, %v2747_v59  ;;  %3644 = vmatpush3.msra.mxu1 %v2986_v21  ;;  %v6227_v16 = vld [vmem:[#allocation73_spill] sm:$0xff]  ;;  %v6228_v14 = vld [vmem:[#allocation103_spill] sm:$0xff]  ;;  %v6229_v59 = vld [vmem:[#allocation72_spill] sm:$0xff] }
 0x242   : > { %v2119_v56 = vsel %vm2095_vm9, %v2107_v57, %v2083_v6  ;;  %v2736_v37 = vmul.f32 %v5272_v10, %v2724_v54  ;;  %v2725_v55 = vadd.f32 -1.4531521, %v2713_v4  ;;  %v1832_v25 = vmul.f32 0.5, %v6223_v22 }
 0x243   : > { %v2178_v17 = vmul.f32 %v2164_v35, %v2142_v3  ;;  %v2131_v60 = vadd.f32 1.0, %v2119_v56  ;;  %v2084_v47 = vsub.f32 1.0, %v2072_v23  ;;  %v2806_v20 = vmul.f32 %v5214_v63, %v2794_v34  ;;  %v6230_v3 = vld [vmem:[#allocation92_spill] sm:$0xff]  ;;  %v2951_v34 = vpop.permute.xlu0 %2950 }
 0x244   : > { %v2771_v12 = vadd.f32 -0.28449672, %v2759_v52  ;;  %v2748_v40 = vadd.f32 1.4214138, %v2736_v37  ;;  %v2737_v24 = vmul.f32 %v6220_v26, %v2725_v55  ;;  %v2715_v30 = vmul.f32 1.0614054, %v6225_v49 }
 0x245   : > { %3608 = vmatmul.mubr.f32.gmra.mxu1 %v2178_v17  ;;  %v2143_v13 = vmul.f32 %v2131_v60, %v1831_v9  ;;  %v2108_v32 = vsub.f32 0.0, %v2084_v47  ;;  %v2866_v48 = vmul.f32 %v6224_v31, %v2806_v20  ;;  %vm2096_vm10 = vcmp.lt.f32.partialorder %v6226_v5, 0.0  ;;  %v6231_v52 = vld [vmem:[#allocation74_spill] sm:$0xff]  ;;  %v6232_v60 = vld [vmem:[#allocation4_spill] sm:$0xff] }
 0x246   : > { %v2783_v53 = vmul.f32 %v5245_v58, %v2771_v12  ;;  %v2760_v63 = vmul.f32 %v5272_v10, %v2748_v40  ;;  %v2749_v15 = vadd.f32 1.4214138, %v2737_v24  ;;  %v2727_v29 = vadd.f32 -1.4531521, %v2715_v30  ;;  %v6233_v40 = vld [vmem:[#allocation94_spill] sm:$0xff] }
 0x247   : > { %v2179_v19 = vmul.f32 %v2166_v2, %v2143_v13  ;;  %v2120_v11 = vsel %vm2096_vm10, %v2108_v32, %v2084_v47  ;;  %v2878_v45 = vsub.f32 1.0, %v2866_v48  ;;  %vm2890_vm11 = vcmp.lt.f32.partialorder %v6227_v16, 0.0  ;;  %v6234_v32 = vld [vmem:[#allocation76_spill] sm:$0xff]  ;;  %v6235_v5 = vld [vmem:[#allocation78_spill] sm:$0xff] }
 0x248   : > { %v2132_v33 = vadd.f32 1.0, %v2120_v11  ;;  %v2795_v27 = vadd.f32 0.2548296, %v2783_v53  ;;  %v2772_v38 = vadd.f32 -0.28449672, %v2760_v63  ;;  %v2761_v46 = vmul.f32 %v6220_v26, %v2749_v15 }
 0x249   : > { %3610 = vmatprep.mubr.f32.mxu1 %v2179_v19  ;;  %v2902_v43 = vsub.f32 0.0, %v2878_v45  ;;  %v2739_v39 = vmul.f32 %v6225_v49, %v2727_v29  ;;  %v2714_v41 = vmul.f32 1.0614054, %v6228_v14  ;;  %v2626_v21 = vmul.f32 0.5, %v6229_v59  ;;  %v6236_v19 = vld [vmem:[#allocation99_spill] sm:$0xff] }
 0x24a   : > { %v2144_v6 = vmul.f32 %v2132_v33, %v1832_v25  ;;  %v2807_v61 = vmul.f32 %v5245_v58, %v2795_v27  ;;  %v2784_v1 = vmul.f32 %v5272_v10, %v2772_v38  ;;  %v2773_v8 = vadd.f32 -0.28449672, %v2761_v46  ;;  %v2953_v33 = vpop.permute.xlu1 %2952  ;;  %v6237_v27 = vld [vmem:[#allocation79_spill] sm:$0xff]  ;;  %v6238_v46 = vld [vmem:[#allocation5_spill] sm:$0xff] }
 0x24b   : > { %v2914_v35 = vsel %vm2890_vm11, %v2902_v43, %v2878_v45  ;;  %v2751_v62 = vadd.f32 1.4214138, %v2739_v39  ;;  %v2726_v57 = vadd.f32 -1.4531521, %v2714_v41  ;;  %v2627_v0 = vmul.f32 0.5, %v6231_v52  ;;  %v6242_v52 = vld [vmem:[#allocation81_spill] sm:$0xff] }
 0x24c   : > { %v2180_v54 = vmul.f32 %v2168_v7, %v2144_v6  ;;  %v2926_v4 = vadd.f32 1.0, %v2914_v35  ;;  %v2867_v51 = vmul.f32 %v6230_v3, %v2807_v61  ;;  %v2796_v23 = vadd.f32 0.2548296, %v2784_v1  ;;  %v6239_v61 = vld [vmem:[#allocation82_spill] sm:$0xff] }
 0x24d   : > { %v2785_v9 = vmul.f32 %v6220_v26, %v2773_v8  ;;  %v2763_v58 = vmul.f32 %v6225_v49, %v2751_v62  ;;  %v2738_v56 = vmul.f32 %v6228_v14, %v2726_v57  ;;  %v2716_v47 = vmul.f32 1.0614054, %v6232_v60  ;;  %v6240_v62 = vld [vmem:[#allocation101_spill] sm:$0xff] }
 0x24e   : > { %3611 = vmatmul.mubr.f32.gmra.mxu1 %v2180_v54  ;;  %v2938_v37 = vmul.f32 %v2926_v4, %v2626_v21  ;;  %v2879_v55 = vsub.f32 1.0, %v2867_v51  ;;  %v2808_v17 = vmul.f32 %v5272_v10, %v2796_v23  ;;  %vm2891_vm12 = vcmp.lt.f32.partialorder %v6234_v32, 0.0  ;;  %v2955_v54 = vpop.permute.xlu0 %2954  ;;  %v6241_v23 = vld [vmem:[#allocation6_spill] sm:$0xff] }
 0x24f   : > { %v2797_v20 = vadd.f32 0.2548296, %v2785_v9  ;;  %v2775_v2 = vadd.f32 -0.28449672, %v2763_v58  ;;  %v2750_v22 = vadd.f32 1.4214138, %v2738_v56 }
 0x250   : > { %v2974_v25 = vmul.f32 %v2951_v34, %v2938_v37  ;;  %v2903_v12 = vsub.f32 0.0, %v2879_v55  ;;  %v2868_v24 = vmul.f32 %v6233_v40, %v2808_v17  ;;  %v2728_v13 = vadd.f32 -1.4531521, %v2716_v47 }
 0x251   : > { %v2809_v31 = vmul.f32 %v6220_v26, %v2797_v20  ;;  %v2787_v48 = vmul.f32 %v6225_v49, %v2775_v2  ;;  %v2762_v10 = vmul.f32 %v6228_v14, %v2750_v22  ;;  %v2628_v28 = vmul.f32 0.5, %v6235_v5  ;;  %v2957_v20 = vpop.permute.xlu1 %2956  ;;  %v6243_v2 = vld [vmem:[#allocation88_spill] sm:$0xff] }
 0x252   : > { %3645 = vmatprep.mubr.f32.mxu1 %v2974_v25  ;;  %v2915_v30 = vsel %vm2891_vm12, %v2903_v12, %v2879_v55  ;;  %v2880_v53 = vsub.f32 1.0, %v2868_v24  ;;  %v2740_v63 = vmul.f32 %v6232_v60, %v2728_v13  ;;  %vm2892_vm13 = vcmp.lt.f32.partialorder %v6237_v27, 0.0  ;;  %v5810_v12 = vpop.eup %3822  ;;  %v6244_v24 = vld [vmem:[#allocation12_spill] sm:$0xff] }
 0x253   : > { %v2927_v15 = vadd.f32 1.0, %v2915_v30  ;;  %v2869_v11 = vmul.f32 %v6236_v19, %v2809_v31  ;;  %v2799_v45 = vadd.f32 0.2548296, %v2787_v48  ;;  %v2774_v29 = vadd.f32 -0.28449672, %v2762_v10  ;;  %v6246_v19 = vld [vmem:[#allocation7_spill] sm:$0xff] }
 0x254   : > { %v2904_v26 = vsub.f32 0.0, %v2880_v53  ;;  %v2752_v38 = vadd.f32 1.4214138, %v2740_v63  ;;  %v2717_v7 = vmul.f32 1.0614054, %v6238_v46  ;;  %vm2893_vm14 = vcmp.lt.f32.partialorder %v6239_v61, 0.0 }
 0x255   : > { %v2939_v16 = vmul.f32 %v2927_v15, %v2627_v0  ;;  %v2881_v43 = vsub.f32 1.0, %v2869_v11  ;;  %v2811_v39 = vmul.f32 %v6225_v49, %v2799_v45  ;;  %v2786_v41 = vmul.f32 %v6228_v14, %v2774_v29 }
 0x256   : > { %v2916_v6 = vsel %vm2892_vm13, %v2904_v26, %v2880_v53  ;;  %v2764_v1 = vmul.f32 %v6232_v60, %v2752_v38  ;;  %v2729_v8 = vadd.f32 -1.4531521, %v2717_v7  ;;  %v2718_v49 = vmul.f32 1.0614054, %v6241_v23  ;;  %v6248_v26 = vld [vmem:[#allocation21_spill] sm:$0xff] }
 0x257   : > { %v2975_v59 = vmul.f32 %v2953_v33, %v2939_v16  ;;  %v2928_v21 = vadd.f32 1.0, %v2916_v6  ;;  %v2905_v35 = vsub.f32 0.0, %v2881_v43  ;;  %v2871_v57 = vmul.f32 %v6240_v62, %v2811_v39  ;;  %v2959_v39 = vpop.permute.xlu0 %2958  ;;  %v6251_v62 = vld [vmem:[#allocation96_spill] sm:$0xff] }
 0x258   : > { %v2798_v4 = vadd.f32 0.2548296, %v2786_v41  ;;  %v2776_v3 = vadd.f32 -0.28449672, %v2764_v1  ;;  %v2741_v51 = vmul.f32 %v6238_v46, %v2729_v8  ;;  %v2629_v0 = vmul.f32 0.5, %v6242_v52  ;;  %v6249_v41 = vld [vmem:[#allocation86_spill] sm:$0xff] }
 0x259   : > { %3646 = vmatmul.mubr.f32.vlgmr.msra.gmra.mxu1 %v2975_v59  ;;  %v2940_v34 = vmul.f32 %v2928_v21, %v2628_v28  ;;  %v2917_v9 = vsel %vm2893_vm14, %v2905_v35, %v2881_v43  ;;  %v2883_v58 = vsub.f32 1.0, %v2871_v57  ;;  %vm2895_vm15 = vcmp.lt.f32.partialorder %v6243_v2, 0.0  ;;  %v6245_v28 = vld [vmem:[#allocation83_spill] sm:$0xff]  ;;  %v2961_v21 = vpop.permute.xlu1 %2960 }
 0x25a   : > { %v2929_v56 = vadd.f32 1.0, %v2917_v9  ;;  %v2810_v37 = vmul.f32 %v6228_v14, %v2798_v4  ;;  %v2788_v55 = vmul.f32 %v6232_v60, %v2776_v3  ;;  %v2753_v17 = vadd.f32 1.4214138, %v2741_v51  ;;  %v6250_v1 = vld [vmem:[#allocation91_spill] sm:$0xff] }
 0x25b   : > { %v2976_v47 = vmul.f32 %v2955_v54, %v2940_v34  ;;  %v2907_v22 = vsub.f32 0.0, %v2883_v58  ;;  %v2730_v25 = vadd.f32 -1.4531521, %v2718_v49  ;;  %v2864_v48 = vmul.f32 1.442695, %v5717_v50  ;;  %v6247_v50 = vld [vmem:[#allocation90_spill] sm:$0xff] }
 0x25c   : > { %v2941_v40 = vmul.f32 %v2929_v56, %v2629_v0  ;;  %v2870_v13 = vmul.f32 %v6244_v24, %v2810_v37  ;;  %v2800_v32 = vadd.f32 0.2548296, %v2788_v55  ;;  %v2765_v31 = vmul.f32 %v6238_v46, %v2753_v17 }
 0x25d   : > { %3648 = vmatprep.mubr.f32.mxu1 %v2976_v47  ;;  %v2919_v14 = vsel %vm2895_vm15, %v2907_v22, %v2883_v58  ;;  %v2742_v10 = vmul.f32 %v6241_v23, %v2730_v25  ;;  %v2719_v30 = vmul.f32 1.0614054, %v5632_v18  ;;  %v2631_v53 = vmul.f32 0.5, %v6245_v28  ;;  %v2963_v25 = vpop.permute.xlu0 %2962  ;;  %v6253_v28 = vld [vmem:[#allocation98_spill] sm:$0xff] }
 0x25e   : > { %v2977_v5 = vmul.f32 %v2957_v20, %v2941_v40  ;;  %v2882_v63 = vsub.f32 1.0, %v2870_v13  ;;  %v2812_v15 = vmul.f32 %v6232_v60, %v2800_v32  ;;  %3824 = vpow2.f32 %v6246_v19  ;;  %v6252_v20 = vld [vmem:[#allocation27_spill] sm:$0xff] }
 0x25f   : > { %v2777_v11 = vadd.f32 -0.28449672, %v2765_v31  ;;  %v2754_v45 = vadd.f32 1.4214138, %v2742_v10  ;;  %v2731_v29 = vadd.f32 -1.4531521, %v2719_v30  ;;  %3826 = vpow2.f32 %v2864_v48 }
 0x260   : > { %3649 = vmatmul.mubr.f32.gmra.mxu1 %v2977_v5  ;;  %v2931_v33 = vadd.f32 1.0, %v2919_v14  ;;  %vm2894_vm0 = vcmp.lt.f32.partialorder %v6247_v50, 0.0  ;;  %v2906_v27 = vsub.f32 0.0, %v2882_v63  ;;  %v2872_v38 = vmul.f32 %v6248_v26, %v2812_v15  ;;  %v6255_v50 = vld [vmem:[#allocation104_spill] sm:$0xff] }
 0x261   : > { %v2789_v7 = vmul.f32 %v6238_v46, %v2777_v11  ;;  %v2766_v16 = vmul.f32 %v6241_v23, %v2754_v45  ;;  %v2743_v43 = vmul.f32 %v5632_v18, %v2731_v29  ;;  %v2720_v60 = vmul.f32 1.0614054, %v5674_v36  ;;  %v6254_v45 = vld [vmem:[#allocation93_spill] sm:$0xff] }
 0x262   : > { %v2630_v6 = vmul.f32 0.5, %v6249_v41  ;;  %v2918_v61 = vsel %vm2894_vm0, %v2906_v27, %v2882_v63  ;;  %v2632_v8 = vmul.f32 0.5, %v6250_v1  ;;  %v2884_v59 = vsub.f32 1.0, %v2872_v38 }
 0x263   : > { %v2930_v35 = vadd.f32 1.0, %v2918_v61  ;;  %vm2896_vm2 = vcmp.lt.f32.partialorder %v6251_v62, 0.0  ;;  %v2801_v57 = vadd.f32 0.2548296, %v2789_v7  ;;  %v2778_v54 = vadd.f32 -0.28449672, %v2766_v16  ;;  %v2965_v16 = vpop.permute.xlu1 %2964 }
 0x264   : > { %v2943_v4 = vmul.f32 %v2931_v33, %v2631_v53  ;;  %v2908_v3 = vsub.f32 0.0, %v2884_v59  ;;  %v2755_v51 = vadd.f32 1.4214138, %v2743_v43  ;;  %v2732_v49 = vadd.f32 -1.4531521, %v2720_v60  ;;  %v6257_v62 = vld [vmem:[#allocation17_spill] sm:$0xff] }
 0x265   : > { %v2942_v34 = vmul.f32 %v2930_v35, %v2630_v6  ;;  %v2813_v52 = vmul.f32 %v6238_v46, %v2801_v57  ;;  %v2790_v0 = vmul.f32 %v6241_v23, %v2778_v54  ;;  %v2721_v9 = vmul.f32 1.0614054, %v5810_v12 }
 0x266   : > { %v2979_v58 = vmul.f32 %v2961_v21, %v2943_v4  ;;  %v2920_v56 = vsel %vm2896_vm2, %v2908_v3, %v2884_v59  ;;  %v2767_v37 = vmul.f32 %v5632_v18, %v2755_v51  ;;  %v2744_v55 = vmul.f32 %v5674_v36, %v2732_v49  ;;  %v6258_v51 = vld [vmem:[#allocation102_spill] sm:$0xff] }
 0x267   : > { %v2978_v17 = vmul.f32 %v2959_v39, %v2942_v34  ;;  %v2932_v47 = vadd.f32 1.0, %v2920_v56  ;;  %v2873_v2 = vmul.f32 %v6252_v20, %v2813_v52  ;;  %v2802_v22 = vadd.f32 0.2548296, %v2790_v0  ;;  %v6259_v56 = vld [vmem:[#allocation3_spill] sm:$0xff] }
 0x268   : > { %v2779_v40 = vadd.f32 -0.28449672, %v2767_v37  ;;  %v2756_v24 = vadd.f32 1.4214138, %v2744_v55  ;;  %v2733_v13 = vadd.f32 -1.4531521, %v2721_v9  ;;  %v2969_v37 = vpop.permute.xlu1 %2968 }
 0x269   : > { %3651 = vmatprep.mubr.f32.mxu1 %v2978_v17  ;;  %v2944_v46 = vmul.f32 %v2932_v47, %v2632_v8  ;;  %v2885_v32 = vsub.f32 1.0, %v2873_v2  ;;  %v2814_v31 = vmul.f32 %v6241_v23, %v2802_v22  ;;  %vm2897_vm3 = vcmp.lt.f32.partialorder %v6253_v28, 0.0  ;;  %v6260_v47 = vld [vmem:[#allocation14_spill] sm:$0xff] }
 0x26a   : > { %3652 = vmatmul.mubr.f32.gmra.mxu1 %v2979_v58  ;;  %v2791_v14 = vmul.f32 %v5632_v18, %v2779_v40  ;;  %v2768_v10 = vmul.f32 %v5674_v36, %v2756_v24  ;;  %v2745_v30 = vmul.f32 %v5810_v12, %v2733_v13  ;;  %v2633_v29 = vmul.f32 0.5, %v6254_v45 }
 0x26b   : > { %v2980_v5 = vmul.f32 %v2963_v25, %v2944_v46  ;;  %v2909_v53 = vsub.f32 0.0, %v2885_v32  ;;  %v2874_v63 = vmul.f32 %v5621_v42, %v2814_v31  ;;  %v3825_v15 = vpop.eup %3824  ;;  %vm2898_vm4 = vcmp.lt.f32.partialorder %v6255_v50, 0.0  ;;  %v6256_v42 = vld [vmem:[#allocation97_spill] sm:$0xff]  ;;  %v6261_v46 = vld [vmem:[#allocation31_spill] sm:$0xff] }
 0x26c   : > { %v2803_v48 = vadd.f32 0.2548296, %v2791_v14  ;;  %v2780_v19 = vadd.f32 -0.28449672, %v2768_v10  ;;  %v2757_v11 = vadd.f32 1.4214138, %v2745_v30  ;;  %v3827_v34 = vpop.eup %3826  ;;  %v2973_v28 = vpop.permute.xlu1 %2972 }
 0x26d   : > { %v2921_v23 = vsel %vm2897_vm3, %v2909_v53, %v2885_v32  ;;  %3654 = vmatprep.mubr.f32.mxu1 %v2980_v5  ;;  %v2886_v33 = vsub.f32 1.0, %v2874_v63  ;;  %v2634_v43 = vmul.f32 0.5, %v6256_v42  ;;  %vm2899_vm5 = vcmp.lt.f32.partialorder %v6257_v62, 0.0  ;;  %v6262_v14 = vld [vmem:[#allocation105_spill] sm:$0xff] }
 0x26e   : > { %v2933_v27 = vadd.f32 1.0, %v2921_v23  ;;  %v2815_v26 = vmul.f32 %v5632_v18, %v2803_v48  ;;  %v2792_v38 = vmul.f32 %v5674_v36, %v2780_v19  ;;  %v2769_v7 = vmul.f32 %v5810_v12, %v2757_v11  ;;  %v2967_v18 = vpop.permute.xlu0 %2966 }
 0x26f   : > { %v2910_v60 = vsub.f32 0.0, %v2886_v33  ;;  %v2635_v49 = vmul.f32 0.5, %v6258_v51  ;;  %vm2900_vm6 = vcmp.lt.f32.partialorder %v6259_v56, 0.0  ;;  %v2636_v20 = vmul.f32 0.5, %v6260_v47 }
 0x270   : > { %v2945_v39 = vmul.f32 %v2933_v27, %v2633_v29  ;;  %v2875_v41 = vmul.f32 %v5652_v44, %v2815_v26  ;;  %v2804_v6 = vadd.f32 0.2548296, %v2792_v38  ;;  %v2781_v61 = vadd.f32 -0.28449672, %v2769_v7 }
 0x271   : > { %v2922_v1 = vsel %vm2898_vm4, %v2910_v60, %v2886_v33  ;;  %vm2901_vm7 = vcmp.lt.f32.partialorder %v6261_v46, 0.0 }
 0x272   : > { %v2981_v8 = vmul.f32 %v2965_v16, %v2945_v39  ;;  %v2934_v59 = vadd.f32 1.0, %v2922_v1  ;;  %v2887_v21 = vsub.f32 1.0, %v2875_v41  ;;  %v2816_v35 = vmul.f32 %v5674_v36, %v2804_v6  ;;  %v2971_v13 = vpop.permute.xlu0 %2970 }
 0x273   : > { %v2793_v57 = vmul.f32 %v5810_v12, %v2781_v61 }
 0x274   : > { %v2946_v54 = vmul.f32 %v2934_v59, %v2634_v43  ;;  %v2911_v4 = vsub.f32 0.0, %v2887_v21  ;;  %3655 = vmatmul.mubr.f32.gmra.mxu1 %v2981_v8  ;;  %v2876_v3 = vmul.f32 %v3825_v15, %v2816_v35 }
 0x275   : > { %v2805_v44 = vadd.f32 0.2548296, %v2793_v57 }
 0x276   : > { %v2982_v52 = vmul.f32 %v2967_v18, %v2946_v54  ;;  %v2923_v0 = vsel %vm2899_vm5, %v2911_v4, %v2887_v21  ;;  %v2888_v9 = vsub.f32 1.0, %v2876_v3 }
 0x277   : > { %v2935_v58 = vadd.f32 1.0, %v2923_v0  ;;  %v2817_v36 = vmul.f32 %v5810_v12, %v2805_v44  ;;  %v2637_v12 = vmul.f32 0.5, %v6262_v14 }
 0x278   : > { %3657 = vmatprep.mubr.f32.mxu1 %v2982_v52  ;;  %v2912_v55 = vsub.f32 0.0, %v2888_v9 }
 0x279   : > { %v2947_v17 = vmul.f32 %v2935_v58, %v2635_v49  ;;  %v2877_v2 = vmul.f32 %v3827_v34, %v2817_v36 }
 0x27a   : > { %v2924_v22 = vsel %vm2900_vm6, %v2912_v55, %v2888_v9 }
 0x27b   : > { %v2983_v25 = vmul.f32 %v2969_v37, %v2947_v17  ;;  %v2936_v40 = vadd.f32 1.0, %v2924_v22  ;;  %v2889_v24 = vsub.f32 1.0, %v2877_v2 }
 0x27d   : > { %v2948_v32 = vmul.f32 %v2936_v40, %v2636_v20  ;;  %v2913_v31 = vsub.f32 0.0, %v2889_v24  ;;  %3658 = vmatmul.mubr.f32.gmra.mxu1 %v2983_v25 }
 0x27f   : > { %v2984_v10 = vmul.f32 %v2971_v13, %v2948_v32  ;;  %v2925_v30 = vsel %vm2901_vm7, %v2913_v31, %v2889_v24 }
 0x280   : > { %v2937_v5 = vadd.f32 1.0, %v2925_v30 }
 0x281   : > { %3660 = vmatprep.mubr.f32.mxu1 %v2984_v10 }
 0x282   : > { %v2949_v53 = vmul.f32 %v2937_v5, %v2637_v12 }
 0x284   : > { %v2985_v63 = vmul.f32 %v2973_v28, %v2949_v53 }
 0x286   : > { %3661 = vmatmul.mubr.f32.gmra.mxu1 %v2985_v63 }
 0x292   : > { %v3547_v15 = vpop.f32.mrf.mxu1 }
 0x293   : > { %1518 = vst.msk [vmem:[%s5861_s21 + $0x8] sm:$0xff] %vm243_vm1, %v3547_v15 }
 0x294   : > { %v1458_v48 = vpop.f32.mrf.mxu1 }
 0x295   : > { %1517 = vst.msk [vmem:[%s5861_s21] sm:$0xff] %vm243_vm1, %v1458_v48 }
 0x2b3   : > { %v3550_v19 = vpop.f32.mrf.mxu1 }
 0x2b4   : > { %1520 = vst.msk [vmem:[%s5861_s21 + $0x18] sm:$0xff] %vm243_vm1, %v3550_v19 }
 0x2b5   : > { %v1468_v11 = vpop.f32.mrf.mxu1 }
 0x2b6   : > { %1519 = vst.msk [vmem:[%s5861_s21 + $0x10] sm:$0xff] %vm243_vm1, %v1468_v11 }
 0x2bc   : > { %v3553_v45 = vpop.f32.mrf.mxu1 }
 0x2bd   : > { %1522 = vst.msk [vmem:[%s5861_s21 + $0x28] sm:$0xff] %vm243_vm1, %v3553_v45 }
 0x2be   : > { %v1478_v29 = vpop.f32.mrf.mxu1 }
 0x2bf   : > { %1521 = vst.msk [vmem:[%s5861_s21 + $0x20] sm:$0xff] %vm243_vm1, %v1478_v29 }
 0x2c3   : > { %v3556_v23 = vpop.f32.mrf.mxu1 }
 0x2c4   : > { %1524 = vst.msk [vmem:[%s5861_s21 + $0x38] sm:$0xff] %vm243_vm1, %v3556_v23 }
 0x2c5   : > { %v1488_v33 = vpop.f32.mrf.mxu1 }
 0x2c6   : > { %1523 = vst.msk [vmem:[%s5861_s21 + $0x30] sm:$0xff] %vm243_vm1, %v1488_v33 }
 0x2ce   : > { %v3559_v50 = vpop.f32.mrf.mxu1 }
 0x2cf   : > { %1526 = vst.msk [vmem:[%s5861_s21 + $0x48] sm:$0xff] %vm243_vm1, %v3559_v50 }
 0x2d0   : > { %v1498_v27 = vpop.f32.mrf.mxu1 }
 0x2d1   : > { %1525 = vst.msk [vmem:[%s5861_s21 + $0x40] sm:$0xff] %vm243_vm1, %v1498_v27 }
 0x2d7   : > { %v3562_v26 = vpop.f32.mrf.mxu1 }
 0x2d8   : > { %1528 = vst.msk [vmem:[%s5861_s21 + $0x58] sm:$0xff] %vm243_vm1, %v3562_v26 }
 0x2d9   : > { %v1508_v38 = vpop.f32.mrf.mxu1 }
 0x2da   : > { %1527 = vst.msk [vmem:[%s5861_s21 + $0x50] sm:$0xff] %vm243_vm1, %v1508_v38 }
 0x2e0   : > { %v3597_v7 = vpop.f32.mrf.mxu1 }
 0x2e1   : > { %2323 = vst.msk [vmem:[%s5861_s21 + $0x68] sm:$0xff] %vm243_vm1, %v3597_v7 }
 0x2e2   : > { %v2263_v16 = vpop.f32.mrf.mxu1 }
 0x2e3   : > { %2322 = vst.msk [vmem:[%s5861_s21 + $0x60] sm:$0xff] %vm243_vm1, %v2263_v16 }
 0x2e9   : > { %v3600_v42 = vpop.f32.mrf.mxu1 }
 0x2ea   : > { %2325 = vst.msk [vmem:[%s5861_s21 + $0x78] sm:$0xff] %vm243_vm1, %v3600_v42 }
 0x2eb   : > { %v2273_v43 = vpop.f32.mrf.mxu1 }
 0x2ec   : > { %2324 = vst.msk [vmem:[%s5861_s21 + $0x70] sm:$0xff] %vm243_vm1, %v2273_v43 }
 0x2f2   : > { %v3603_v60 = vpop.f32.mrf.mxu1 }
 0x2f3   : > { %2327 = vst.msk [vmem:[%s5861_s21 + $0x88] sm:$0xff] %vm243_vm1, %v3603_v60 }
 0x2f4   : > { %v2283_v39 = vpop.f32.mrf.mxu1 }
 0x2f5   : > { %2326 = vst.msk [vmem:[%s5861_s21 + $0x80] sm:$0xff] %vm243_vm1, %v2283_v39 }
 0x2fe   : > { %v3606_v41 = vpop.f32.mrf.mxu1 }
 0x2ff   : > { %2329 = vst.msk [vmem:[%s5861_s21 + $0x98] sm:$0xff] %vm243_vm1, %v3606_v41 }
 0x300   : > { %v2293_v6 = vpop.f32.mrf.mxu1 }
 0x301   : > { %2328 = vst.msk [vmem:[%s5861_s21 + $0x90] sm:$0xff] %vm243_vm1, %v2293_v6 }
 0x305   : > { %v3609_v61 = vpop.f32.mrf.mxu1 }
 0x306   : > { %2331 = vst.msk [vmem:[%s5861_s21 + $0xa8] sm:$0xff] %vm243_vm1, %v3609_v61 }
 0x307   : > { %v2303_v1 = vpop.f32.mrf.mxu1 }
 0x308   : > { %2330 = vst.msk [vmem:[%s5861_s21 + $0xa0] sm:$0xff] %vm243_vm1, %v2303_v1 }
 0x30e   : > { %v3612_v8 = vpop.f32.mrf.mxu1 }
 0x30f   : > { %2333 = vst.msk [vmem:[%s5861_s21 + $0xb8] sm:$0xff] %vm243_vm1, %v3612_v8 }
 0x310   : > { %v2313_v59 = vpop.f32.mrf.mxu1 }
 0x311   : > { %2332 = vst.msk [vmem:[%s5861_s21 + $0xb0] sm:$0xff] %vm243_vm1, %v2313_v59 }
 0x319   : > { %v3647_v21 = vpop.f32.mrf.mxu1 }
 0x31a   : > { %3128 = vst.msk [vmem:[%s5861_s21 + $0xc8] sm:$0xff] %vm243_vm1, %v3647_v21 }
 0x31b   : > { %v3068_v35 = vpop.f32.mrf.mxu1 }
 0x31c   : > { %3127 = vst.msk [vmem:[%s5861_s21 + $0xc0] sm:$0xff] %vm243_vm1, %v3068_v35 }
 0x320   : > { %v3650_v18 = vpop.f32.mrf.mxu1 }
 0x321   : > { %3130 = vst.msk [vmem:[%s5861_s21 + $0xd8] sm:$0xff] %vm243_vm1, %v3650_v18 }
 0x322   : > { %v3078_v62 = vpop.f32.mrf.mxu1 }
 0x323   : > { %3129 = vst.msk [vmem:[%s5861_s21 + $0xd0] sm:$0xff] %vm243_vm1, %v3078_v62 }
 0x32a   : > { %v3653_v57 = vpop.f32.mrf.mxu1 }
 0x32b   : > { %3132 = vst.msk [vmem:[%s5861_s21 + $0xe8] sm:$0xff] %vm243_vm1, %v3653_v57 }
 0x32c   : > { %v3088_v54 = vpop.f32.mrf.mxu1 }
 0x32d   : > { %3131 = vst.msk [vmem:[%s5861_s21 + $0xe0] sm:$0xff] %vm243_vm1, %v3088_v54 }
 0x334   : > { %v3656_v4 = vpop.f32.mrf.mxu1 }
 0x335   : > { %3134 = vst.msk [vmem:[%s5861_s21 + $0xf8] sm:$0xff] %vm243_vm1, %v3656_v4 }
 0x336   : > { %v3098_v3 = vpop.f32.mrf.mxu1 }
 0x337   : > { %3133 = vst.msk [vmem:[%s5861_s21 + $0xf0] sm:$0xff] %vm243_vm1, %v3098_v3 }
 0x33d   : > { %v3659_v51 = vpop.f32.mrf.mxu1 }
 0x33e   : > { %3136 = vst.msk [vmem:[%s5861_s21 + $0x108] sm:$0xff] %vm243_vm1, %v3659_v51 }
 0x33f   : > { %v3108_v49 = vpop.f32.mrf.mxu1 }
 0x340   : > { %3135 = vst.msk [vmem:[%s5861_s21 + $0x100] sm:$0xff] %vm243_vm1, %v3108_v49 }
 0x346   : > { %v3662_v44 = vpop.f32.mrf.mxu1 }
 0x347   : > { %3138 = vst.msk [vmem:[%s5861_s21 + $0x118] sm:$0xff] %vm243_vm1, %v3662_v44 }
 0x348   : > { %v3118_v34 = vpop.f32.mrf.mxu1 }
 0x349   : > { %3137 = vst.msk [vmem:[%s5861_s21 + $0x110] sm:$0xff] %vm243_vm1, %v3118_v34 }
 0x34a PF: > { %s14_s15 = sadd.s32 1, %s3858_s15  }
 0x34b   : > { %p11_p4 = scmp.ge.s32.totalorder %s14_s15, 4  }
 0x34d   :  { %13 = sbr.rel (!%p11_p4) target bundleno = 1 (0x1), region = 66 }

</bundles_post_ra>
